<compile_context>
chip_gen: v5e
topology: v5e:2x2
jax: 0.10.0
libtpu: 0.0.40
codegen_flags: <defaults>
</compile_context>

<pallas_src>
import functools

import jax
import jax.numpy as jnp
from jax import lax
from jax.experimental import pallas as pl
from jax.experimental.pallas import tpu as pltpu


_EMB_NAMES = (
    "cell_embedding",
    "assay_embedding",
    "positions_25bp_embedding",
    "positions_250bp_embedding",
    "positions_5kbp_embedding",
)


def _round_up(x, m):
    return (x + m - 1) // m * m


def fused_mlp_kernel(idx_ref, tblT_ref, b1_ref, w2T_ref, b2_ref, w3_ref, b3_ref,
                     o_ref, *, offsets):
    """One batch tile of the fused gather + MLP (transposed, batch-on-lanes).

    idx_ref  : (5, TB)      int32 raw indices (per-table offsets are static)
    tblT_ref : (H, N_pad)   f32, fused per-table embeddings pre-projected
                            through W1, transposed, zero-padded to N_pad lanes
    b1_ref   : (H, 1);  w2T_ref : (H, H);  b2_ref : (H, 1)
    w3_ref   : (1, H)   linear_out weights (row);  b3_ref : (1, 1)
    o_ref    : (1, TB)  f32 (lane-dense output block)
    """
    n_pad = tblT_ref.shape[1]
    tb = idx_ref.shape[1]

    idx = idx_ref[...]                                          # (5, TB)
    iota = lax.broadcasted_iota(jnp.int32, (n_pad, tb), 0)      # table rows on sublanes

    # One-hot via boolean ORs + a single cast.  Post-offset ranges are
    # disjoint, so at most one compare per (row, batch) position is true.
    # (Padded batch columns hold index 0 for every table; those hit five
    # distinct rows {offsets[k]} and are sliced off in the wrapper.)
    hit = iota == (idx[0:1, :] + offsets[0])
    for k in range(1, 5):
        hit = hit | (iota == (idx[k:k + 1, :] + offsets[k]))
    m = hit.astype(jnp.float32)                                 # (N_pad, TB)

    # h1^T = tbl^T @ m^T + b1  ==  relu-pre of (gather+concat) @ W1 + b1, transposed
    h1 = jnp.dot(tblT_ref[...], m, preferred_element_type=jnp.float32) + b1_ref[...]
    h1 = jnp.maximum(h1, 0.0)
    # dropout(0.5) -> identity (eval mode)
    h2 = jnp.dot(w2T_ref[...], h1, preferred_element_type=jnp.float32) + b2_ref[...]
    h2 = jnp.maximum(h2, 0.0)
    # Output layer: (1, H) @ (H, TB) -> (1, TB), lane-dense store.
    out = jnp.dot(w3_ref[...], h2, preferred_element_type=jnp.float32) + b3_ref[...]
    o_ref[...] = out.astype(o_ref.dtype)


def encode_imputation_forward(x_idx, params, *, tb=1024):
    """Fused forward pass. x_idx: [B, 5] integer indices -> [B, 1] float32."""
    tables = [params[n] for n in _EMB_NAMES]
    w1 = params["w1"]
    H = w1.shape[1]

    # Fold W1 into the frozen embedding tables: proj_k = table_k @ W1[rows_k].
    projs, row = [], 0
    for t in tables:
        d = t.shape[1]
        projs.append(t @ w1[row:row + d])                       # (n_k, H)
        row += d
    big_tbl = jnp.concatenate(projs, axis=0)                    # (N_tot, H)
    n_tot = big_tbl.shape[0]
    n_pad = max(128, _round_up(n_tot, 128))
    if n_pad != n_tot:
        big_tbl = jnp.concatenate(
            [big_tbl, jnp.zeros((n_pad - n_tot, H), big_tbl.dtype)], axis=0)
    tbl_T = big_tbl.T                                           # (H, N_pad)

    # Per-table row offsets as compile-time constants (folded into kernel compares).
    sizes = [t.shape[0] for t in tables]
    offsets = tuple(int(sum(sizes[:k])) for k in range(5))

    B = x_idx.shape[0]
    tb_eff = min(tb, _round_up(B, 128))
    tb_eff = _round_up(tb_eff, 128)
    B_pad = _round_up(B, tb_eff)

    # Transposed index layout: (5, B_pad), lane-dense DMA of tb indices per row.
    idx_t = x_idx.astype(jnp.int32).T                           # (5, B)
    if B_pad != B:
        idx_t = jnp.concatenate(
            [idx_t, jnp.zeros((5, B_pad - B), jnp.int32)], axis=1)

    w2_T = params["w2"].T                                       # (H, H)
    b1_col = params["b1"].reshape(H, 1)
    b2_col = params["b2"].reshape(H, 1)
    w3_row = params["w3"].reshape(1, H)
    b3 = params["b3"].reshape(1, 1)

    # Conservative VMEM budget check for the resident-table design (double-
    # buffered inputs + batch-tile buffers must fit even on v7x's 64 MiB).
    resident_bytes = 4 * (tbl_T.size + w2_T.size + 3 * H + 1)
    tile_bytes = 4 * (5 * tb_eff + tb_eff)
    assert 2 * (resident_bytes + tile_bytes) < 16 * 1024 * 1024, (
        "fused table too large for resident-in-VMEM design; tile it instead")

    grid = (B_pad // tb_eff,)
    kernel = functools.partial(fused_mlp_kernel, offsets=offsets)

    out = pl.pallas_call(
        kernel,
        out_shape=jax.ShapeDtypeStruct((1, B_pad), jnp.float32),
        grid_spec=pltpu.PrefetchScalarGridSpec(
            num_scalar_prefetch=0,
            grid=grid,
            in_specs=[
                pl.BlockSpec((5, tb_eff), lambda i: (0, i)),    # indices (batch on lanes)
                pl.BlockSpec((H, n_pad), lambda i: (0, 0)),     # fused projected tables^T (resident)
                pl.BlockSpec((H, 1), lambda i: (0, 0)),         # b1 (column)
                pl.BlockSpec((H, H), lambda i: (0, 0)),         # w2^T
                pl.BlockSpec((H, 1), lambda i: (0, 0)),         # b2 (column)
                pl.BlockSpec((1, H), lambda i: (0, 0)),         # w3 (row)
                pl.BlockSpec((1, 1), lambda i: (0, 0)),         # b3
            ],
            out_specs=pl.BlockSpec((1, tb_eff), lambda i: (0, i)),  # lane-dense output
        ),
        compiler_params=pltpu.CompilerParams(
            dimension_semantics=("parallel",),
        ),
    )(idx_t, tbl_T, b1_col, w2_T, b2_col, w3_row, b3)

    return out[0, :B].reshape(B, 1)


def reference_forward(x_idx, params):
    """Pure-JAX reference (unfused) for correctness check."""
    cell = params["cell_embedding"][x_idx[:, 0]]
    assay = params["assay_embedding"][x_idx[:, 1]]
    p25 = params["positions_25bp_embedding"][x_idx[:, 2]]
    p250 = params["positions_250bp_embedding"][x_idx[:, 3]]
    p5k = params["positions_5kbp_embedding"][x_idx[:, 4]]
    inputs = jnp.concatenate((cell, assay, p25, p250, p5k), axis=1)
    h1 = jnp.maximum(inputs @ params["w1"] + params["b1"], 0.0)
    h2 = jnp.maximum(h1 @ params["w2"] + params["b2"], 0.0)
    return h2 @ params["w3"] + params["b3"]


def make_params(key, *, n_cells, cell_dim, n_assays, assay_dim,
                n_25bp, dim_25bp, n_250bp, dim_250bp, n_5kbp, dim_5kbp,
                n_hidden):
    keys = jax.random.split(key, 11)
    in_features = cell_dim + assay_dim + dim_25bp + dim_250bp + dim_5kbp

    def lin_init(kw, kb, fan_in, fan_out):
        # mimic PyTorch nn.Linear default init: U(-1/sqrt(fan_in), 1/sqrt(fan_in))
        bound = 1.0 / jnp.sqrt(jnp.float32(fan_in))
        w = jax.random.uniform(kw, (fan_in, fan_out), jnp.float32, -bound, bound)
        b = jax.random.uniform(kb, (1, fan_out), jnp.float32, -bound, bound)
        return w, b

    w1, b1 = lin_init(keys[5], keys[6], in_features, n_hidden)
    w2, b2 = lin_init(keys[7], keys[8], n_hidden, n_hidden)
    w3, b3 = lin_init(keys[9], keys[10], n_hidden, 1)

    return {
        "cell_embedding": jax.random.normal(keys[0], (n_cells, cell_dim), jnp.float32),
        "assay_embedding": jax.random.normal(keys[1], (n_assays, assay_dim), jnp.float32),
        "positions_25bp_embedding": jax.random.normal(keys[2], (n_25bp, dim_25bp), jnp.float32),
        "positions_250bp_embedding": jax.random.normal(keys[3], (n_250bp, dim_250bp), jnp.float32),
        "positions_5kbp_embedding": jax.random.normal(keys[4], (n_5kbp, dim_5kbp), jnp.float32),
        "w1": w1, "b1": b1, "w2": w2, "b2": b2, "w3": w3, "b3": b3,
    }


if __name__ == "__main__":
    key = jax.random.PRNGKey(0)
    pkey, ikey = jax.random.split(key)

    # Small, deterministic config consistent with the module.
    n_cells, cell_dim = 8, 16
    n_assays, assay_dim = 6, 16
    n_25bp, dim_25bp = 64, 16
    n_250bp, dim_250bp = 32, 8
    n_5kbp, dim_5kbp = 16, 8
    n_hidden = 32
    B = 2048   # tb=1024 -> 2 grid steps: serial pair on v5e/v6e, one per TC on v7x

    params = make_params(
        pkey,
        n_cells=n_cells, cell_dim=cell_dim,
        n_assays=n_assays, assay_dim=assay_dim,
        n_25bp=n_25bp, dim_25bp=dim_25bp,
        n_250bp=n_250bp, dim_250bp=dim_250bp,
        n_5kbp=n_5kbp, dim_5kbp=dim_5kbp,
        n_hidden=n_hidden,
    )

    ikeys = jax.random.split(ikey, 5)
    x_idx = jnp.stack(
        [
            jax.random.randint(ikeys[0], (B,), 0, n_cells, jnp.int32),
            jax.random.randint(ikeys[1], (B,), 0, n_assays, jnp.int32),
            jax.random.randint(ikeys[2], (B,), 0, n_25bp, jnp.int32),
            jax.random.randint(ikeys[3], (B,), 0, n_250bp, jnp.int32),
            jax.random.randint(ikeys[4], (B,), 0, n_5kbp, jnp.int32),
        ],
        axis=1,
    )  # [B, 5] int32 index matrix, like the PyTorch module's `x`

    out = encode_imputation_forward(x_idx, params, tb=1024)
    out = jax.block_until_ready(out)

    ref = reference_forward(x_idx, params)
    assert out.shape == (B, 1)
    assert jnp.allclose(out, ref, atol=1e-4, rtol=1e-4), "Pallas output mismatch vs reference"

    print("KERNEL_OK")
</pallas_src>

<mosaic_0001>
module attributes {stable_mosaic.version = 11 : i64} {
  func.func @fused_mlp_kernel(%arg0: i32, %arg1: memref<5x1024xi32, #tpu.memory_space<vmem>>, %arg2: memref<32x128xf32, #tpu.memory_space<vmem>>, %arg3: memref<32x1xf32, #tpu.memory_space<vmem>>, %arg4: memref<32x32xf32, #tpu.memory_space<vmem>>, %arg5: memref<32x1xf32, #tpu.memory_space<vmem>>, %arg6: memref<1x32xf32, #tpu.memory_space<vmem>>, %arg7: memref<1x1xf32, #tpu.memory_space<vmem>>, %arg8: memref<1x1024xf32, #tpu.memory_space<vmem>>) attributes {dimension_semantics = [#tpu.dimension_semantics<parallel>], iteration_bounds = array<i64: 2>, scalar_prefetch = 0 : i64, scratch_operands = 0 : i64, tpu.core_type = #tpu.core_type<tc>, window_params = [{transform_indices = @transform_0, window_bounds = array<i64: 5, 1024>}, {pipeline_mode = #tpu.pipeline_mode<synchronous>, transform_indices = @transform_1, window_bounds = array<i64: 32, 128>}, {pipeline_mode = #tpu.pipeline_mode<synchronous>, transform_indices = @transform_2, window_bounds = array<i64: 32, 1>}, {pipeline_mode = #tpu.pipeline_mode<synchronous>, transform_indices = @transform_3, window_bounds = array<i64: 32, 32>}, {pipeline_mode = #tpu.pipeline_mode<synchronous>, transform_indices = @transform_4, window_bounds = array<i64: 32, 1>}, {pipeline_mode = #tpu.pipeline_mode<synchronous>, transform_indices = @transform_5, window_bounds = array<i64: 1, 32>}, {pipeline_mode = #tpu.pipeline_mode<synchronous>, transform_indices = @transform_6, window_bounds = array<i64: 1, 1>}, {transform_indices = @transform_7, window_bounds = array<i64: 1, 1024>}]} {
    %c0 = arith.constant 0 : index
    %c0_0 = arith.constant 0 : index
    %0 = vector.load %arg1[%c0, %c0_0] : memref<5x1024xi32, #tpu.memory_space<vmem>>, vector<5x1024xi32>
    %1 = tpu.iota {dimensions = array<i32: 0>} : vector<128x1024xi32>
    %2 = vector.extract_strided_slice %0 {offsets = [0, 0], sizes = [1, 1024], strides = [1, 1]} : vector<5x1024xi32> to vector<1x1024xi32>
    %c0_i32 = arith.constant 0 : i32
    %3 = vector.broadcast %c0_i32 : i32 to vector<1x1024xi32>
    %4 = arith.addi %2, %3 : vector<1x1024xi32>
    %5 = vector.broadcast %4 : vector<1x1024xi32> to vector<128x1024xi32>
    %6 = arith.cmpi eq, %1, %5 : vector<128x1024xi32>
    %7 = vector.extract_strided_slice %0 {offsets = [1, 0], sizes = [1, 1024], strides = [1, 1]} : vector<5x1024xi32> to vector<1x1024xi32>
    %c8_i32 = arith.constant 8 : i32
    %8 = vector.broadcast %c8_i32 : i32 to vector<1x1024xi32>
    %9 = arith.addi %7, %8 : vector<1x1024xi32>
    %10 = vector.broadcast %9 : vector<1x1024xi32> to vector<128x1024xi32>
    %11 = arith.cmpi eq, %1, %10 : vector<128x1024xi32>
    %12 = arith.ori %6, %11 : vector<128x1024xi1>
    %13 = vector.extract_strided_slice %0 {offsets = [2, 0], sizes = [1, 1024], strides = [1, 1]} : vector<5x1024xi32> to vector<1x1024xi32>
    %c14_i32 = arith.constant 14 : i32
    %14 = vector.broadcast %c14_i32 : i32 to vector<1x1024xi32>
    %15 = arith.addi %13, %14 : vector<1x1024xi32>
    %16 = vector.broadcast %15 : vector<1x1024xi32> to vector<128x1024xi32>
    %17 = arith.cmpi eq, %1, %16 : vector<128x1024xi32>
    %18 = arith.ori %12, %17 : vector<128x1024xi1>
    %19 = vector.extract_strided_slice %0 {offsets = [3, 0], sizes = [1, 1024], strides = [1, 1]} : vector<5x1024xi32> to vector<1x1024xi32>
    %c78_i32 = arith.constant 78 : i32
    %20 = vector.broadcast %c78_i32 : i32 to vector<1x1024xi32>
    %21 = arith.addi %19, %20 : vector<1x1024xi32>
    %22 = vector.broadcast %21 : vector<1x1024xi32> to vector<128x1024xi32>
    %23 = arith.cmpi eq, %1, %22 : vector<128x1024xi32>
    %24 = arith.ori %18, %23 : vector<128x1024xi1>
    %25 = vector.extract_strided_slice %0 {offsets = [4, 0], sizes = [1, 1024], strides = [1, 1]} : vector<5x1024xi32> to vector<1x1024xi32>
    %c110_i32 = arith.constant 110 : i32
    %26 = vector.broadcast %c110_i32 : i32 to vector<1x1024xi32>
    %27 = arith.addi %25, %26 : vector<1x1024xi32>
    %28 = vector.broadcast %27 : vector<1x1024xi32> to vector<128x1024xi32>
    %29 = arith.cmpi eq, %1, %28 : vector<128x1024xi32>
    %30 = arith.ori %24, %29 : vector<128x1024xi1>
    %31 = arith.extui %30 : vector<128x1024xi1> to vector<128x1024xi32>
    %32 = arith.sitofp %31 : vector<128x1024xi32> to vector<128x1024xf32>
    %c0_1 = arith.constant 0 : index
    %c0_2 = arith.constant 0 : index
    %33 = vector.load %arg2[%c0_1, %c0_2] : memref<32x128xf32, #tpu.memory_space<vmem>>, vector<32x128xf32>
    %cst = arith.constant dense<0.000000e+00> : vector<32x1024xf32>
    %34 = tpu.matmul %33, %32, %cst {dimension_numbers = #tpu.dot_dimension_numbers<[1], [0], [0], [1], [0, 0, 1, 1], [], []>} : vector<32x128xf32>, vector<128x1024xf32>, vector<32x1024xf32> -> vector<32x1024xf32>
    %c0_3 = arith.constant 0 : index
    %c0_4 = arith.constant 0 : index
    %35 = vector.load %arg3[%c0_3, %c0_4] : memref<32x1xf32, #tpu.memory_space<vmem>>, vector<32x1xf32>
    %36 = vector.broadcast %35 : vector<32x1xf32> to vector<32x1024xf32>
    %37 = arith.addf %34, %36 : vector<32x1024xf32>
    %cst_5 = arith.constant 0.000000e+00 : f32
    %38 = vector.broadcast %cst_5 : f32 to vector<32x1024xf32>
    %39 = arith.maximumf %37, %38 : vector<32x1024xf32>
    %c0_6 = arith.constant 0 : index
    %c0_7 = arith.constant 0 : index
    %40 = vector.load %arg4[%c0_6, %c0_7] : memref<32x32xf32, #tpu.memory_space<vmem>>, vector<32x32xf32>
    %cst_8 = arith.constant dense<0.000000e+00> : vector<32x1024xf32>
    %41 = tpu.matmul %40, %39, %cst_8 {dimension_numbers = #tpu.dot_dimension_numbers<[1], [0], [0], [1], [0, 0, 1, 1], [], []>} : vector<32x32xf32>, vector<32x1024xf32>, vector<32x1024xf32> -> vector<32x1024xf32>
    %c0_9 = arith.constant 0 : index
    %c0_10 = arith.constant 0 : index
    %42 = vector.load %arg5[%c0_9, %c0_10] : memref<32x1xf32, #tpu.memory_space<vmem>>, vector<32x1xf32>
    %43 = vector.broadcast %42 : vector<32x1xf32> to vector<32x1024xf32>
    %44 = arith.addf %41, %43 : vector<32x1024xf32>
    %cst_11 = arith.constant 0.000000e+00 : f32
    %45 = vector.broadcast %cst_11 : f32 to vector<32x1024xf32>
    %46 = arith.maximumf %44, %45 : vector<32x1024xf32>
    %c0_12 = arith.constant 0 : index
    %c0_13 = arith.constant 0 : index
    %47 = vector.load %arg6[%c0_12, %c0_13] : memref<1x32xf32, #tpu.memory_space<vmem>>, vector<1x32xf32>
    %cst_14 = arith.constant dense<0.000000e+00> : vector<1x1024xf32>
    %48 = tpu.matmul %47, %46, %cst_14 {dimension_numbers = #tpu.dot_dimension_numbers<[1], [0], [0], [1], [0, 0, 1, 1], [], []>} : vector<1x32xf32>, vector<32x1024xf32>, vector<1x1024xf32> -> vector<1x1024xf32>
    %c0_15 = arith.constant 0 : index
    %c0_16 = arith.constant 0 : index
    %49 = vector.load %arg7[%c0_15, %c0_16] : memref<1x1xf32, #tpu.memory_space<vmem>>, vector<1x1xf32>
    %50 = vector.broadcast %49 : vector<1x1xf32> to vector<1x1024xf32>
    %51 = arith.addf %48, %50 : vector<1x1024xf32>
    %c0_17 = arith.constant 0 : index
    %c0_18 = arith.constant 0 : index
    %52 = vector.load %arg8[%c0_17, %c0_18] : memref<1x1024xf32, #tpu.memory_space<vmem>>, vector<1x1024xf32>
    tpu.vector_store %arg8[%c0_17, %c0_18], %51 {strides = array<i32>} : memref<1x1024xf32, #tpu.memory_space<vmem>>, vector<1x1024xf32>,
    return
  }
  func.func @transform_0(%arg0: i32) -> (i32, i32) {
    %c0_i32 = arith.constant 0 : i32
    %c0_i32_0 = arith.constant 0 : i32
    return %c0_i32, %arg0 : i32, i32
  }
  func.func @transform_1(%arg0: i32) -> (i32, i32) {
    %c0_i32 = arith.constant 0 : i32
    %c0_i32_0 = arith.constant 0 : i32
    %c0_i32_1 = arith.constant 0 : i32
    return %c0_i32, %c0_i32_0 : i32, i32
  }
  func.func @transform_2(%arg0: i32) -> (i32, i32) {
    %c0_i32 = arith.constant 0 : i32
    %c0_i32_0 = arith.constant 0 : i32
    %c0_i32_1 = arith.constant 0 : i32
    return %c0_i32, %c0_i32_0 : i32, i32
  }
  func.func @transform_3(%arg0: i32) -> (i32, i32) {
    %c0_i32 = arith.constant 0 : i32
    %c0_i32_0 = arith.constant 0 : i32
    %c0_i32_1 = arith.constant 0 : i32
    return %c0_i32, %c0_i32_0 : i32, i32
  }
  func.func @transform_4(%arg0: i32) -> (i32, i32) {
    %c0_i32 = arith.constant 0 : i32
    %c0_i32_0 = arith.constant 0 : i32
    %c0_i32_1 = arith.constant 0 : i32
    return %c0_i32, %c0_i32_0 : i32, i32
  }
  func.func @transform_5(%arg0: i32) -> (i32, i32) {
    %c0_i32 = arith.constant 0 : i32
    %c0_i32_0 = arith.constant 0 : i32
    %c0_i32_1 = arith.constant 0 : i32
    return %c0_i32, %c0_i32_0 : i32, i32
  }
  func.func @transform_6(%arg0: i32) -> (i32, i32) {
    %c0_i32 = arith.constant 0 : i32
    %c0_i32_0 = arith.constant 0 : i32
    %c0_i32_1 = arith.constant 0 : i32
    return %c0_i32, %c0_i32_0 : i32, i32
  }
  func.func @transform_7(%arg0: i32) -> (i32, i32) {
    %c0_i32 = arith.constant 0 : i32
    %c0_i32_0 = arith.constant 0 : i32
    return %c0_i32, %arg0 : i32, i32
  }
}

</mosaic_0001>

<bundles_post_ra>
// kernel: tpu_custom_call.1
= control target key start
LH: loop header
LB: loop body
LE: loop exit
PB: predicated region body
PF: predicated region fallthrough
CT: control target
= control target key end

     0   :  { %s5043_s0 = inlined_call_operand.hbm [shape: s32[5,2048], index: 0, kind: input, shape index: {}]   ;;  %s5044_s1 = inlined_call_operand.vmem [shape: f32[32,128], index: 1, kind: input, shape index: {}]   ;;  %s5045_s2 = inlined_call_operand.vmem [shape: f32[32,1], index: 2, kind: input, shape index: {}]   ;;  %s5046_s3 = inlined_call_operand.vmem [shape: f32[32,32], index: 3, kind: input, shape index: {}]   ;;  %s5047_s4 = inlined_call_operand.vmem [shape: f32[32,1], index: 4, kind: input, shape index: {}]   ;;  %s5048_s5 = inlined_call_operand.vmem [shape: f32[1,32], index: 5, kind: input, shape index: {}]   ;;  %s5049_s6 = inlined_call_operand.<no memory space> [shape: f32[1,1], index: 6, kind: input, shape index: {}]   ;;  %s5050_s7 = inlined_call_operand.hbm [shape: f32[1,2048], index: 7, kind: output, shape index: {}]  }
   0x1   :  { %v12_v0 = vstv %s5049_s6 }
   0x2   :  { %13 = vst [vmem:[#allocation2] sm:$0x1] %v12_v0 }
   0x3   :  { %14 = vsyncpa [#allocation4], 0 }
   0x4   :  { %16 = vsyncpa [#allocation4 + $0x1], 0 }
   0x5   :  { %17 = vsyncpa [#allocation5], 0 }
   0x6   :  { %19 = vsyncpa [#allocation5 + $0x1], 0  ;;  %s3069_s26 = smov 0   ;;  %s3071_s27 = smov 0  }
   0x7   :  { %s3073_s28 = smov 0   ;;  %s3075_s29 = smov 0  }
   0x8 LB: > { %s3090_s6 = sadd.s32 4294967295, %s3022_s29   ;;  %s2691_s30 = sadd.s32 4294967294, %s3022_s29   ;;  %s3022_s29 = sphi %s3075_s29, %s5060_s29   ;;  %s3018_s28 = sphi %s3073_s28, %s5059_s28   ;;  %s3014_s27 = sphi %s3071_s27, %s5058_s27   ;;  %s3010_s26 = sphi %s3069_s26, %s5057_s26  }
   0x9   : > { %s3094_s8 = sadd.s32 1, %s3022_s29   ;;  %s32_s9 = sadd.s32 1, %s3018_s28 }
   0xa   : > { %s29_s10 = ssub.s32 %s3022_s29, %s3094_s8  ;;  %p39_p0 = scmp.ne.s32.totalorder %s3018_s28, %s3014_s27 }
   0xb   : > { %p30_p1 = scmp.eq.s32.totalorder %s29_s10, 0  ;;  %p40_p2 = scmp.eq.s32.totalorder %s3022_s29, 0 }
   0xc   : > { %p45_p3 = scmp.ne.s32.totalorder %s3014_s27, %s3010_s26  ;;  %p46_p4 = scmp.eq.s32.totalorder %s3090_s6, 0 }
   0xd   : > { %s3106_s11 = scalar_select %p30_p1, %s3018_s28, %s32_s9  }
   0xe   : > { %p3108_p5 = por %p40_p2, %p39_p0  ;;  %p3112_p6 = por %p46_p4, %p45_p3 }
   0xf   : > { %p195_p7 = scmp.eq.s32.totalorder %s3090_s6, 1  ;;  %p201_p8 = scmp.eq.s32.totalorder %s2691_s30, 1 }
  0x10   : > { %p2885_p10 = scmp.lt.s32.totalorder %s3022_s29, 2  ;;  %s239_s16 = sand.u32 1, %s3018_s28  }
  0x11   : > { %p3119_p11 = por %p195_p7, %p39_p0  ;;  %p3123_p12 = por %p201_p8, %p45_p3 }
  0x12   : > { %s2872_s17 = sshll.u32 %s3022_s29, 6  ;;  %s2694_s18 = sshll.u32 %s239_s16, 6 }
  0x13   : > { %s248_s21 = scalar_lea.hbm %s5043_s0, %s2872_s17  ;;  %s243_s23 = scalar_lea.vmem [#allocation3], %s2694_s18 }
  0x14   : > { %s250_s22 = sshll.u32 %s248_s21, 4  ;;  %s252_s24 = sshll.u32 %s243_s23, 4  ;;  %s251_s22 = int_to_ptr.hbm [resolvable:$true] %s250_s22  ;;  %s253_s24 = int_to_ptr.vmem [resolvable:$true] %s252_s24 }
  0x15   : > { %p3134_p13 = pnand %p2885_p10, %p3108_p5  ;;  %p2697_p0 = scmp.ge.s32.totalorder %s3022_s29, 1 }
  0x16   : > { %p257_p1 = scmp.lt.s32.totalorder %s3022_s29, 3  ;;  %s240_s30 = scalar_lea.sflag [#allocation4], %s239_s16 }
  0x17   : > { %s2926_s9 = sshra.s32 %s251_s22, 4  ;;  %p2930_p3 = pneg %p3134_p13  ;;  %s2927_s9 = int_to_ptr.hbm [resolvable:$true] %s2926_s9 }
  0x18   : > { %s2928_s10 = scalar_lea.hbm %s2927_s9, 64  ;;  %s2933_s12 = scalar_lea.hbm %s5043_s0, 128 }
  0x19   : > { %p2929_p2 = scmp.ne.s32.totalorder %s2927_s9, %s2928_s10  ;;  %p2934_p5 = scmp.lt.s32.totalorder %s2927_s9, %s5043_s0 }
  0x1a   : > { %p2935_p8 = scmp.lt.s32.totalorder %s2933_s12, %s2928_s10 }
  0x1b   : > { %p2931_p4 = pnand %p2930_p3, %p2929_p2 }
  0x1c   : > { %p2936_p10 = por %p2935_p8, %p2934_p5 }
  0x1d   : > { %p2932_p7 = pneg %p2931_p4 }
  0x1f   : > { %p2937_p9 = pnand %p2936_p10, %p2932_p7 }
  0x21   : > { %2940 = shalt.err (!%p2937_p9)
}
  0x22   : > { %2880 = dma.hbm_to_vmem [thread:$0]  (!%p3134_p13), %s251_s22, 1024, %s253_s24, %s240_s30  }
  0x23   : > { %p258_p2 = pnand %p2697_p0, %p257_p1 }
  0x24   : > { %s3155_s16 = sand.u32 (!%p258_p2), 1, %s3014_s27  }
  0x25   : > { %261 = sbr.rel (%p258_p2) target bundleno = 1040 (0x410), region = 48  ;;  %s2698_s21 = sshll.u32 (!%p258_p2), %s3155_s16, 6 }
  0x26   : > { %s264_s23 = scalar_lea.sflag (!%p258_p2), [#allocation4], %s3155_s16  ;;  %s3159_s9 = scalar_lea.vmem (!%p258_p2), [#allocation3], %s2698_s21 }
  0x2a   : > { %3001 = dma.done.wait (%p3112_p6), %s264_s23, 1024  }
  0x2b   : > { %3003 = vsyncadd (%p3112_p6), %s264_s23, 4294966272  ;;  %v309_v1 = vlaneseq  ;;  %v301_v4 = vld [vmem:[%s3159_s9] sm:$0x1f]  ;;  %v302_v5 = vld [vmem:[%s3159_s9 + $0x8] sm:$0x1f]  ;;  %v3024_v33 = vmov 0.0  }
  0x2c   : > { %v3172_v6 = vperm.slane %v301_v4, 0  ;;  %v462_v7 = vadd.s32 8, %v301_v4  ;;  %v734_v8 = vadd.s32 14, %v301_v4  ;;  %v1006_v9 = vadd.s32 78, %v301_v4  ;;  %v303_v20 = vld [vmem:[%s3159_s9 + $0x10] sm:$0x1f] }
  0x2d   : > { %v3165_v2 = vshrl.u32 %v309_v1, 7  ;;  %v1278_v10 = vadd.s32 110, %v301_v4  ;;  %v3174_v11 = vperm.slane %v302_v5, 0  ;;  %v463_v12 = vadd.s32 8, %v302_v5  ;;  %v304_v30 = vld [vmem:[%s3159_s9 + $0x18] sm:$0x1f] }
  0x2e   : > { %v735_v13 = vadd.s32 14, %v302_v5  ;;  %v3178_v14 = vperm.slane %v462_v7, 1  ;;  %v3180_v15 = vperm.slane %v734_v8, 2  ;;  %v3182_v16 = vperm.slane %v1006_v9, 3  ;;  %s2699_s20 = sshll.u32 %s3155_s16, 3  ;;  %s2869_s21 = sshll.u32 %s3090_s6, 3 }
  0x2f   : > { %v3168_v3 = vadd.s32 120, %v3165_v2  ;;  %v3184_v17 = vperm.slane %v1278_v10, 4  ;;  %v3186_v18 = vperm.slane %v463_v12, 1  ;;  %v1007_v21 = vadd.s32 78, %v302_v5  ;;  %s2616_s13 = scalar_lea.hbm %s5050_s7, %s2869_s21  ;;  %s298_s6 = scalar_lea.vmem [#allocation6], %s2699_s20 }
  0x30   : > { %v3188_v19 = vperm.slane %v735_v13, 2  ;;  %v1279_v22 = vadd.s32 110, %v302_v5  ;;  %v3205_v24 = vperm.slane %v303_v20, 0  ;;  %v464_v25 = vadd.s32 8, %v303_v20  ;;  %s2618_s22 = sshll.u32 %s298_s6, 4  ;;  %s2620_s24 = sshll.u32 %s2616_s13, 4  ;;  %s2619_s22 = int_to_ptr.vmem [resolvable:$true] %s2618_s22  ;;  %s2621_s24 = int_to_ptr.hbm [resolvable:$true] %s2620_s24 }
  0x31   : > { %vm454_vm0 = vcmp.eq.s32.totalorder %v3168_v3, %v3172_v6  ;;  %vm598_vm1 = vcmp.eq.s32.totalorder %v3168_v3, %v3178_v14  ;;  %vm870_vm2 = vcmp.eq.s32.totalorder %v3168_v3, %v3180_v15  ;;  %vm1142_vm3 = vcmp.eq.s32.totalorder %v3168_v3, %v3182_v16  ;;  %s2606_s25 = scalar_lea.sflag [#allocation5], %s3155_s16  ;;  %s2970_s30 = sshra.s32 %s2621_s24, 4  ;;  %s2971_s30 = int_to_ptr.hbm [resolvable:$true] %s2970_s30 }
  0x32   : > { %vm726_vm4 = vmor %vm454_vm0, %vm598_vm1  ;;  %vm1414_vm5 = vcmp.eq.s32.totalorder %v3168_v3, %v3184_v17  ;;  %vm455_vm6 = vcmp.eq.s32.totalorder %v3168_v3, %v3174_v11  ;;  %vm599_vm7 = vcmp.eq.s32.totalorder %v3168_v3, %v3186_v18  ;;  %v3203_v23 = vperm.slane %v1007_v21, 3  ;;  %s2972_s10 = scalar_lea.hbm %s2971_s30, 8  ;;  %s2976_s12 = scalar_lea.hbm %s5050_s7, 16 }
  0x33   : > { %vm998_vm8 = vmor %vm726_vm4, %vm870_vm2  ;;  %v736_v26 = vadd.s32 14, %v303_v20  ;;  %vm871_vm10 = vcmp.eq.s32.totalorder %v3168_v3, %v3188_v19  ;;  %v3209_v27 = vperm.slane %v1279_v22, 4  ;;  %v1008_v28 = vadd.s32 78, %v303_v20  ;;  %p2973_p6 = scmp.ne.s32.totalorder %s2971_s30, %s2972_s10  ;;  %p2977_p0 = scmp.lt.s32.totalorder %s2971_s30, %s5050_s7 }
  0x34   : > { %vm1270_vm9 = vmor %vm998_vm8, %vm1142_vm3  ;;  %v1280_v29 = vadd.s32 110, %v303_v20  ;;  %vm1143_vm12 = vcmp.eq.s32.totalorder %v3168_v3, %v3203_v23  ;;  %v3217_v31 = vperm.slane %v464_v25, 1  ;;  %vm456_vm0 = vcmp.eq.s32.totalorder %v3168_v3, %v3205_v24  ;;  %p2978_p1 = scmp.lt.s32.totalorder %s2976_s12, %s2972_s10 }
  0x35   : > { %vm1542_vm11 = vmor %vm1270_vm9, %vm1414_vm5  ;;  %v3219_v32 = vperm.slane %v736_v26, 2  ;;  %vm1415_vm14 = vcmp.eq.s32.totalorder %v3168_v3, %v3209_v27  ;;  %v3230_v35 = vperm.slane %v1008_v28, 3  ;;  %v3241_v37 = vperm.slane %v304_v30, 0  ;;  %p2974_p9 = pnand %p2973_p6, %p3119_p11 }
  0x36   : > { %v2820_v34 = vsel %vm1542_vm11, 1.0, %v3024_v33  ;;  %vm727_vm13 = vmor %vm455_vm6, %vm599_vm7  ;;  %v3232_v36 = vperm.slane %v1280_v29, 4  ;;  %vm600_vm1 = vcmp.eq.s32.totalorder %v3168_v3, %v3217_v31  ;;  %v465_v38 = vadd.s32 8, %v304_v30  ;;  %p2979_p3 = por %p2978_p1, %p2977_p0 }
  0x37   : > { %1834 = vmatpush.msra.mxu0 %v2820_v34  ;;  %vm999_vm15 = vmor %vm727_vm13, %vm871_vm10  ;;  %vm872_vm3 = vcmp.eq.s32.totalorder %v3168_v3, %v3219_v32  ;;  %v737_v39 = vadd.s32 14, %v304_v30  ;;  %v1009_v40 = vadd.s32 78, %v304_v30  ;;  %vm1144_vm5 = vcmp.eq.s32.totalorder %v3168_v3, %v3230_v35  ;;  %p2975_p13 = pneg %p2974_p9 }
  0x38   : > { %vm1271_vm2 = vmor %vm999_vm15, %vm1143_vm12  ;;  %v3250_v41 = vperm.slane %v465_v38, 1  ;;  %v1281_v42 = vadd.s32 110, %v304_v30  ;;  %vm1416_vm7 = vcmp.eq.s32.totalorder %v3168_v3, %v3232_v36  ;;  %vm457_vm9 = vcmp.eq.s32.totalorder %v3168_v3, %v3241_v37 }
  0x39   : > { %vm1543_vm4 = vmor %vm1271_vm2, %vm1415_vm14  ;;  %v3255_v44 = vperm.slane %v737_v39, 2  ;;  %v3257_v45 = vperm.slane %v1009_v40, 3  ;;  %v3266_v47 = vadd.s32 112, %v3165_v2  ;;  %v3313_v52 = vadd.s32 104, %v3165_v2  ;;  %p2980_p4 = pnand %p2979_p3, %p2975_p13 }
  0x3a   : > { %v2821_v43 = vsel %vm1543_vm4, 1.0, %v3024_v33  ;;  %vm728_vm6 = vmor %vm456_vm0, %vm600_vm1  ;;  %vm601_vm10 = vcmp.eq.s32.totalorder %v3168_v3, %v3250_v41  ;;  %v3263_v46 = vperm.slane %v1281_v42, 4  ;;  %v3360_v57 = vadd.s32 96, %v3165_v2 }
  0x3b   : > { %1863 = vmatpush.msra.mxu1 %v2821_v43  ;;  %vm1000_vm8 = vmor %vm728_vm6, %vm872_vm3  ;;  %vm873_vm12 = vcmp.eq.s32.totalorder %v3168_v3, %v3255_v44  ;;  %vm1145_vm14 = vcmp.eq.s32.totalorder %v3168_v3, %v3257_v45  ;;  %vm446_vm2 = vcmp.eq.s32.totalorder %v3266_v47, %v3172_v6  ;;  %vm590_vm3 = vcmp.eq.s32.totalorder %v3266_v47, %v3178_v14 }
  0x3c   : > { %vm1272_vm11 = vmor %vm1000_vm8, %vm1144_vm5  ;;  %vm1417_vm0 = vcmp.eq.s32.totalorder %v3168_v3, %v3263_v46  ;;  %vm862_vm5 = vcmp.eq.s32.totalorder %v3266_v47, %v3180_v15  ;;  %v3407_v62 = vadd.s32 88, %v3165_v2  ;;  %v3454_v5 = vadd.s32 80, %v3165_v2 }
  0x3d   : > { %vm1544_vm13 = vmor %vm1272_vm11, %vm1416_vm7  ;;  %vm1134_vm7 = vcmp.eq.s32.totalorder %v3266_v47, %v3182_v16  ;;  %vm447_vm11 = vcmp.eq.s32.totalorder %v3266_v47, %v3174_v11  ;;  %v3501_v12 = vadd.s32 72, %v3165_v2  ;;  %v3548_v25 = vadd.s32 64, %v3165_v2 }
  0x3e   : > { %v2822_v48 = vsel %vm1544_vm13, 1.0, %v3024_v33  ;;  %vm729_vm15 = vmor %vm457_vm9, %vm601_vm10  ;;  %vm1406_vm9 = vcmp.eq.s32.totalorder %v3266_v47, %v3184_v17  ;;  %v3595_v34 = vadd.s32 56, %v3165_v2  ;;  %v3642_v43 = vadd.s32 48, %v3165_v2 }
  0x3f   : > { %1892 = vmatpush.msra.mxu2 %v2822_v48  ;;  %vm1001_vm1 = vmor %vm729_vm15, %vm873_vm12  ;;  %vm591_vm12 = vcmp.eq.s32.totalorder %v3266_v47, %v3186_v18 }
  0x40   : > { %vm1273_vm4 = vmor %vm1001_vm1, %vm1145_vm14  ;;  %vm863_vm14 = vcmp.eq.s32.totalorder %v3266_v47, %v3188_v19 }
  0x41   : > { %vm1545_vm6 = vmor %vm1273_vm4, %vm1417_vm0  ;;  %vm1135_vm0 = vcmp.eq.s32.totalorder %v3266_v47, %v3203_v23  ;;  %vm448_vm4 = vcmp.eq.s32.totalorder %v3266_v47, %v3205_v24 }
  0x42   : > { %v2823_v49 = vsel %vm1545_vm6, 1.0, %v3024_v33  ;;  %vm718_vm8 = vmor %vm446_vm2, %vm590_vm3  ;;  %vm1407_vm2 = vcmp.eq.s32.totalorder %v3266_v47, %v3209_v27 }
  0x43   : > { %1921 = vmatpush.msra.mxu3 %v2823_v49  ;;  %vm990_vm10 = vmor %vm718_vm8, %vm862_vm5  ;;  %vm592_vm5 = vcmp.eq.s32.totalorder %v3266_v47, %v3217_v31 }
  0x44   : > { %vm1262_vm13 = vmor %vm990_vm10, %vm1134_vm7  ;;  %vm864_vm7 = vcmp.eq.s32.totalorder %v3266_v47, %v3219_v32 }
  0x45   : > { %vm1534_vm15 = vmor %vm1262_vm13, %vm1406_vm9  ;;  %vm1136_vm9 = vcmp.eq.s32.totalorder %v3266_v47, %v3230_v35  ;;  %vm449_vm13 = vcmp.eq.s32.totalorder %v3266_v47, %v3241_v37 }
  0x46   : > { %v2812_v50 = vsel %vm1534_vm15, 1.0, %v3024_v33  ;;  %vm719_vm1 = vmor %vm447_vm11, %vm591_vm12  ;;  %vm1408_vm11 = vcmp.eq.s32.totalorder %v3266_v47, %v3232_v36 }
  0x47   : > { %1835 = vmatpush.msra.mxu0 %v2812_v50  ;;  %vm991_vm3 = vmor %vm719_vm1, %vm863_vm14  ;;  %vm593_vm14 = vcmp.eq.s32.totalorder %v3266_v47, %v3250_v41 }
  0x48   : > { %vm1263_vm6 = vmor %vm991_vm3, %vm1135_vm0  ;;  %vm865_vm0 = vcmp.eq.s32.totalorder %v3266_v47, %v3255_v44 }
  0x49   : > { %vm1535_vm8 = vmor %vm1263_vm6, %vm1407_vm2  ;;  %vm1137_vm2 = vcmp.eq.s32.totalorder %v3266_v47, %v3257_v45  ;;  %vm438_vm6 = vcmp.eq.s32.totalorder %v3313_v52, %v3172_v6 }
  0x4a   : > { %v2813_v51 = vsel %vm1535_vm8, 1.0, %v3024_v33  ;;  %vm720_vm10 = vmor %vm448_vm4, %vm592_vm5  ;;  %vm1409_vm4 = vcmp.eq.s32.totalorder %v3266_v47, %v3263_v46 }
  0x4b   : > { %1864 = vmatpush.msra.mxu1 %v2813_v51  ;;  %vm992_vm12 = vmor %vm720_vm10, %vm864_vm7  ;;  %vm582_vm7 = vcmp.eq.s32.totalorder %v3313_v52, %v3178_v14 }
  0x4c   : > { %vm1264_vm15 = vmor %vm992_vm12, %vm1136_vm9  ;;  %vm854_vm9 = vcmp.eq.s32.totalorder %v3313_v52, %v3180_v15 }
  0x4d   : > { %vm1536_vm1 = vmor %vm1264_vm15, %vm1408_vm11  ;;  %vm1126_vm11 = vcmp.eq.s32.totalorder %v3313_v52, %v3182_v16  ;;  %vm439_vm15 = vcmp.eq.s32.totalorder %v3313_v52, %v3174_v11 }
  0x4e   : > { %v2814_v53 = vsel %vm1536_vm1, 1.0, %v3024_v33  ;;  %vm721_vm3 = vmor %vm449_vm13, %vm593_vm14  ;;  %vm1398_vm13 = vcmp.eq.s32.totalorder %v3313_v52, %v3184_v17 }
  0x4f   : > { %1893 = vmatpush.msra.mxu2 %v2814_v53  ;;  %vm993_vm5 = vmor %vm721_vm3, %vm865_vm0  ;;  %vm583_vm0 = vcmp.eq.s32.totalorder %v3313_v52, %v3186_v18  ;;  %v3689_v53 = vadd.s32 40, %v3165_v2 }
  0x50   : > { %vm1265_vm8 = vmor %vm993_vm5, %vm1137_vm2  ;;  %vm855_vm2 = vcmp.eq.s32.totalorder %v3313_v52, %v3188_v19 }
  0x51   : > { %vm1537_vm10 = vmor %vm1265_vm8, %vm1409_vm4  ;;  %vm1127_vm4 = vcmp.eq.s32.totalorder %v3313_v52, %v3203_v23  ;;  %vm440_vm8 = vcmp.eq.s32.totalorder %v3313_v52, %v3205_v24 }
  0x52   : > { %v2815_v54 = vsel %vm1537_vm10, 1.0, %v3024_v33  ;;  %vm710_vm12 = vmor %vm438_vm6, %vm582_vm7  ;;  %vm1399_vm6 = vcmp.eq.s32.totalorder %v3313_v52, %v3209_v27 }
  0x53   : > { %1922 = vmatpush.msra.mxu3 %v2815_v54  ;;  %vm982_vm14 = vmor %vm710_vm12, %vm854_vm9  ;;  %vm584_vm9 = vcmp.eq.s32.totalorder %v3313_v52, %v3217_v31 }
  0x54   : > { %vm1254_vm1 = vmor %vm982_vm14, %vm1126_vm11  ;;  %vm856_vm11 = vcmp.eq.s32.totalorder %v3313_v52, %v3219_v32 }
  0x55   : > { %vm1526_vm3 = vmor %vm1254_vm1, %vm1398_vm13  ;;  %vm1128_vm13 = vcmp.eq.s32.totalorder %v3313_v52, %v3230_v35  ;;  %vm441_vm1 = vcmp.eq.s32.totalorder %v3313_v52, %v3241_v37 }
  0x56   : > { %v2804_v55 = vsel %vm1526_vm3, 1.0, %v3024_v33  ;;  %vm711_vm5 = vmor %vm439_vm15, %vm583_vm0  ;;  %vm1400_vm15 = vcmp.eq.s32.totalorder %v3313_v52, %v3232_v36 }
  0x57   : > { %1836 = vmatpush.msra.mxu0 %v2804_v55  ;;  %vm983_vm7 = vmor %vm711_vm5, %vm855_vm2  ;;  %vm585_vm2 = vcmp.eq.s32.totalorder %v3313_v52, %v3250_v41 }
  0x58   : > { %vm1255_vm10 = vmor %vm983_vm7, %vm1127_vm4  ;;  %vm857_vm4 = vcmp.eq.s32.totalorder %v3313_v52, %v3255_v44 }
  0x59   : > { %vm1527_vm12 = vmor %vm1255_vm10, %vm1399_vm6  ;;  %vm1129_vm6 = vcmp.eq.s32.totalorder %v3313_v52, %v3257_v45  ;;  %vm430_vm10 = vcmp.eq.s32.totalorder %v3360_v57, %v3172_v6 }
  0x5a   : > { %v2805_v56 = vsel %vm1527_vm12, 1.0, %v3024_v33  ;;  %vm712_vm14 = vmor %vm440_vm8, %vm584_vm9  ;;  %vm1401_vm8 = vcmp.eq.s32.totalorder %v3313_v52, %v3263_v46 }
  0x5b   : > { %1865 = vmatpush.msra.mxu1 %v2805_v56  ;;  %vm984_vm0 = vmor %vm712_vm14, %vm856_vm11  ;;  %vm574_vm11 = vcmp.eq.s32.totalorder %v3360_v57, %v3178_v14 }
  0x5c   : > { %vm1256_vm3 = vmor %vm984_vm0, %vm1128_vm13  ;;  %vm846_vm13 = vcmp.eq.s32.totalorder %v3360_v57, %v3180_v15 }
  0x5d   : > { %vm1528_vm5 = vmor %vm1256_vm3, %vm1400_vm15  ;;  %vm1118_vm15 = vcmp.eq.s32.totalorder %v3360_v57, %v3182_v16  ;;  %vm431_vm3 = vcmp.eq.s32.totalorder %v3360_v57, %v3174_v11 }
  0x5e   : > { %v2806_v58 = vsel %vm1528_vm5, 1.0, %v3024_v33  ;;  %vm713_vm7 = vmor %vm441_vm1, %vm585_vm2  ;;  %vm1390_vm1 = vcmp.eq.s32.totalorder %v3360_v57, %v3184_v17 }
  0x5f   : > { %1894 = vmatpush.msra.mxu2 %v2806_v58  ;;  %vm985_vm9 = vmor %vm713_vm7, %vm857_vm4  ;;  %vm575_vm4 = vcmp.eq.s32.totalorder %v3360_v57, %v3186_v18 }
  0x60   : > { %vm1257_vm12 = vmor %vm985_vm9, %vm1129_vm6  ;;  %vm847_vm6 = vcmp.eq.s32.totalorder %v3360_v57, %v3188_v19 }
  0x61   : > { %vm1529_vm14 = vmor %vm1257_vm12, %vm1401_vm8  ;;  %vm1119_vm8 = vcmp.eq.s32.totalorder %v3360_v57, %v3203_v23  ;;  %vm432_vm12 = vcmp.eq.s32.totalorder %v3360_v57, %v3205_v24 }
  0x62   : > { %v2807_v59 = vsel %vm1529_vm14, 1.0, %v3024_v33  ;;  %vm702_vm0 = vmor %vm430_vm10, %vm574_vm11  ;;  %vm1391_vm10 = vcmp.eq.s32.totalorder %v3360_v57, %v3209_v27 }
  0x63   : > { %1923 = vmatpush.msra.mxu3 %v2807_v59  ;;  %vm974_vm2 = vmor %vm702_vm0, %vm846_vm13  ;;  %vm576_vm13 = vcmp.eq.s32.totalorder %v3360_v57, %v3217_v31  ;;  %v3736_v59 = vadd.s32 32, %v3165_v2 }
  0x64   : > { %vm1246_vm5 = vmor %vm974_vm2, %vm1118_vm15  ;;  %vm848_vm15 = vcmp.eq.s32.totalorder %v3360_v57, %v3219_v32 }
  0x65   : > { %vm1518_vm7 = vmor %vm1246_vm5, %vm1390_vm1  ;;  %vm1120_vm1 = vcmp.eq.s32.totalorder %v3360_v57, %v3230_v35  ;;  %vm433_vm5 = vcmp.eq.s32.totalorder %v3360_v57, %v3241_v37 }
  0x66   : > { %v2796_v60 = vsel %vm1518_vm7, 1.0, %v3024_v33  ;;  %vm703_vm9 = vmor %vm431_vm3, %vm575_vm4  ;;  %vm1392_vm3 = vcmp.eq.s32.totalorder %v3360_v57, %v3232_v36 }
  0x67   : > { %1837 = vmatpush.msra.mxu0 %v2796_v60  ;;  %vm975_vm11 = vmor %vm703_vm9, %vm847_vm6  ;;  %vm577_vm6 = vcmp.eq.s32.totalorder %v3360_v57, %v3250_v41 }
  0x68   : > { %vm1247_vm14 = vmor %vm975_vm11, %vm1119_vm8  ;;  %vm849_vm8 = vcmp.eq.s32.totalorder %v3360_v57, %v3255_v44 }
  0x69   : > { %vm1519_vm0 = vmor %vm1247_vm14, %vm1391_vm10  ;;  %vm1121_vm10 = vcmp.eq.s32.totalorder %v3360_v57, %v3257_v45  ;;  %vm422_vm14 = vcmp.eq.s32.totalorder %v3407_v62, %v3172_v6 }
  0x6a   : > { %v2797_v61 = vsel %vm1519_vm0, 1.0, %v3024_v33  ;;  %vm704_vm2 = vmor %vm432_vm12, %vm576_vm13  ;;  %vm1393_vm12 = vcmp.eq.s32.totalorder %v3360_v57, %v3263_v46 }
  0x6b   : > { %1866 = vmatpush.msra.mxu1 %v2797_v61  ;;  %vm976_vm4 = vmor %vm704_vm2, %vm848_vm15  ;;  %vm566_vm15 = vcmp.eq.s32.totalorder %v3407_v62, %v3178_v14 }
  0x6c   : > { %vm1248_vm7 = vmor %vm976_vm4, %vm1120_vm1  ;;  %vm838_vm1 = vcmp.eq.s32.totalorder %v3407_v62, %v3180_v15 }
  0x6d   : > { %vm1520_vm9 = vmor %vm1248_vm7, %vm1392_vm3  ;;  %vm1110_vm3 = vcmp.eq.s32.totalorder %v3407_v62, %v3182_v16  ;;  %vm423_vm7 = vcmp.eq.s32.totalorder %v3407_v62, %v3174_v11 }
  0x6e   : > { %v2798_v63 = vsel %vm1520_vm9, 1.0, %v3024_v33  ;;  %vm705_vm11 = vmor %vm433_vm5, %vm577_vm6  ;;  %vm1382_vm5 = vcmp.eq.s32.totalorder %v3407_v62, %v3184_v17 }
  0x6f   : > { %1895 = vmatpush.msra.mxu2 %v2798_v63  ;;  %vm977_vm13 = vmor %vm705_vm11, %vm849_vm8  ;;  %vm567_vm8 = vcmp.eq.s32.totalorder %v3407_v62, %v3186_v18 }
  0x70   : > { %vm1249_vm0 = vmor %vm977_vm13, %vm1121_vm10  ;;  %vm839_vm10 = vcmp.eq.s32.totalorder %v3407_v62, %v3188_v19 }
  0x71   : > { %vm1521_vm2 = vmor %vm1249_vm0, %vm1393_vm12  ;;  %vm1111_vm12 = vcmp.eq.s32.totalorder %v3407_v62, %v3203_v23  ;;  %vm424_vm0 = vcmp.eq.s32.totalorder %v3407_v62, %v3205_v24 }
  0x72   : > { %v2799_v0 = vsel %vm1521_vm2, 1.0, %v3024_v33  ;;  %vm694_vm4 = vmor %vm422_vm14, %vm566_vm15  ;;  %vm1383_vm14 = vcmp.eq.s32.totalorder %v3407_v62, %v3209_v27 }
  0x73   : > { %1924 = vmatpush.msra.mxu3 %v2799_v0  ;;  %vm966_vm6 = vmor %vm694_vm4, %vm838_vm1  ;;  %vm568_vm1 = vcmp.eq.s32.totalorder %v3407_v62, %v3217_v31 }
  0x74   : > { %vm1238_vm9 = vmor %vm966_vm6, %vm1110_vm3  ;;  %vm840_vm3 = vcmp.eq.s32.totalorder %v3407_v62, %v3219_v32 }
  0x75   : > { %vm1510_vm11 = vmor %vm1238_vm9, %vm1382_vm5  ;;  %vm1112_vm5 = vcmp.eq.s32.totalorder %v3407_v62, %v3230_v35  ;;  %vm425_vm9 = vcmp.eq.s32.totalorder %v3407_v62, %v3241_v37 }
  0x76   : > { %v2788_v1 = vsel %vm1510_vm11, 1.0, %v3024_v33  ;;  %vm695_vm13 = vmor %vm423_vm7, %vm567_vm8  ;;  %vm1384_vm7 = vcmp.eq.s32.totalorder %v3407_v62, %v3232_v36 }
  0x77   : > { %1838 = vmatpush.msra.mxu0 %v2788_v1  ;;  %vm967_vm15 = vmor %vm695_vm13, %vm839_vm10  ;;  %vm569_vm10 = vcmp.eq.s32.totalorder %v3407_v62, %v3250_v41  ;;  %v3783_v1 = vadd.s32 24, %v3165_v2 }
  0x78   : > { %vm1239_vm2 = vmor %vm967_vm15, %vm1111_vm12  ;;  %vm841_vm12 = vcmp.eq.s32.totalorder %v3407_v62, %v3255_v44 }
  0x79   : > { %vm1511_vm4 = vmor %vm1239_vm2, %vm1383_vm14  ;;  %vm1113_vm14 = vcmp.eq.s32.totalorder %v3407_v62, %v3257_v45  ;;  %vm414_vm2 = vcmp.eq.s32.totalorder %v3454_v5, %v3172_v6 }
  0x7a   : > { %v2789_v4 = vsel %vm1511_vm4, 1.0, %v3024_v33  ;;  %vm696_vm6 = vmor %vm424_vm0, %vm568_vm1  ;;  %vm1385_vm0 = vcmp.eq.s32.totalorder %v3407_v62, %v3263_v46 }
  0x7b   : > { %1867 = vmatpush.msra.mxu1 %v2789_v4  ;;  %vm968_vm8 = vmor %vm696_vm6, %vm840_vm3  ;;  %vm558_vm3 = vcmp.eq.s32.totalorder %v3454_v5, %v3178_v14 }
  0x7c   : > { %vm1240_vm11 = vmor %vm968_vm8, %vm1112_vm5  ;;  %vm830_vm5 = vcmp.eq.s32.totalorder %v3454_v5, %v3180_v15 }
  0x7d   : > { %vm1512_vm13 = vmor %vm1240_vm11, %vm1384_vm7  ;;  %vm1102_vm7 = vcmp.eq.s32.totalorder %v3454_v5, %v3182_v16  ;;  %vm415_vm11 = vcmp.eq.s32.totalorder %v3454_v5, %v3174_v11 }
  0x7e   : > { %v2790_v7 = vsel %vm1512_vm13, 1.0, %v3024_v33  ;;  %vm697_vm15 = vmor %vm425_vm9, %vm569_vm10  ;;  %vm1374_vm9 = vcmp.eq.s32.totalorder %v3454_v5, %v3184_v17 }
  0x7f   : > { %1896 = vmatpush.msra.mxu2 %v2790_v7  ;;  %vm969_vm1 = vmor %vm697_vm15, %vm841_vm12  ;;  %vm559_vm12 = vcmp.eq.s32.totalorder %v3454_v5, %v3186_v18 }
  0x80   : > { %vm1241_vm4 = vmor %vm969_vm1, %vm1113_vm14  ;;  %vm831_vm14 = vcmp.eq.s32.totalorder %v3454_v5, %v3188_v19 }
  0x81   : > { %vm1513_vm6 = vmor %vm1241_vm4, %vm1385_vm0  ;;  %vm1103_vm0 = vcmp.eq.s32.totalorder %v3454_v5, %v3203_v23  ;;  %vm416_vm4 = vcmp.eq.s32.totalorder %v3454_v5, %v3205_v24 }
  0x82   : > { %v2791_v8 = vsel %vm1513_vm6, 1.0, %v3024_v33  ;;  %vm686_vm8 = vmor %vm414_vm2, %vm558_vm3  ;;  %vm1375_vm2 = vcmp.eq.s32.totalorder %v3454_v5, %v3209_v27 }
  0x83   : > { %1925 = vmatpush.msra.mxu3 %v2791_v8  ;;  %vm958_vm10 = vmor %vm686_vm8, %vm830_vm5  ;;  %vm560_vm5 = vcmp.eq.s32.totalorder %v3454_v5, %v3217_v31 }
  0x84   : > { %vm1230_vm13 = vmor %vm958_vm10, %vm1102_vm7  ;;  %vm832_vm7 = vcmp.eq.s32.totalorder %v3454_v5, %v3219_v32 }
  0x85   : > { %vm1502_vm15 = vmor %vm1230_vm13, %vm1374_vm9  ;;  %vm1104_vm9 = vcmp.eq.s32.totalorder %v3454_v5, %v3230_v35  ;;  %vm417_vm13 = vcmp.eq.s32.totalorder %v3454_v5, %v3241_v37 }
  0x86   : > { %v2780_v9 = vsel %vm1502_vm15, 1.0, %v3024_v33  ;;  %vm687_vm1 = vmor %vm415_vm11, %vm559_vm12  ;;  %vm1376_vm11 = vcmp.eq.s32.totalorder %v3454_v5, %v3232_v36 }
  0x87   : > { %1839 = vmatpush.msra.mxu0 %v2780_v9  ;;  %vm959_vm3 = vmor %vm687_vm1, %vm831_vm14  ;;  %vm561_vm14 = vcmp.eq.s32.totalorder %v3454_v5, %v3250_v41 }
  0x88   : > { %vm1231_vm6 = vmor %vm959_vm3, %vm1103_vm0  ;;  %vm833_vm0 = vcmp.eq.s32.totalorder %v3454_v5, %v3255_v44 }
  0x89   : > { %vm1503_vm8 = vmor %vm1231_vm6, %vm1375_vm2  ;;  %vm1105_vm2 = vcmp.eq.s32.totalorder %v3454_v5, %v3257_v45  ;;  %vm406_vm6 = vcmp.eq.s32.totalorder %v3501_v12, %v3172_v6 }
  0x8a   : > { %v2781_v10 = vsel %vm1503_vm8, 1.0, %v3024_v33  ;;  %vm688_vm10 = vmor %vm416_vm4, %vm560_vm5  ;;  %vm1377_vm4 = vcmp.eq.s32.totalorder %v3454_v5, %v3263_v46 }
  0x8b   : > { %1868 = vmatpush.msra.mxu1 %v2781_v10  ;;  %vm960_vm12 = vmor %vm688_vm10, %vm832_vm7  ;;  %vm550_vm7 = vcmp.eq.s32.totalorder %v3501_v12, %v3178_v14  ;;  %v3830_v10 = vadd.s32 16, %v3165_v2 }
  0x8c   : > { %vm1232_vm15 = vmor %vm960_vm12, %vm1104_vm9  ;;  %vm822_vm9 = vcmp.eq.s32.totalorder %v3501_v12, %v3180_v15 }
  0x8d   : > { %vm1504_vm1 = vmor %vm1232_vm15, %vm1376_vm11  ;;  %vm1094_vm11 = vcmp.eq.s32.totalorder %v3501_v12, %v3182_v16  ;;  %vm407_vm15 = vcmp.eq.s32.totalorder %v3501_v12, %v3174_v11 }
  0x8e   : > { %v2782_v13 = vsel %vm1504_vm1, 1.0, %v3024_v33  ;;  %vm689_vm3 = vmor %vm417_vm13, %vm561_vm14  ;;  %vm1366_vm13 = vcmp.eq.s32.totalorder %v3501_v12, %v3184_v17 }
  0x8f   : > { %1897 = vmatpush.msra.mxu2 %v2782_v13  ;;  %vm961_vm5 = vmor %vm689_vm3, %vm833_vm0  ;;  %vm551_vm0 = vcmp.eq.s32.totalorder %v3501_v12, %v3186_v18 }
  0x90   : > { %vm1233_vm8 = vmor %vm961_vm5, %vm1105_vm2  ;;  %vm823_vm2 = vcmp.eq.s32.totalorder %v3501_v12, %v3188_v19 }
  0x91   : > { %vm1505_vm10 = vmor %vm1233_vm8, %vm1377_vm4  ;;  %vm1095_vm4 = vcmp.eq.s32.totalorder %v3501_v12, %v3203_v23  ;;  %vm408_vm8 = vcmp.eq.s32.totalorder %v3501_v12, %v3205_v24 }
  0x92   : > { %v2783_v20 = vsel %vm1505_vm10, 1.0, %v3024_v33  ;;  %vm678_vm12 = vmor %vm406_vm6, %vm550_vm7  ;;  %vm1367_vm6 = vcmp.eq.s32.totalorder %v3501_v12, %v3209_v27 }
  0x93   : > { %1926 = vmatpush.msra.mxu3 %v2783_v20  ;;  %vm950_vm14 = vmor %vm678_vm12, %vm822_vm9  ;;  %vm552_vm9 = vcmp.eq.s32.totalorder %v3501_v12, %v3217_v31 }
  0x94   : > { %vm1222_vm1 = vmor %vm950_vm14, %vm1094_vm11  ;;  %vm824_vm11 = vcmp.eq.s32.totalorder %v3501_v12, %v3219_v32 }
  0x95   : > { %vm1494_vm3 = vmor %vm1222_vm1, %vm1366_vm13  ;;  %vm1096_vm13 = vcmp.eq.s32.totalorder %v3501_v12, %v3230_v35  ;;  %vm409_vm1 = vcmp.eq.s32.totalorder %v3501_v12, %v3241_v37 }
  0x96   : > { %v2772_v21 = vsel %vm1494_vm3, 1.0, %v3024_v33  ;;  %vm679_vm5 = vmor %vm407_vm15, %vm551_vm0  ;;  %vm1368_vm15 = vcmp.eq.s32.totalorder %v3501_v12, %v3232_v36 }
  0x97   : > { %1840 = vmatpush.msra.mxu0 %v2772_v21  ;;  %vm951_vm7 = vmor %vm679_vm5, %vm823_vm2  ;;  %vm553_vm2 = vcmp.eq.s32.totalorder %v3501_v12, %v3250_v41 }
  0x98   : > { %vm1223_vm10 = vmor %vm951_vm7, %vm1095_vm4  ;;  %vm825_vm4 = vcmp.eq.s32.totalorder %v3501_v12, %v3255_v44 }
  0x99   : > { %vm1495_vm12 = vmor %vm1223_vm10, %vm1367_vm6  ;;  %vm1097_vm6 = vcmp.eq.s32.totalorder %v3501_v12, %v3257_v45  ;;  %vm398_vm10 = vcmp.eq.s32.totalorder %v3548_v25, %v3172_v6 }
  0x9a   : > { %v2773_v22 = vsel %vm1495_vm12, 1.0, %v3024_v33  ;;  %vm680_vm14 = vmor %vm408_vm8, %vm552_vm9  ;;  %vm1369_vm8 = vcmp.eq.s32.totalorder %v3501_v12, %v3263_v46 }
  0x9b   : > { %1869 = vmatpush.msra.mxu1 %v2773_v22  ;;  %vm952_vm0 = vmor %vm680_vm14, %vm824_vm11  ;;  %vm542_vm11 = vcmp.eq.s32.totalorder %v3548_v25, %v3178_v14 }
  0x9c   : > { %vm1224_vm3 = vmor %vm952_vm0, %vm1096_vm13  ;;  %vm814_vm13 = vcmp.eq.s32.totalorder %v3548_v25, %v3180_v15 }
  0x9d   : > { %vm1496_vm5 = vmor %vm1224_vm3, %vm1368_vm15  ;;  %vm1086_vm15 = vcmp.eq.s32.totalorder %v3548_v25, %v3182_v16  ;;  %vm399_vm3 = vcmp.eq.s32.totalorder %v3548_v25, %v3174_v11 }
  0x9e   : > { %v2774_v26 = vsel %vm1496_vm5, 1.0, %v3024_v33  ;;  %vm681_vm7 = vmor %vm409_vm1, %vm553_vm2  ;;  %vm1358_vm1 = vcmp.eq.s32.totalorder %v3548_v25, %v3184_v17 }
  0x9f   : > { %1898 = vmatpush.msra.mxu2 %v2774_v26  ;;  %vm953_vm9 = vmor %vm681_vm7, %vm825_vm4  ;;  %vm543_vm4 = vcmp.eq.s32.totalorder %v3548_v25, %v3186_v18  ;;  %v3877_v26 = vadd.s32 8, %v3165_v2 }
  0xa0   : > { %vm1225_vm12 = vmor %vm953_vm9, %vm1097_vm6  ;;  %vm815_vm6 = vcmp.eq.s32.totalorder %v3548_v25, %v3188_v19 }
  0xa1   : > { %vm1497_vm14 = vmor %vm1225_vm12, %vm1369_vm8  ;;  %vm1087_vm8 = vcmp.eq.s32.totalorder %v3548_v25, %v3203_v23  ;;  %vm400_vm12 = vcmp.eq.s32.totalorder %v3548_v25, %v3205_v24 }
  0xa2   : > { %v2775_v28 = vsel %vm1497_vm14, 1.0, %v3024_v33  ;;  %vm670_vm0 = vmor %vm398_vm10, %vm542_vm11  ;;  %vm1359_vm10 = vcmp.eq.s32.totalorder %v3548_v25, %v3209_v27 }
  0xa3   : > { %1927 = vmatpush.msra.mxu3 %v2775_v28  ;;  %vm942_vm2 = vmor %vm670_vm0, %vm814_vm13  ;;  %vm544_vm13 = vcmp.eq.s32.totalorder %v3548_v25, %v3217_v31 }
  0xa4   : > { %vm1214_vm5 = vmor %vm942_vm2, %vm1086_vm15  ;;  %vm816_vm15 = vcmp.eq.s32.totalorder %v3548_v25, %v3219_v32 }
  0xa5   : > { %vm1486_vm7 = vmor %vm1214_vm5, %vm1358_vm1  ;;  %vm1088_vm1 = vcmp.eq.s32.totalorder %v3548_v25, %v3230_v35  ;;  %vm401_vm5 = vcmp.eq.s32.totalorder %v3548_v25, %v3241_v37 }
  0xa6   : > { %v2764_v29 = vsel %vm1486_vm7, 1.0, %v3024_v33  ;;  %vm671_vm9 = vmor %vm399_vm3, %vm543_vm4  ;;  %vm1360_vm3 = vcmp.eq.s32.totalorder %v3548_v25, %v3232_v36 }
  0xa7   : > { %1841 = vmatpush.msra.mxu0 %v2764_v29  ;;  %vm943_vm11 = vmor %vm671_vm9, %vm815_vm6  ;;  %vm545_vm6 = vcmp.eq.s32.totalorder %v3548_v25, %v3250_v41 }
  0xa8   : > { %vm1215_vm14 = vmor %vm943_vm11, %vm1087_vm8  ;;  %vm817_vm8 = vcmp.eq.s32.totalorder %v3548_v25, %v3255_v44 }
  0xa9   : > { %vm1487_vm0 = vmor %vm1215_vm14, %vm1359_vm10  ;;  %vm1089_vm10 = vcmp.eq.s32.totalorder %v3548_v25, %v3257_v45  ;;  %vm390_vm14 = vcmp.eq.s32.totalorder %v3595_v34, %v3172_v6 }
  0xaa   : > { %v2765_v30 = vsel %vm1487_vm0, 1.0, %v3024_v33  ;;  %vm672_vm2 = vmor %vm400_vm12, %vm544_vm13  ;;  %vm1361_vm12 = vcmp.eq.s32.totalorder %v3548_v25, %v3263_v46 }
  0xab   : > { %1870 = vmatpush.msra.mxu1 %v2765_v30  ;;  %vm944_vm4 = vmor %vm672_vm2, %vm816_vm15  ;;  %vm534_vm15 = vcmp.eq.s32.totalorder %v3595_v34, %v3178_v14 }
  0xac   : > { %vm1216_vm7 = vmor %vm944_vm4, %vm1088_vm1  ;;  %vm806_vm1 = vcmp.eq.s32.totalorder %v3595_v34, %v3180_v15 }
  0xad   : > { %vm1488_vm9 = vmor %vm1216_vm7, %vm1360_vm3  ;;  %vm1078_vm3 = vcmp.eq.s32.totalorder %v3595_v34, %v3182_v16  ;;  %vm391_vm7 = vcmp.eq.s32.totalorder %v3595_v34, %v3174_v11 }
  0xae   : > { %v2766_v38 = vsel %vm1488_vm9, 1.0, %v3024_v33  ;;  %vm673_vm11 = vmor %vm401_vm5, %vm545_vm6  ;;  %vm1350_vm5 = vcmp.eq.s32.totalorder %v3595_v34, %v3184_v17 }
  0xaf   : > { %1899 = vmatpush.msra.mxu2 %v2766_v38  ;;  %vm945_vm13 = vmor %vm673_vm11, %vm817_vm8  ;;  %vm535_vm8 = vcmp.eq.s32.totalorder %v3595_v34, %v3186_v18 }
  0xb0   : > { %vm1217_vm0 = vmor %vm945_vm13, %vm1089_vm10  ;;  %vm807_vm10 = vcmp.eq.s32.totalorder %v3595_v34, %v3188_v19 }
  0xb1   : > { %vm1489_vm2 = vmor %vm1217_vm0, %vm1361_vm12  ;;  %vm1079_vm12 = vcmp.eq.s32.totalorder %v3595_v34, %v3203_v23  ;;  %vm392_vm0 = vcmp.eq.s32.totalorder %v3595_v34, %v3205_v24 }
  0xb2   : > { %v2767_v39 = vsel %vm1489_vm2, 1.0, %v3024_v33  ;;  %vm662_vm4 = vmor %vm390_vm14, %vm534_vm15  ;;  %vm1351_vm14 = vcmp.eq.s32.totalorder %v3595_v34, %v3209_v27 }
  0xb3   : > { %1928 = vmatpush.msra.mxu3 %v2767_v39  ;;  %vm934_vm6 = vmor %vm662_vm4, %vm806_vm1  ;;  %vm536_vm1 = vcmp.eq.s32.totalorder %v3595_v34, %v3217_v31 }
  0xb4   : > { %vm1206_vm9 = vmor %vm934_vm6, %vm1078_vm3  ;;  %vm808_vm3 = vcmp.eq.s32.totalorder %v3595_v34, %v3219_v32 }
  0xb5   : > { %vm1478_vm11 = vmor %vm1206_vm9, %vm1350_vm5  ;;  %vm1080_vm5 = vcmp.eq.s32.totalorder %v3595_v34, %v3230_v35  ;;  %vm393_vm9 = vcmp.eq.s32.totalorder %v3595_v34, %v3241_v37 }
  0xb6   : > { %v2756_v40 = vsel %vm1478_vm11, 1.0, %v3024_v33  ;;  %vm663_vm13 = vmor %vm391_vm7, %vm535_vm8  ;;  %vm1352_vm7 = vcmp.eq.s32.totalorder %v3595_v34, %v3232_v36 }
  0xb7   : > { %1842 = vmatpush.msra.mxu0 %v2756_v40  ;;  %vm935_vm15 = vmor %vm663_vm13, %vm807_vm10  ;;  %vm537_vm10 = vcmp.eq.s32.totalorder %v3595_v34, %v3250_v41 }
  0xb8   : > { %vm1207_vm2 = vmor %vm935_vm15, %vm1079_vm12  ;;  %vm809_vm12 = vcmp.eq.s32.totalorder %v3595_v34, %v3255_v44 }
  0xb9   : > { %vm1479_vm4 = vmor %vm1207_vm2, %vm1351_vm14  ;;  %vm1081_vm14 = vcmp.eq.s32.totalorder %v3595_v34, %v3257_v45  ;;  %vm382_vm2 = vcmp.eq.s32.totalorder %v3642_v43, %v3172_v6 }
  0xba   : > { %v2757_v42 = vsel %vm1479_vm4, 1.0, %v3024_v33  ;;  %vm664_vm6 = vmor %vm392_vm0, %vm536_vm1  ;;  %vm1353_vm0 = vcmp.eq.s32.totalorder %v3595_v34, %v3263_v46 }
  0xbb   : > { %1871 = vmatpush.msra.mxu1 %v2757_v42  ;;  %vm936_vm8 = vmor %vm664_vm6, %vm808_vm3  ;;  %vm526_vm3 = vcmp.eq.s32.totalorder %v3642_v43, %v3178_v14  ;;  %v307_v42 = vld [vmem:[%s3159_s9 + $0x30] sm:$0x1f] }
  0xbc   : > { %vm1208_vm11 = vmor %vm936_vm8, %vm1080_vm5  ;;  %vm798_vm5 = vcmp.eq.s32.totalorder %v3642_v43, %v3180_v15 }
  0xbd   : > { %vm1480_vm13 = vmor %vm1208_vm11, %vm1352_vm7  ;;  %vm1070_vm7 = vcmp.eq.s32.totalorder %v3642_v43, %v3182_v16  ;;  %vm383_vm11 = vcmp.eq.s32.totalorder %v3642_v43, %v3174_v11 }
  0xbe   : > { %v2758_v48 = vsel %vm1480_vm13, 1.0, %v3024_v33  ;;  %vm665_vm15 = vmor %vm393_vm9, %vm537_vm10  ;;  %vm1342_vm9 = vcmp.eq.s32.totalorder %v3642_v43, %v3184_v17 }
  0xbf   : > { %1900 = vmatpush.msra.mxu2 %v2758_v48  ;;  %vm937_vm1 = vmor %vm665_vm15, %vm809_vm12  ;;  %vm527_vm12 = vcmp.eq.s32.totalorder %v3642_v43, %v3186_v18 }
  0xc0   : > { %vm1209_vm4 = vmor %vm937_vm1, %vm1081_vm14  ;;  %vm799_vm14 = vcmp.eq.s32.totalorder %v3642_v43, %v3188_v19 }
  0xc1   : > { %vm1481_vm6 = vmor %vm1209_vm4, %vm1353_vm0  ;;  %vm1071_vm0 = vcmp.eq.s32.totalorder %v3642_v43, %v3203_v23  ;;  %vm384_vm4 = vcmp.eq.s32.totalorder %v3642_v43, %v3205_v24 }
  0xc2   : > { %v2759_v49 = vsel %vm1481_vm6, 1.0, %v3024_v33  ;;  %vm654_vm8 = vmor %vm382_vm2, %vm526_vm3  ;;  %vm1343_vm2 = vcmp.eq.s32.totalorder %v3642_v43, %v3209_v27 }
  0xc3   : > { %1929 = vmatpush.msra.mxu3 %v2759_v49  ;;  %vm926_vm10 = vmor %vm654_vm8, %vm798_vm5  ;;  %vm528_vm5 = vcmp.eq.s32.totalorder %v3642_v43, %v3217_v31 }
  0xc4   : > { %vm1198_vm13 = vmor %vm926_vm10, %vm1070_vm7  ;;  %vm800_vm7 = vcmp.eq.s32.totalorder %v3642_v43, %v3219_v32 }
  0xc5   : > { %vm1470_vm15 = vmor %vm1198_vm13, %vm1342_vm9  ;;  %vm1072_vm9 = vcmp.eq.s32.totalorder %v3642_v43, %v3230_v35  ;;  %vm385_vm13 = vcmp.eq.s32.totalorder %v3642_v43, %v3241_v37 }
  0xc6   : > { %v2748_v50 = vsel %vm1470_vm15, 1.0, %v3024_v33  ;;  %vm655_vm1 = vmor %vm383_vm11, %vm527_vm12  ;;  %vm1344_vm11 = vcmp.eq.s32.totalorder %v3642_v43, %v3232_v36 }
  0xc7   : > { %1843 = vmatpush.msra.mxu0 %v2748_v50  ;;  %vm927_vm3 = vmor %vm655_vm1, %vm799_vm14  ;;  %vm529_vm14 = vcmp.eq.s32.totalorder %v3642_v43, %v3250_v41 }
  0xc8   : > { %vm1199_vm6 = vmor %vm927_vm3, %vm1071_vm0  ;;  %vm801_vm0 = vcmp.eq.s32.totalorder %v3642_v43, %v3255_v44 }
  0xc9   : > { %vm1471_vm8 = vmor %vm1199_vm6, %vm1343_vm2  ;;  %vm1073_vm2 = vcmp.eq.s32.totalorder %v3642_v43, %v3257_v45  ;;  %vm374_vm6 = vcmp.eq.s32.totalorder %v3689_v53, %v3172_v6 }
  0xca   : > { %v2749_v51 = vsel %vm1471_vm8, 1.0, %v3024_v33  ;;  %vm656_vm10 = vmor %vm384_vm4, %vm528_vm5  ;;  %vm1345_vm4 = vcmp.eq.s32.totalorder %v3642_v43, %v3263_v46 }
  0xcb   : > { %1872 = vmatpush.msra.mxu1 %v2749_v51  ;;  %vm928_vm12 = vmor %vm656_vm10, %vm800_vm7  ;;  %vm518_vm7 = vcmp.eq.s32.totalorder %v3689_v53, %v3178_v14 }
  0xcc   : > { %vm1200_vm15 = vmor %vm928_vm12, %vm1072_vm9  ;;  %vm790_vm9 = vcmp.eq.s32.totalorder %v3689_v53, %v3180_v15 }
  0xcd   : > { %vm1472_vm1 = vmor %vm1200_vm15, %vm1344_vm11  ;;  %vm1062_vm11 = vcmp.eq.s32.totalorder %v3689_v53, %v3182_v16  ;;  %vm375_vm15 = vcmp.eq.s32.totalorder %v3689_v53, %v3174_v11 }
  0xce   : > { %v2750_v54 = vsel %vm1472_vm1, 1.0, %v3024_v33  ;;  %vm657_vm3 = vmor %vm385_vm13, %vm529_vm14  ;;  %vm1334_vm13 = vcmp.eq.s32.totalorder %v3689_v53, %v3184_v17 }
  0xcf   : > { %1901 = vmatpush.msra.mxu2 %v2750_v54  ;;  %vm929_vm5 = vmor %vm657_vm3, %vm801_vm0  ;;  %vm519_vm0 = vcmp.eq.s32.totalorder %v3689_v53, %v3186_v18 }
  0xd0   : > { %vm1201_vm8 = vmor %vm929_vm5, %vm1073_vm2  ;;  %vm791_vm2 = vcmp.eq.s32.totalorder %v3689_v53, %v3188_v19 }
  0xd1   : > { %vm1473_vm10 = vmor %vm1201_vm8, %vm1345_vm4  ;;  %vm1063_vm4 = vcmp.eq.s32.totalorder %v3689_v53, %v3203_v23  ;;  %vm376_vm8 = vcmp.eq.s32.totalorder %v3689_v53, %v3205_v24 }
  0xd2   : > { %v2751_v55 = vsel %vm1473_vm10, 1.0, %v3024_v33  ;;  %vm646_vm12 = vmor %vm374_vm6, %vm518_vm7  ;;  %vm1335_vm6 = vcmp.eq.s32.totalorder %v3689_v53, %v3209_v27 }
  0xd3   : > { %1930 = vmatpush.msra.mxu3 %v2751_v55  ;;  %vm918_vm14 = vmor %vm646_vm12, %vm790_vm9  ;;  %vm520_vm9 = vcmp.eq.s32.totalorder %v3689_v53, %v3217_v31  ;;  %v740_v55 = vadd.s32 14, %v307_v42 }
  0xd4   : > { %vm1190_vm1 = vmor %vm918_vm14, %vm1062_vm11  ;;  %vm792_vm11 = vcmp.eq.s32.totalorder %v3689_v53, %v3219_v32 }
  0xd5   : > { %vm1462_vm3 = vmor %vm1190_vm1, %vm1334_vm13  ;;  %vm1064_vm13 = vcmp.eq.s32.totalorder %v3689_v53, %v3230_v35  ;;  %vm377_vm1 = vcmp.eq.s32.totalorder %v3689_v53, %v3241_v37 }
  0xd6   : > { %v2740_v56 = vsel %vm1462_vm3, 1.0, %v3024_v33  ;;  %vm647_vm5 = vmor %vm375_vm15, %vm519_vm0  ;;  %vm1336_vm15 = vcmp.eq.s32.totalorder %v3689_v53, %v3232_v36 }
  0xd7   : > { %1844 = vmatpush.msra.mxu0 %v2740_v56  ;;  %vm919_vm7 = vmor %vm647_vm5, %vm791_vm2  ;;  %vm521_vm2 = vcmp.eq.s32.totalorder %v3689_v53, %v3250_v41  ;;  %v308_v56 = vld [vmem:[%s3159_s9 + $0x38] sm:$0x1f] }
  0xd8   : > { %vm1191_vm10 = vmor %vm919_vm7, %vm1063_vm4  ;;  %vm793_vm4 = vcmp.eq.s32.totalorder %v3689_v53, %v3255_v44 }
  0xd9   : > { %vm1463_vm12 = vmor %vm1191_vm10, %vm1335_vm6  ;;  %vm1065_vm6 = vcmp.eq.s32.totalorder %v3689_v53, %v3257_v45  ;;  %vm366_vm10 = vcmp.eq.s32.totalorder %v3736_v59, %v3172_v6 }
  0xda   : > { %v2741_v58 = vsel %vm1463_vm12, 1.0, %v3024_v33  ;;  %vm648_vm14 = vmor %vm376_vm8, %vm520_vm9  ;;  %vm1337_vm8 = vcmp.eq.s32.totalorder %v3689_v53, %v3263_v46 }
  0xdb   : > { %1873 = vmatpush.msra.mxu1 %v2741_v58  ;;  %vm920_vm0 = vmor %vm648_vm14, %vm792_vm11  ;;  %vm510_vm11 = vcmp.eq.s32.totalorder %v3736_v59, %v3178_v14  ;;  %v1012_v58 = vadd.s32 78, %v307_v42 }
  0xdc   : > { %vm1192_vm3 = vmor %vm920_vm0, %vm1064_vm13  ;;  %vm782_vm13 = vcmp.eq.s32.totalorder %v3736_v59, %v3180_v15 }
  0xdd   : > { %vm1464_vm5 = vmor %vm1192_vm3, %vm1336_vm15  ;;  %vm1054_vm15 = vcmp.eq.s32.totalorder %v3736_v59, %v3182_v16  ;;  %vm367_vm3 = vcmp.eq.s32.totalorder %v3736_v59, %v3174_v11 }
  0xde   : > { %v2742_v60 = vsel %vm1464_vm5, 1.0, %v3024_v33  ;;  %vm649_vm7 = vmor %vm377_vm1, %vm521_vm2  ;;  %vm1326_vm1 = vcmp.eq.s32.totalorder %v3736_v59, %v3184_v17 }
  0xdf   : > { %1902 = vmatpush.msra.mxu2 %v2742_v60  ;;  %vm921_vm9 = vmor %vm649_vm7, %vm793_vm4  ;;  %vm511_vm4 = vcmp.eq.s32.totalorder %v3736_v59, %v3186_v18 }
  0xe0   : > { %vm1193_vm12 = vmor %vm921_vm9, %vm1065_vm6  ;;  %vm783_vm6 = vcmp.eq.s32.totalorder %v3736_v59, %v3188_v19 }
  0xe1   : > { %vm1465_vm14 = vmor %vm1193_vm12, %vm1337_vm8  ;;  %vm1055_vm8 = vcmp.eq.s32.totalorder %v3736_v59, %v3203_v23  ;;  %vm368_vm12 = vcmp.eq.s32.totalorder %v3736_v59, %v3205_v24 }
  0xe2   : > { %v2743_v61 = vsel %vm1465_vm14, 1.0, %v3024_v33  ;;  %vm638_vm0 = vmor %vm366_vm10, %vm510_vm11  ;;  %vm1327_vm10 = vcmp.eq.s32.totalorder %v3736_v59, %v3209_v27 }
  0xe3   : > { %1931 = vmatpush.msra.mxu3 %v2743_v61  ;;  %vm910_vm2 = vmor %vm638_vm0, %vm782_vm13  ;;  %vm512_vm13 = vcmp.eq.s32.totalorder %v3736_v59, %v3217_v31  ;;  %v1284_v61 = vadd.s32 110, %v307_v42 }
  0xe4   : > { %vm1182_vm5 = vmor %vm910_vm2, %vm1054_vm15  ;;  %vm784_vm15 = vcmp.eq.s32.totalorder %v3736_v59, %v3219_v32 }
  0xe5   : > { %vm1454_vm7 = vmor %vm1182_vm5, %vm1326_vm1  ;;  %vm1056_vm1 = vcmp.eq.s32.totalorder %v3736_v59, %v3230_v35  ;;  %vm369_vm5 = vcmp.eq.s32.totalorder %v3736_v59, %v3241_v37 }
  0xe6   : > { %v2732_v63 = vsel %vm1454_vm7, 1.0, %v3024_v33  ;;  %vm639_vm9 = vmor %vm367_vm3, %vm511_vm4  ;;  %vm1328_vm3 = vcmp.eq.s32.totalorder %v3736_v59, %v3232_v36 }
  0xe7   : > { %1845 = vmatpush.msra.mxu0 %v2732_v63  ;;  %vm911_vm11 = vmor %vm639_vm9, %vm783_vm6  ;;  %vm513_vm6 = vcmp.eq.s32.totalorder %v3736_v59, %v3250_v41  ;;  %v4048_v63 = vperm.slane %v307_v42, 0 }
  0xe8   : > { %vm1183_vm14 = vmor %vm911_vm11, %vm1055_vm8  ;;  %vm785_vm8 = vcmp.eq.s32.totalorder %v3736_v59, %v3255_v44 }
  0xe9   : > { %vm1455_vm0 = vmor %vm1183_vm14, %vm1327_vm10  ;;  %vm1057_vm10 = vcmp.eq.s32.totalorder %v3736_v59, %v3257_v45  ;;  %vm358_vm14 = vcmp.eq.s32.totalorder %v3783_v1, %v3172_v6 }
  0xea   : > { %v2733_v0 = vsel %vm1455_vm0, 1.0, %v3024_v33  ;;  %vm640_vm2 = vmor %vm368_vm12, %vm512_vm13  ;;  %vm1329_vm12 = vcmp.eq.s32.totalorder %v3736_v59, %v3263_v46 }
  0xeb   : > { %1874 = vmatpush.msra.mxu1 %v2733_v0  ;;  %vm912_vm4 = vmor %vm640_vm2, %vm784_vm15  ;;  %vm502_vm15 = vcmp.eq.s32.totalorder %v3783_v1, %v3178_v14 }
  0xec   : > { %vm1184_vm7 = vmor %vm912_vm4, %vm1056_vm1  ;;  %vm774_vm1 = vcmp.eq.s32.totalorder %v3783_v1, %v3180_v15 }
  0xed   : > { %vm1456_vm9 = vmor %vm1184_vm7, %vm1328_vm3  ;;  %vm1046_vm3 = vcmp.eq.s32.totalorder %v3783_v1, %v3182_v16  ;;  %vm359_vm7 = vcmp.eq.s32.totalorder %v3783_v1, %v3174_v11 }
  0xee   : > { %v2734_v4 = vsel %vm1456_vm9, 1.0, %v3024_v33  ;;  %vm641_vm11 = vmor %vm369_vm5, %vm513_vm6  ;;  %vm1318_vm5 = vcmp.eq.s32.totalorder %v3783_v1, %v3184_v17 }
  0xef   : > { %1903 = vmatpush.msra.mxu2 %v2734_v4  ;;  %vm913_vm13 = vmor %vm641_vm11, %vm785_vm8  ;;  %vm503_vm8 = vcmp.eq.s32.totalorder %v3783_v1, %v3186_v18  ;;  %v469_v4 = vadd.s32 8, %v308_v56 }
  0xf0   : > { %vm1185_vm0 = vmor %vm913_vm13, %vm1057_vm10  ;;  %vm775_vm10 = vcmp.eq.s32.totalorder %v3783_v1, %v3188_v19 }
  0xf1   : > { %vm1457_vm2 = vmor %vm1185_vm0, %vm1329_vm12  ;;  %vm1047_vm12 = vcmp.eq.s32.totalorder %v3783_v1, %v3203_v23  ;;  %vm360_vm0 = vcmp.eq.s32.totalorder %v3783_v1, %v3205_v24 }
  0xf2   : > { %v2735_v7 = vsel %vm1457_vm2, 1.0, %v3024_v33  ;;  %vm630_vm4 = vmor %vm358_vm14, %vm502_vm15  ;;  %vm1319_vm14 = vcmp.eq.s32.totalorder %v3783_v1, %v3209_v27 }
  0xf3   : > { %1932 = vmatpush.msra.mxu3 %v2735_v7  ;;  %vm902_vm6 = vmor %vm630_vm4, %vm774_vm1  ;;  %vm504_vm1 = vcmp.eq.s32.totalorder %v3783_v1, %v3217_v31  ;;  %v4058_v7 = vperm.slane %v740_v55, 2 }
  0xf4   : > { %vm1174_vm9 = vmor %vm902_vm6, %vm1046_vm3  ;;  %vm776_vm3 = vcmp.eq.s32.totalorder %v3783_v1, %v3219_v32 }
  0xf5   : > { %vm1446_vm11 = vmor %vm1174_vm9, %vm1318_vm5  ;;  %vm1048_vm5 = vcmp.eq.s32.totalorder %v3783_v1, %v3230_v35  ;;  %vm361_vm9 = vcmp.eq.s32.totalorder %v3783_v1, %v3241_v37 }
  0xf6   : > { %v2724_v8 = vsel %vm1446_vm11, 1.0, %v3024_v33  ;;  %vm631_vm13 = vmor %vm359_vm7, %vm503_vm8  ;;  %vm1320_vm7 = vcmp.eq.s32.totalorder %v3783_v1, %v3232_v36 }
  0xf7   : > { %1846 = vmatpush.msra.mxu0 %v2724_v8  ;;  %vm903_vm15 = vmor %vm631_vm13, %vm775_vm10  ;;  %vm505_vm10 = vcmp.eq.s32.totalorder %v3783_v1, %v3250_v41  ;;  %v741_v8 = vadd.s32 14, %v308_v56 }
  0xf8   : > { %vm1175_vm2 = vmor %vm903_vm15, %vm1047_vm12  ;;  %vm777_vm12 = vcmp.eq.s32.totalorder %v3783_v1, %v3255_v44 }
  0xf9   : > { %vm1447_vm4 = vmor %vm1175_vm2, %vm1319_vm14  ;;  %vm1049_vm14 = vcmp.eq.s32.totalorder %v3783_v1, %v3257_v45  ;;  %vm350_vm2 = vcmp.eq.s32.totalorder %v3830_v10, %v3172_v6 }
  0xfa   : > { %v2725_v9 = vsel %vm1447_vm4, 1.0, %v3024_v33  ;;  %vm632_vm6 = vmor %vm360_vm0, %vm504_vm1  ;;  %vm1321_vm0 = vcmp.eq.s32.totalorder %v3783_v1, %v3263_v46 }
  0xfb   : > { %1875 = vmatpush.msra.mxu1 %v2725_v9  ;;  %vm904_vm8 = vmor %vm632_vm6, %vm776_vm3  ;;  %vm494_vm3 = vcmp.eq.s32.totalorder %v3830_v10, %v3178_v14  ;;  %v4062_v9 = vperm.slane %v1012_v58, 3 }
  0xfc   : > { %vm1176_vm11 = vmor %vm904_vm8, %vm1048_vm5  ;;  %vm766_vm5 = vcmp.eq.s32.totalorder %v3830_v10, %v3180_v15 }
  0xfd   : > { %vm1448_vm13 = vmor %vm1176_vm11, %vm1320_vm7  ;;  %vm1038_vm7 = vcmp.eq.s32.totalorder %v3830_v10, %v3182_v16  ;;  %vm351_vm11 = vcmp.eq.s32.totalorder %v3830_v10, %v3174_v11 }
  0xfe   : > { %v2726_v13 = vsel %vm1448_vm13, 1.0, %v3024_v33  ;;  %vm633_vm15 = vmor %vm361_vm9, %vm505_vm10  ;;  %vm1310_vm9 = vcmp.eq.s32.totalorder %v3830_v10, %v3184_v17 }
  0xff   : > { %1904 = vmatpush.msra.mxu2 %v2726_v13  ;;  %vm905_vm1 = vmor %vm633_vm15, %vm777_vm12  ;;  %vm495_vm12 = vcmp.eq.s32.totalorder %v3830_v10, %v3186_v18  ;;  %v1013_v13 = vadd.s32 78, %v308_v56 }
 0x100   : > { %vm1177_vm4 = vmor %vm905_vm1, %vm1049_vm14  ;;  %vm767_vm14 = vcmp.eq.s32.totalorder %v3830_v10, %v3188_v19 }
 0x101   : > { %vm1449_vm6 = vmor %vm1177_vm4, %vm1321_vm0  ;;  %vm1039_vm0 = vcmp.eq.s32.totalorder %v3830_v10, %v3203_v23  ;;  %vm352_vm4 = vcmp.eq.s32.totalorder %v3830_v10, %v3205_v24 }
 0x102   : > { %v2727_v20 = vsel %vm1449_vm6, 1.0, %v3024_v33  ;;  %vm622_vm8 = vmor %vm350_vm2, %vm494_vm3  ;;  %vm1311_vm2 = vcmp.eq.s32.totalorder %v3830_v10, %v3209_v27 }
 0x103   : > { %1933 = vmatpush.msra.mxu3 %v2727_v20  ;;  %vm894_vm10 = vmor %vm622_vm8, %vm766_vm5  ;;  %vm496_vm5 = vcmp.eq.s32.totalorder %v3830_v10, %v3217_v31 }
 0x104   : > { %vm1166_vm13 = vmor %vm894_vm10, %vm1038_vm7  ;;  %vm768_vm7 = vcmp.eq.s32.totalorder %v3830_v10, %v3219_v32 }
 0x105   : > { %vm1438_vm15 = vmor %vm1166_vm13, %vm1310_vm9  ;;  %vm1040_vm9 = vcmp.eq.s32.totalorder %v3830_v10, %v3230_v35  ;;  %vm353_vm13 = vcmp.eq.s32.totalorder %v3830_v10, %v3241_v37 }
 0x106   : > { %v2716_v21 = vsel %vm1438_vm15, 1.0, %v3024_v33  ;;  %vm623_vm1 = vmor %vm351_vm11, %vm495_vm12  ;;  %vm1312_vm11 = vcmp.eq.s32.totalorder %v3830_v10, %v3232_v36 }
 0x107   : > { %1847 = vmatpush.msra.mxu0 %v2716_v21  ;;  %vm895_vm3 = vmor %vm623_vm1, %vm767_vm14  ;;  %vm497_vm14 = vcmp.eq.s32.totalorder %v3830_v10, %v3250_v41  ;;  %v4070_v21 = vperm.slane %v1284_v61, 4  ;;  %v1810_v61 = vld [vmem:[%s5045_s2] sm:$0xff] }
 0x108   : > { %vm1167_vm6 = vmor %vm895_vm3, %vm1039_vm0  ;;  %vm769_vm0 = vcmp.eq.s32.totalorder %v3830_v10, %v3255_v44 }
 0x109   : > { %vm1439_vm8 = vmor %vm1167_vm6, %vm1311_vm2  ;;  %vm1041_vm2 = vcmp.eq.s32.totalorder %v3830_v10, %v3257_v45  ;;  %vm342_vm6 = vcmp.eq.s32.totalorder %v3877_v26, %v3172_v6 }
 0x10a   : > { %v2717_v22 = vsel %vm1439_vm8, 1.0, %v3024_v33  ;;  %vm624_vm10 = vmor %vm352_vm4, %vm496_vm5  ;;  %vm1313_vm4 = vcmp.eq.s32.totalorder %v3830_v10, %v3263_v46 }
 0x10b   : > { %1876 = vmatpush.msra.mxu1 %v2717_v22  ;;  %vm896_vm12 = vmor %vm624_vm10, %vm768_vm7  ;;  %vm486_vm7 = vcmp.eq.s32.totalorder %v3877_v26, %v3178_v14  ;;  %v1285_v22 = vadd.s32 110, %v308_v56 }
 0x10c   : > { %vm1168_vm15 = vmor %vm896_vm12, %vm1040_vm9  ;;  %vm758_vm9 = vcmp.eq.s32.totalorder %v3877_v26, %v3180_v15 }
 0x10d   : > { %vm1440_vm1 = vmor %vm1168_vm15, %vm1312_vm11  ;;  %vm1030_vm11 = vcmp.eq.s32.totalorder %v3877_v26, %v3182_v16  ;;  %vm343_vm15 = vcmp.eq.s32.totalorder %v3877_v26, %v3174_v11 }
 0x10e   : > { %v2718_v28 = vsel %vm1440_vm1, 1.0, %v3024_v33  ;;  %vm625_vm3 = vmor %vm353_vm13, %vm497_vm14  ;;  %vm1302_vm13 = vcmp.eq.s32.totalorder %v3877_v26, %v3184_v17 }
 0x10f   : > { %1905 = vmatpush.msra.mxu2 %v2718_v28  ;;  %vm897_vm5 = vmor %vm625_vm3, %vm769_vm0  ;;  %vm487_vm0 = vcmp.eq.s32.totalorder %v3877_v26, %v3186_v18  ;;  %v4076_v28 = vperm.slane %v308_v56, 0 }
 0x110   : > { %vm1169_vm8 = vmor %vm897_vm5, %vm1041_vm2  ;;  %vm759_vm2 = vcmp.eq.s32.totalorder %v3877_v26, %v3188_v19 }
 0x111   : > { %vm1441_vm10 = vmor %vm1169_vm8, %vm1313_vm4  ;;  %vm1031_vm4 = vcmp.eq.s32.totalorder %v3877_v26, %v3203_v23  ;;  %vm344_vm8 = vcmp.eq.s32.totalorder %v3877_v26, %v3205_v24 }
 0x112   : > { %v2719_v29 = vsel %vm1441_vm10, 1.0, %v3024_v33  ;;  %vm614_vm12 = vmor %vm342_vm6, %vm486_vm7  ;;  %vm1303_vm6 = vcmp.eq.s32.totalorder %v3877_v26, %v3209_v27 }
 0x113   : > { %1934 = vmatpush.msra.mxu3 %v2719_v29  ;;  %vm886_vm14 = vmor %vm614_vm12, %vm758_vm9  ;;  %vm488_vm9 = vcmp.eq.s32.totalorder %v3877_v26, %v3217_v31  ;;  %v4078_v29 = vperm.slane %v469_v4, 1 }
 0x114   : > { %vm1158_vm1 = vmor %vm886_vm14, %vm1030_vm11  ;;  %vm760_vm11 = vcmp.eq.s32.totalorder %v3877_v26, %v3219_v32 }
 0x115   : > { %vm1430_vm3 = vmor %vm1158_vm1, %vm1302_vm13  ;;  %vm1032_vm13 = vcmp.eq.s32.totalorder %v3877_v26, %v3230_v35  ;;  %vm345_vm1 = vcmp.eq.s32.totalorder %v3877_v26, %v3241_v37 }
 0x116   : > { %v2708_v30 = vsel %vm1430_vm3, 1.0, %v3024_v33  ;;  %vm615_vm5 = vmor %vm343_vm15, %vm487_vm0  ;;  %vm1304_vm15 = vcmp.eq.s32.totalorder %v3877_v26, %v3232_v36 }
 0x117   : > { %1848 = vmatpush.msra.mxu0 %v2708_v30  ;;  %vm887_vm7 = vmor %vm615_vm5, %vm759_vm2  ;;  %vm489_vm2 = vcmp.eq.s32.totalorder %v3877_v26, %v3250_v41  ;;  %v4082_v30 = vperm.slane %v741_v8, 2 }
 0x118   : > { %vm1159_vm10 = vmor %vm887_vm7, %vm1031_vm4  ;;  %vm761_vm4 = vcmp.eq.s32.totalorder %v3877_v26, %v3255_v44 }
 0x119   : > { %vm1431_vm12 = vmor %vm1159_vm10, %vm1303_vm6  ;;  %vm1033_vm6 = vcmp.eq.s32.totalorder %v3877_v26, %v3257_v45  ;;  %vm334_vm10 = vcmp.eq.s32.totalorder %v3165_v2, %v3172_v6  ;;  %v305_v6 = vld [vmem:[%s3159_s9 + $0x20] sm:$0x1f] }
 0x11a   : > { %v2709_v38 = vsel %vm1431_vm12, 1.0, %v3024_v33  ;;  %vm616_vm14 = vmor %vm344_vm8, %vm488_vm9  ;;  %vm1305_vm8 = vcmp.eq.s32.totalorder %v3877_v26, %v3263_v46 }
 0x11b   : > { %1877 = vmatpush.msra.mxu1 %v2709_v38  ;;  %vm888_vm0 = vmor %vm616_vm14, %vm760_vm11  ;;  %vm478_vm11 = vcmp.eq.s32.totalorder %v3165_v2, %v3178_v14  ;;  %v3953_v14 = vld [vmem:[%s5044_s1] sm:$0xff]  ;;  %v4086_v38 = vperm.slane %v1013_v13, 3 }
 0x11c   : > { %vm1160_vm3 = vmor %vm888_vm0, %vm1032_vm13  ;;  %vm750_vm13 = vcmp.eq.s32.totalorder %v3165_v2, %v3180_v15  ;;  %v466_v15 = vadd.s32 8, %v305_v6 }
 0x11d   : > { %vm1432_vm5 = vmor %vm1160_vm3, %vm1304_vm15  ;;  %vm1022_vm15 = vcmp.eq.s32.totalorder %v3165_v2, %v3182_v16  ;;  %vm335_vm3 = vcmp.eq.s32.totalorder %v3165_v2, %v3174_v11  ;;  %v738_v16 = vadd.s32 14, %v305_v6 }
 0x11e   : > { %v2710_v39 = vsel %vm1432_vm5, 1.0, %v3024_v33  ;;  %vm617_vm7 = vmor %vm345_vm1, %vm489_vm2  ;;  %vm1294_vm1 = vcmp.eq.s32.totalorder %v3165_v2, %v3184_v17  ;;  %v306_v17 = vld [vmem:[%s3159_s9 + $0x28] sm:$0x1f] }
 0x11f   : > { %1906 = vmatpush.msra.mxu2 %v2710_v39  ;;  %vm889_vm9 = vmor %vm617_vm7, %vm761_vm4  ;;  %vm479_vm4 = vcmp.eq.s32.totalorder %v3165_v2, %v3186_v18  ;;  %v1010_v18 = vadd.s32 78, %v305_v6  ;;  %v3992_v49 = vperm.slane %v306_v17, 0  ;;  %v1011_v50 = vadd.s32 78, %v306_v17 }
 0x120   : > { %vm1161_vm12 = vmor %vm889_vm9, %vm1033_vm6  ;;  %vm751_vm6 = vcmp.eq.s32.totalorder %v3165_v2, %v3188_v19  ;;  %v1283_v54 = vadd.s32 110, %v306_v17 }
 0x121   : > { %vm1433_vm14 = vmor %vm1161_vm12, %vm1305_vm8  ;;  %vm1023_vm8 = vcmp.eq.s32.totalorder %v3165_v2, %v3203_v23  ;;  %vm336_vm12 = vcmp.eq.s32.totalorder %v3165_v2, %v3205_v24  ;;  %v1282_v23 = vadd.s32 110, %v305_v6  ;;  %v3975_v24 = vperm.slane %v305_v6, 0 }
 0x122   : > { %v2711_v40 = vsel %vm1433_vm14, 1.0, %v3024_v33  ;;  %vm606_vm0 = vmor %vm334_vm10, %vm478_vm11  ;;  %vm1295_vm10 = vcmp.eq.s32.totalorder %v3165_v2, %v3209_v27  ;;  %v3977_v27 = vperm.slane %v466_v15, 1  ;;  %v3990_v48 = vperm.slane %v1010_v18, 3 }
 0x123   : > { %1935 = vmatpush.msra.mxu3 %v2711_v40  ;;  %vm878_vm2 = vmor %vm606_vm0, %vm750_vm13  ;;  %vm480_vm13 = vcmp.eq.s32.totalorder %v3165_v2, %v3217_v31  ;;  %v467_v31 = vadd.s32 8, %v306_v17  ;;  %v4091_v40 = vperm.slane %v1285_v22, 4  ;;  %v3025_v18 = vmov 0  }
 0x124   : > { %vm1150_vm5 = vmor %vm878_vm2, %vm1022_vm15  ;;  %vm752_vm15 = vcmp.eq.s32.totalorder %v3165_v2, %v3219_v32  ;;  %v3982_v32 = vperm.slane %v738_v16, 2  ;;  %2922 = vset.pattern.permute.xlu1 %v3025_v18  ;;  %2921 = vset.pattern.permute.xlu0 %v3025_v18 }
 0x125   : > { %vm1422_vm7 = vmor %vm1150_vm5, %vm1294_vm1  ;;  %vm1024_vm1 = vcmp.eq.s32.totalorder %v3165_v2, %v3230_v35  ;;  %v739_v35 = vadd.s32 14, %v306_v17  ;;  %v1811_v17 = vld [vmem:[%s5045_s2 + $0x8] sm:$0xff]  ;;  %2923 = vset.pattern.permute.xlu2 %v3025_v18 }
 0x126   : > { %v2700_v11 = vsel %vm1422_vm7, 1.0, %v3024_v33  ;;  %vm607_vm9 = vmor %vm335_vm3, %vm479_vm4  ;;  %vm1296_vm3 = vcmp.eq.s32.totalorder %v3165_v2, %v3232_v36  ;;  %vm337_vm4 = vcmp.eq.s32.totalorder %v3165_v2, %v3241_v37  ;;  %v4003_v36 = vperm.slane %v1282_v23, 4  ;;  %1821 = vperm.xlu1 %2922, %v1811_v17   ;;  %v4539_v17 = vld [vmem:[%s5044_s1 + $0x18] sm:$0xff] }
 0x127   : > { %1849 = vmatpush.msra.mxu0 %v2700_v11  ;;  %vm879_vm11 = vmor %vm607_vm9, %vm751_vm6  ;;  %vm481_vm6 = vcmp.eq.s32.totalorder %v3165_v2, %v3250_v41  ;;  %v4012_v37 = vperm.slane %v467_v31, 1  ;;  %v468_v41 = vadd.s32 8, %v307_v42 }
 0x128   : > { %vm1151_vm14 = vmor %vm879_vm11, %vm1023_vm8  ;;  %1850 = vmatmul.f32.vlgmr.msra.gmra.mxu0 %v3953_v14  ;;  %vm753_vm8 = vcmp.eq.s32.totalorder %v3165_v2, %v3255_v44  ;;  %v4020_v44 = vperm.slane %v739_v35, 2 }
 0x129   : > { %vm1423_vm0 = vmor %vm1151_vm14, %vm1295_vm10  ;;  %vm1025_vm10 = vcmp.eq.s32.totalorder %v3165_v2, %v3257_v45  ;;  %vm458_vm14 = vcmp.eq.s32.totalorder %v3168_v3, %v3975_v24  ;;  %v4030_v45 = vperm.slane %v1011_v50, 3  ;;  %v4050_v0 = vperm.slane %v468_v41, 1 }
 0x12a   : > { %v2701_v19 = vsel %vm1423_vm0, 1.0, %v3024_v33  ;;  %vm608_vm2 = vmor %vm336_vm12, %vm480_vm13  ;;  %vm1297_vm12 = vcmp.eq.s32.totalorder %v3165_v2, %v3263_v46  ;;  %v4041_v46 = vperm.slane %v1283_v54, 4 }
 0x12b   : > { %1878 = vmatpush.msra.mxu1 %v2701_v19  ;;  %vm880_vm5 = vmor %vm608_vm2, %vm752_vm15  ;;  %vm602_vm15 = vcmp.eq.s32.totalorder %v3168_v3, %v3977_v27 }
 0x12c   : > { %vm1152_vm7 = vmor %vm880_vm5, %vm1024_vm1  ;;  %1879 = vmatmul.f32.vlgmr.msra.gmra.mxu1 %v3953_v14  ;;  %vm874_vm1 = vcmp.eq.s32.totalorder %v3168_v3, %v3982_v32 }
 0x12d   : > { %vm1424_vm9 = vmor %vm1152_vm7, %vm1296_vm3  ;;  %vm1146_vm3 = vcmp.eq.s32.totalorder %v3168_v3, %v3990_v48 }
 0x12e   : > { %v2702_v51 = vsel %vm1424_vm9, 1.0, %v3024_v33  ;;  %vm609_vm11 = vmor %vm337_vm4, %vm481_vm6  ;;  %vm459_vm4 = vcmp.eq.s32.totalorder %v3168_v3, %v3992_v49  ;;  %vm1418_vm6 = vcmp.eq.s32.totalorder %v3168_v3, %v4003_v36  ;;  %1816 = vperm.xlu1 %2922, %v1810_v61  }
 0x12f   : > { %1907 = vmatpush.msra.mxu2 %v2702_v51  ;;  %vm881_vm13 = vmor %vm609_vm11, %vm753_vm8  ;;  %vm603_vm8 = vcmp.eq.s32.totalorder %v3168_v3, %v4012_v37 }
 0x130   : > { %vm1153_vm0 = vmor %vm881_vm13, %vm1025_vm10  ;;  %1908 = vmatmul.f32.vlgmr.msra.gmra.mxu2 %v3953_v14  ;;  %vm875_vm10 = vcmp.eq.s32.totalorder %v3168_v3, %v4020_v44 }
 0x131   : > { %vm1425_vm2 = vmor %vm1153_vm0, %vm1297_vm12  ;;  %vm1147_vm12 = vcmp.eq.s32.totalorder %v3168_v3, %v4030_v45  ;;  %vm460_vm0 = vcmp.eq.s32.totalorder %v3168_v3, %v4048_v63 }
 0x132   : > { %v2703_v60 = vsel %vm1425_vm2, 1.0, %v3024_v33  ;;  %vm730_vm5 = vmor %vm458_vm14, %vm602_vm15  ;;  %vm1419_vm14 = vcmp.eq.s32.totalorder %v3168_v3, %v4041_v46 }
 0x133   : > { %1936 = vmatpush.msra.mxu3 %v2703_v60  ;;  %vm1002_vm7 = vmor %vm730_vm5, %vm874_vm1  ;;  %vm604_vm1 = vcmp.eq.s32.totalorder %v3168_v3, %v4050_v0  ;;  %vm1148_vm5 = vcmp.eq.s32.totalorder %v3168_v3, %v4062_v9 }
 0x134   : > { %1937 = vmatmul.f32.vlgmr.msra.gmra.mxu3 %v3953_v14  ;;  %vm1274_vm9 = vmor %vm1002_vm7, %vm1146_vm3  ;;  %vm876_vm3 = vcmp.eq.s32.totalorder %v3168_v3, %v4058_v7  ;;  %vm1420_vm7 = vcmp.eq.s32.totalorder %v3168_v3, %v4070_v21 }
 0x135   : > { %vm1546_vm11 = vmor %vm1274_vm9, %vm1418_vm6  ;;  %vm461_vm9 = vcmp.eq.s32.totalorder %v3168_v3, %v4076_v28 }
 0x136   : > { %v2824_v20 = vsel %vm1546_vm11, 1.0, %v3024_v33  ;;  %vm731_vm13 = vmor %vm459_vm4, %vm603_vm8 }
 0x137   : > { %1950 = vmatpush.msrb.mxu0 %v2824_v20  ;;  %vm1003_vm15 = vmor %vm731_vm13, %vm875_vm10  ;;  %vm605_vm10 = vcmp.eq.s32.totalorder %v3168_v3, %v4078_v29 }
 0x138   : > { %vm1275_vm2 = vmor %vm1003_vm15, %vm1147_vm12  ;;  %vm877_vm12 = vcmp.eq.s32.totalorder %v3168_v3, %v4082_v30 }
 0x139   : > { %vm1547_vm4 = vmor %vm1275_vm2, %vm1419_vm14  ;;  %vm1149_vm14 = vcmp.eq.s32.totalorder %v3168_v3, %v4086_v38  ;;  %vm450_vm2 = vcmp.eq.s32.totalorder %v3266_v47, %v3975_v24 }
 0x13a   : > { %v2825_v39 = vsel %vm1547_vm4, 1.0, %v3024_v33  ;;  %vm732_vm6 = vmor %vm460_vm0, %vm604_vm1  ;;  %vm1421_vm0 = vcmp.eq.s32.totalorder %v3168_v3, %v4091_v40 }
 0x13b   : > { %1979 = vmatpush.msrb.mxu1 %v2825_v39  ;;  %vm1004_vm8 = vmor %vm732_vm6, %vm876_vm3  ;;  %vm594_vm3 = vcmp.eq.s32.totalorder %v3266_v47, %v3977_v27 }
 0x13c   : > { %vm1276_vm11 = vmor %vm1004_vm8, %vm1148_vm5  ;;  %vm866_vm5 = vcmp.eq.s32.totalorder %v3266_v47, %v3982_v32 }
 0x13d   : > { %vm1548_vm13 = vmor %vm1276_vm11, %vm1420_vm7  ;;  %vm1138_vm7 = vcmp.eq.s32.totalorder %v3266_v47, %v3990_v48  ;;  %vm451_vm11 = vcmp.eq.s32.totalorder %v3266_v47, %v3992_v49 }
 0x13e   : > { %v2826_v6 = vsel %vm1548_vm13, 1.0, %v3024_v33  ;;  %vm733_vm15 = vmor %vm461_vm9, %vm605_vm10  ;;  %vm1410_vm9 = vcmp.eq.s32.totalorder %v3266_v47, %v4003_v36 }
 0x13f   : > { %2008 = vmatpush.msrb.mxu2 %v2826_v6  ;;  %vm1005_vm1 = vmor %vm733_vm15, %vm877_vm12  ;;  %vm595_vm12 = vcmp.eq.s32.totalorder %v3266_v47, %v4012_v37 }
 0x140   : > { %vm1277_vm4 = vmor %vm1005_vm1, %vm1149_vm14  ;;  %vm867_vm14 = vcmp.eq.s32.totalorder %v3266_v47, %v4020_v44 }
 0x141   : > { %vm1549_vm6 = vmor %vm1277_vm4, %vm1421_vm0  ;;  %vm1139_vm0 = vcmp.eq.s32.totalorder %v3266_v47, %v4030_v45  ;;  %vm452_vm4 = vcmp.eq.s32.totalorder %v3266_v47, %v4048_v63 }
 0x142   : > { %v2827_v14 = vsel %vm1549_vm6, 1.0, %v3024_v33  ;;  %vm722_vm8 = vmor %vm450_vm2, %vm594_vm3  ;;  %vm1411_vm2 = vcmp.eq.s32.totalorder %v3266_v47, %v4041_v46 }
 0x143   : > { %2037 = vmatpush.msrb.mxu3 %v2827_v14  ;;  %vm994_vm10 = vmor %vm722_vm8, %vm866_vm5  ;;  %vm596_vm5 = vcmp.eq.s32.totalorder %v3266_v47, %v4050_v0 }
 0x144   : > { %vm1266_vm13 = vmor %vm994_vm10, %vm1138_vm7  ;;  %vm868_vm7 = vcmp.eq.s32.totalorder %v3266_v47, %v4058_v7 }
 0x145   : > { %vm1538_vm15 = vmor %vm1266_vm13, %vm1410_vm9  ;;  %vm1140_vm9 = vcmp.eq.s32.totalorder %v3266_v47, %v4062_v9  ;;  %vm453_vm13 = vcmp.eq.s32.totalorder %v3266_v47, %v4076_v28 }
 0x146   : > { %v2816_v3 = vsel %vm1538_vm15, 1.0, %v3024_v33  ;;  %vm723_vm1 = vmor %vm451_vm11, %vm595_vm12  ;;  %vm1412_vm11 = vcmp.eq.s32.totalorder %v3266_v47, %v4070_v21 }
 0x147   : > { %1951 = vmatpush.msrb.mxu0 %v2816_v3  ;;  %vm995_vm3 = vmor %vm723_vm1, %vm867_vm14  ;;  %vm597_vm14 = vcmp.eq.s32.totalorder %v3266_v47, %v4078_v29 }
 0x148   : > { %vm1267_vm6 = vmor %vm995_vm3, %vm1139_vm0  ;;  %vm869_vm0 = vcmp.eq.s32.totalorder %v3266_v47, %v4082_v30 }
 0x149   : > { %vm1539_vm8 = vmor %vm1267_vm6, %vm1411_vm2  ;;  %vm1141_vm2 = vcmp.eq.s32.totalorder %v3266_v47, %v4086_v38  ;;  %vm442_vm6 = vcmp.eq.s32.totalorder %v3313_v52, %v3975_v24 }
 0x14a   : > { %v2817_v11 = vsel %vm1539_vm8, 1.0, %v3024_v33  ;;  %vm724_vm10 = vmor %vm452_vm4, %vm596_vm5  ;;  %vm1413_vm4 = vcmp.eq.s32.totalorder %v3266_v47, %v4091_v40  ;;  %v1807_v47 = vld [vmem:[%s5044_s1 + $0x8] sm:$0xff] }
 0x14b   : > { %1980 = vmatpush.msrb.mxu1 %v2817_v11  ;;  %vm996_vm12 = vmor %vm724_vm10, %vm868_vm7  ;;  %vm586_vm7 = vcmp.eq.s32.totalorder %v3313_v52, %v3977_v27  ;;  %1853 = vmatmul.f32.gmra.mxu0 %v1807_v47 }
 0x14c   : > { %vm1268_vm15 = vmor %vm996_vm12, %vm1140_vm9  ;;  %vm858_vm9 = vcmp.eq.s32.totalorder %v3313_v52, %v3982_v32  ;;  %1882 = vmatmul.f32.gmra.mxu1 %v1807_v47  ;;  %1911 = vmatmul.f32.gmra.mxu2 %v1807_v47 }
 0x14d   : > { %vm1540_vm1 = vmor %vm1268_vm15, %vm1412_vm11  ;;  %vm1130_vm11 = vcmp.eq.s32.totalorder %v3313_v52, %v3990_v48  ;;  %vm443_vm15 = vcmp.eq.s32.totalorder %v3313_v52, %v3992_v49  ;;  %1940 = vmatmul.f32.gmra.mxu3 %v1807_v47  ;;  %v1813_v47 = vld [vmem:[%s5045_s2 + $0x18] sm:$0xff] }
 0x14e   : > { %v2818_v15 = vsel %vm1540_vm1, 1.0, %v3024_v33  ;;  %vm725_vm3 = vmor %vm453_vm13, %vm597_vm14  ;;  %vm1402_vm13 = vcmp.eq.s32.totalorder %v3313_v52, %v4003_v36  ;;  %1831 = vperm.xlu0 %2921, %v1813_v47  }
 0x14f   : > { %2009 = vmatpush.msrb.mxu2 %v2818_v15  ;;  %vm997_vm5 = vmor %vm725_vm3, %vm869_vm0  ;;  %vm587_vm0 = vcmp.eq.s32.totalorder %v3313_v52, %v4012_v37 }
 0x150   : > { %vm1269_vm8 = vmor %vm997_vm5, %vm1141_vm2  ;;  %vm859_vm2 = vcmp.eq.s32.totalorder %v3313_v52, %v4020_v44 }
 0x151   : > { %vm1541_vm10 = vmor %vm1269_vm8, %vm1413_vm4  ;;  %vm1131_vm4 = vcmp.eq.s32.totalorder %v3313_v52, %v4030_v45  ;;  %vm444_vm8 = vcmp.eq.s32.totalorder %v3313_v52, %v4048_v63 }
 0x152   : > { %v2819_v16 = vsel %vm1541_vm10, 1.0, %v3024_v33  ;;  %vm714_vm12 = vmor %vm442_vm6, %vm586_vm7  ;;  %vm1403_vm6 = vcmp.eq.s32.totalorder %v3313_v52, %v4041_v46 }
 0x153   : > { %2038 = vmatpush.msrb.mxu3 %v2819_v16  ;;  %vm986_vm14 = vmor %vm714_vm12, %vm858_vm9  ;;  %vm588_vm9 = vcmp.eq.s32.totalorder %v3313_v52, %v4050_v0 }
 0x154   : > { %vm1258_vm1 = vmor %vm986_vm14, %vm1130_vm11  ;;  %vm860_vm11 = vcmp.eq.s32.totalorder %v3313_v52, %v4058_v7 }
 0x155   : > { %vm1530_vm3 = vmor %vm1258_vm1, %vm1402_vm13  ;;  %vm1132_vm13 = vcmp.eq.s32.totalorder %v3313_v52, %v4062_v9  ;;  %vm445_vm1 = vcmp.eq.s32.totalorder %v3313_v52, %v4076_v28 }
 0x156   : > { %v2808_v19 = vsel %vm1530_vm3, 1.0, %v3024_v33  ;;  %vm715_vm5 = vmor %vm443_vm15, %vm587_vm0  ;;  %vm1404_vm15 = vcmp.eq.s32.totalorder %v3313_v52, %v4070_v21 }
 0x157   : > { %1952 = vmatpush.msrb.mxu0 %v2808_v19  ;;  %vm987_vm7 = vmor %vm715_vm5, %vm859_vm2  ;;  %vm589_vm2 = vcmp.eq.s32.totalorder %v3313_v52, %v4078_v29 }
 0x158   : > { %vm1259_vm10 = vmor %vm987_vm7, %vm1131_vm4  ;;  %vm861_vm4 = vcmp.eq.s32.totalorder %v3313_v52, %v4082_v30 }
 0x159   : > { %vm1531_vm12 = vmor %vm1259_vm10, %vm1403_vm6  ;;  %vm1133_vm6 = vcmp.eq.s32.totalorder %v3313_v52, %v4086_v38  ;;  %vm434_vm10 = vcmp.eq.s32.totalorder %v3360_v57, %v3975_v24 }
 0x15a   : > { %v2809_v23 = vsel %vm1531_vm12, 1.0, %v3024_v33  ;;  %vm716_vm14 = vmor %vm444_vm8, %vm588_vm9  ;;  %vm1405_vm8 = vcmp.eq.s32.totalorder %v3313_v52, %v4091_v40 }
 0x15b   : > { %1981 = vmatpush.msrb.mxu1 %v2809_v23  ;;  %vm988_vm0 = vmor %vm716_vm14, %vm860_vm11  ;;  %vm578_vm11 = vcmp.eq.s32.totalorder %v3360_v57, %v3977_v27 }
 0x15c   : > { %vm1260_vm3 = vmor %vm988_vm0, %vm1132_vm13  ;;  %vm850_vm13 = vcmp.eq.s32.totalorder %v3360_v57, %v3982_v32 }
 0x15d   : > { %vm1532_vm5 = vmor %vm1260_vm3, %vm1404_vm15  ;;  %vm1122_vm15 = vcmp.eq.s32.totalorder %v3360_v57, %v3990_v48  ;;  %vm435_vm3 = vcmp.eq.s32.totalorder %v3360_v57, %v3992_v49 }
 0x15e   : > { %v2810_v31 = vsel %vm1532_vm5, 1.0, %v3024_v33  ;;  %vm717_vm7 = vmor %vm445_vm1, %vm589_vm2  ;;  %vm1394_vm1 = vcmp.eq.s32.totalorder %v3360_v57, %v4003_v36 }
 0x15f   : > { %2010 = vmatpush.msrb.mxu2 %v2810_v31  ;;  %vm989_vm9 = vmor %vm717_vm7, %vm861_vm4  ;;  %vm579_vm4 = vcmp.eq.s32.totalorder %v3360_v57, %v4012_v37 }
 0x160   : > { %vm1261_vm12 = vmor %vm989_vm9, %vm1133_vm6  ;;  %vm851_vm6 = vcmp.eq.s32.totalorder %v3360_v57, %v4020_v44 }
 0x161   : > { %vm1533_vm14 = vmor %vm1261_vm12, %vm1405_vm8  ;;  %vm1123_vm8 = vcmp.eq.s32.totalorder %v3360_v57, %v4030_v45  ;;  %vm436_vm12 = vcmp.eq.s32.totalorder %v3360_v57, %v4048_v63 }
 0x162   : > { %v2811_v35 = vsel %vm1533_vm14, 1.0, %v3024_v33  ;;  %vm706_vm0 = vmor %vm434_vm10, %vm578_vm11  ;;  %vm1395_vm10 = vcmp.eq.s32.totalorder %v3360_v57, %v4041_v46 }
 0x163   : > { %2039 = vmatpush.msrb.mxu3 %v2811_v35  ;;  %vm978_vm2 = vmor %vm706_vm0, %vm850_vm13  ;;  %vm580_vm13 = vcmp.eq.s32.totalorder %v3360_v57, %v4050_v0 }
 0x164   : > { %vm1250_vm5 = vmor %vm978_vm2, %vm1122_vm15  ;;  %vm852_vm15 = vcmp.eq.s32.totalorder %v3360_v57, %v4058_v7 }
 0x165   : > { %vm1522_vm7 = vmor %vm1250_vm5, %vm1394_vm1  ;;  %vm1124_vm1 = vcmp.eq.s32.totalorder %v3360_v57, %v4062_v9  ;;  %vm437_vm5 = vcmp.eq.s32.totalorder %v3360_v57, %v4076_v28 }
 0x166   : > { %v2800_v52 = vsel %vm1522_vm7, 1.0, %v3024_v33  ;;  %vm707_vm9 = vmor %vm435_vm3, %vm579_vm4  ;;  %vm1396_vm3 = vcmp.eq.s32.totalorder %v3360_v57, %v4070_v21 }
 0x167   : > { %1953 = vmatpush.msrb.mxu0 %v2800_v52  ;;  %vm979_vm11 = vmor %vm707_vm9, %vm851_vm6  ;;  %vm581_vm6 = vcmp.eq.s32.totalorder %v3360_v57, %v4078_v29 }
 0x168   : > { %vm1251_vm14 = vmor %vm979_vm11, %vm1123_vm8  ;;  %vm853_vm8 = vcmp.eq.s32.totalorder %v3360_v57, %v4082_v30 }
 0x169   : > { %vm1523_vm0 = vmor %vm1251_vm14, %vm1395_vm10  ;;  %vm1125_vm10 = vcmp.eq.s32.totalorder %v3360_v57, %v4086_v38  ;;  %vm426_vm14 = vcmp.eq.s32.totalorder %v3407_v62, %v3975_v24 }
 0x16a   : > { %v2801_v42 = vsel %vm1523_vm0, 1.0, %v3024_v33  ;;  %vm708_vm2 = vmor %vm436_vm12, %vm580_vm13  ;;  %vm1397_vm12 = vcmp.eq.s32.totalorder %v3360_v57, %v4091_v40 }
 0x16b   : > { %1982 = vmatpush.msrb.mxu1 %v2801_v42  ;;  %vm980_vm4 = vmor %vm708_vm2, %vm852_vm15  ;;  %vm570_vm15 = vcmp.eq.s32.totalorder %v3407_v62, %v3977_v27 }
 0x16c   : > { %vm1252_vm7 = vmor %vm980_vm4, %vm1124_vm1  ;;  %vm842_vm1 = vcmp.eq.s32.totalorder %v3407_v62, %v3982_v32 }
 0x16d   : > { %vm1524_vm9 = vmor %vm1252_vm7, %vm1396_vm3  ;;  %vm1114_vm3 = vcmp.eq.s32.totalorder %v3407_v62, %v3990_v48  ;;  %vm427_vm7 = vcmp.eq.s32.totalorder %v3407_v62, %v3992_v49 }
 0x16e   : > { %v2802_v50 = vsel %vm1524_vm9, 1.0, %v3024_v33  ;;  %vm709_vm11 = vmor %vm437_vm5, %vm581_vm6  ;;  %vm1386_vm5 = vcmp.eq.s32.totalorder %v3407_v62, %v4003_v36 }
 0x16f   : > { %2011 = vmatpush.msrb.mxu2 %v2802_v50  ;;  %vm981_vm13 = vmor %vm709_vm11, %vm853_vm8  ;;  %vm571_vm8 = vcmp.eq.s32.totalorder %v3407_v62, %v4012_v37 }
 0x170   : > { %vm1253_vm0 = vmor %vm981_vm13, %vm1125_vm10  ;;  %vm843_vm10 = vcmp.eq.s32.totalorder %v3407_v62, %v4020_v44 }
 0x171   : > { %vm1525_vm2 = vmor %vm1253_vm0, %vm1397_vm12  ;;  %vm1115_vm12 = vcmp.eq.s32.totalorder %v3407_v62, %v4030_v45  ;;  %vm428_vm0 = vcmp.eq.s32.totalorder %v3407_v62, %v4048_v63 }
 0x172   : > { %v2803_v51 = vsel %vm1525_vm2, 1.0, %v3024_v33  ;;  %vm698_vm4 = vmor %vm426_vm14, %vm570_vm15  ;;  %vm1387_vm14 = vcmp.eq.s32.totalorder %v3407_v62, %v4041_v46 }
 0x173   : > { %2040 = vmatpush.msrb.mxu3 %v2803_v51  ;;  %vm970_vm6 = vmor %vm698_vm4, %vm842_vm1  ;;  %vm572_vm1 = vcmp.eq.s32.totalorder %v3407_v62, %v4050_v0 }
 0x174   : > { %vm1242_vm9 = vmor %vm970_vm6, %vm1114_vm3  ;;  %vm844_vm3 = vcmp.eq.s32.totalorder %v3407_v62, %v4058_v7 }
 0x175   : > { %vm1514_vm11 = vmor %vm1242_vm9, %vm1386_vm5  ;;  %vm1116_vm5 = vcmp.eq.s32.totalorder %v3407_v62, %v4062_v9  ;;  %vm429_vm9 = vcmp.eq.s32.totalorder %v3407_v62, %v4076_v28 }
 0x176   : > { %v2792_v57 = vsel %vm1514_vm11, 1.0, %v3024_v33  ;;  %vm699_vm13 = vmor %vm427_vm7, %vm571_vm8  ;;  %vm1388_vm7 = vcmp.eq.s32.totalorder %v3407_v62, %v4070_v21 }
 0x177   : > { %1954 = vmatpush.msrb.mxu0 %v2792_v57  ;;  %vm971_vm15 = vmor %vm699_vm13, %vm843_vm10  ;;  %vm573_vm10 = vcmp.eq.s32.totalorder %v3407_v62, %v4078_v29 }
 0x178   : > { %vm1243_vm2 = vmor %vm971_vm15, %vm1115_vm12  ;;  %vm845_vm12 = vcmp.eq.s32.totalorder %v3407_v62, %v4082_v30 }
 0x179   : > { %vm1515_vm4 = vmor %vm1243_vm2, %vm1387_vm14  ;;  %vm1117_vm14 = vcmp.eq.s32.totalorder %v3407_v62, %v4086_v38  ;;  %vm418_vm2 = vcmp.eq.s32.totalorder %v3454_v5, %v3975_v24 }
 0x17a   : > { %v2793_v54 = vsel %vm1515_vm4, 1.0, %v3024_v33  ;;  %vm700_vm6 = vmor %vm428_vm0, %vm572_vm1  ;;  %vm1389_vm0 = vcmp.eq.s32.totalorder %v3407_v62, %v4091_v40 }
 0x17b   : > { %1983 = vmatpush.msrb.mxu1 %v2793_v54  ;;  %vm972_vm8 = vmor %vm700_vm6, %vm844_vm3  ;;  %vm562_vm3 = vcmp.eq.s32.totalorder %v3454_v5, %v3977_v27 }
 0x17c   : > { %vm1244_vm11 = vmor %vm972_vm8, %vm1116_vm5  ;;  %vm834_vm5 = vcmp.eq.s32.totalorder %v3454_v5, %v3982_v32 }
 0x17d   : > { %vm1516_vm13 = vmor %vm1244_vm11, %vm1388_vm7  ;;  %vm1106_vm7 = vcmp.eq.s32.totalorder %v3454_v5, %v3990_v48  ;;  %vm419_vm11 = vcmp.eq.s32.totalorder %v3454_v5, %v3992_v49 }
 0x17e   : > { %v2794_v41 = vsel %vm1516_vm13, 1.0, %v3024_v33  ;;  %vm701_vm15 = vmor %vm429_vm9, %vm573_vm10  ;;  %vm1378_vm9 = vcmp.eq.s32.totalorder %v3454_v5, %v4003_v36 }
 0x17f   : > { %2012 = vmatpush.msrb.mxu2 %v2794_v41  ;;  %vm973_vm1 = vmor %vm701_vm15, %vm845_vm12  ;;  %vm563_vm12 = vcmp.eq.s32.totalorder %v3454_v5, %v4012_v37 }
 0x180   : > { %vm1245_vm4 = vmor %vm973_vm1, %vm1117_vm14  ;;  %vm835_vm14 = vcmp.eq.s32.totalorder %v3454_v5, %v4020_v44 }
 0x181   : > { %vm1517_vm6 = vmor %vm1245_vm4, %vm1389_vm0  ;;  %vm1107_vm0 = vcmp.eq.s32.totalorder %v3454_v5, %v4030_v45  ;;  %vm420_vm4 = vcmp.eq.s32.totalorder %v3454_v5, %v4048_v63 }
 0x182   : > { %v2795_v55 = vsel %vm1517_vm6, 1.0, %v3024_v33  ;;  %vm690_vm8 = vmor %vm418_vm2, %vm562_vm3  ;;  %vm1379_vm2 = vcmp.eq.s32.totalorder %v3454_v5, %v4041_v46 }
 0x183   : > { %2041 = vmatpush.msrb.mxu3 %v2795_v55  ;;  %vm962_vm10 = vmor %vm690_vm8, %vm834_vm5  ;;  %vm564_vm5 = vcmp.eq.s32.totalorder %v3454_v5, %v4050_v0  ;;  %v1812_v55 = vld [vmem:[%s5045_s2 + $0x10] sm:$0xff] }
 0x184   : > { %vm1234_vm13 = vmor %vm962_vm10, %vm1106_vm7  ;;  %vm836_vm7 = vcmp.eq.s32.totalorder %v3454_v5, %v4058_v7  ;;  %1826 = vperm.xlu0 %2921, %v1812_v55  }
 0x185   : > { %vm1506_vm15 = vmor %vm1234_vm13, %vm1378_vm9  ;;  %vm1108_vm9 = vcmp.eq.s32.totalorder %v3454_v5, %v4062_v9  ;;  %vm421_vm13 = vcmp.eq.s32.totalorder %v3454_v5, %v4076_v28 }
 0x186   : > { %v2784_v62 = vsel %vm1506_vm15, 1.0, %v3024_v33  ;;  %vm691_vm1 = vmor %vm419_vm11, %vm563_vm12  ;;  %vm1380_vm11 = vcmp.eq.s32.totalorder %v3454_v5, %v4070_v21 }
 0x187   : > { %1955 = vmatpush.msrb.mxu0 %v2784_v62  ;;  %vm963_vm3 = vmor %vm691_vm1, %vm835_vm14  ;;  %vm565_vm14 = vcmp.eq.s32.totalorder %v3454_v5, %v4078_v29 }
 0x188   : > { %vm1235_vm6 = vmor %vm963_vm3, %vm1107_vm0  ;;  %vm837_vm0 = vcmp.eq.s32.totalorder %v3454_v5, %v4082_v30 }
 0x189   : > { %vm1507_vm8 = vmor %vm1235_vm6, %vm1379_vm2  ;;  %vm1109_vm2 = vcmp.eq.s32.totalorder %v3454_v5, %v4086_v38  ;;  %vm410_vm6 = vcmp.eq.s32.totalorder %v3501_v12, %v3975_v24 }
 0x18a   : > { %v2785_v56 = vsel %vm1507_vm8, 1.0, %v3024_v33  ;;  %vm692_vm10 = vmor %vm420_vm4, %vm564_vm5  ;;  %vm1381_vm4 = vcmp.eq.s32.totalorder %v3454_v5, %v4091_v40  ;;  %v4348_v5 = vld [vmem:[%s5044_s1 + $0x10] sm:$0xff] }
 0x18b   : > { %1984 = vmatpush.msrb.mxu1 %v2785_v56  ;;  %vm964_vm12 = vmor %vm692_vm10, %vm836_vm7  ;;  %vm554_vm7 = vcmp.eq.s32.totalorder %v3501_v12, %v3977_v27  ;;  %1856 = vmatmul.f32.gmra.mxu0 %v4348_v5  ;;  %v2103_v56 = vld [vmem:[%s5047_s4 + $0x8] sm:$0xff] }
 0x18c   : > { %vm1236_vm15 = vmor %vm964_vm12, %vm1108_vm9  ;;  %vm826_vm9 = vcmp.eq.s32.totalorder %v3501_v12, %v3982_v32  ;;  %1885 = vmatmul.f32.gmra.mxu1 %v4348_v5  ;;  %1914 = vmatmul.f32.gmra.mxu2 %v4348_v5 }
 0x18d   : > { %vm1508_vm1 = vmor %vm1236_vm15, %vm1380_vm11  ;;  %vm1098_vm11 = vcmp.eq.s32.totalorder %v3501_v12, %v3990_v48  ;;  %vm411_vm15 = vcmp.eq.s32.totalorder %v3501_v12, %v3992_v49  ;;  %1943 = vmatmul.f32.gmra.mxu3 %v4348_v5  ;;  %2113 = vperm.xlu0 %2921, %v2103_v56   ;;  %v4858_v56 = vld [vmem:[%s5046_s3 + $0x8] sm:$0xff] }
 0x18e   : > { %v2786_v58 = vsel %vm1508_vm1, 1.0, %v3024_v33  ;;  %vm693_vm3 = vmor %vm421_vm13, %vm565_vm14  ;;  %vm1370_vm13 = vcmp.eq.s32.totalorder %v3501_v12, %v4003_v36 }
 0x18f   : > { %2013 = vmatpush.msrb.mxu2 %v2786_v58  ;;  %vm965_vm5 = vmor %vm693_vm3, %vm837_vm0  ;;  %vm555_vm0 = vcmp.eq.s32.totalorder %v3501_v12, %v4012_v37 }
 0x190   : > { %vm1237_vm8 = vmor %vm965_vm5, %vm1109_vm2  ;;  %vm827_vm2 = vcmp.eq.s32.totalorder %v3501_v12, %v4020_v44 }
 0x191   : > { %vm1509_vm10 = vmor %vm1237_vm8, %vm1381_vm4  ;;  %vm1099_vm4 = vcmp.eq.s32.totalorder %v3501_v12, %v4030_v45  ;;  %vm412_vm8 = vcmp.eq.s32.totalorder %v3501_v12, %v4048_v63 }
 0x192   : > { %v2787_v60 = vsel %vm1509_vm10, 1.0, %v3024_v33  ;;  %vm682_vm12 = vmor %vm410_vm6, %vm554_vm7  ;;  %vm1371_vm6 = vcmp.eq.s32.totalorder %v3501_v12, %v4041_v46 }
 0x193   : > { %2042 = vmatpush.msrb.mxu3 %v2787_v60  ;;  %vm954_vm14 = vmor %vm682_vm12, %vm826_vm9  ;;  %vm556_vm9 = vcmp.eq.s32.totalorder %v3501_v12, %v4050_v0  ;;  %1859 = vmatmul.f32.gmra.mxu0 %v4539_v17  ;;  %v2102_v60 = vld [vmem:[%s5047_s4] sm:$0xff] }
 0x194   : > { %vm1226_vm1 = vmor %vm954_vm14, %vm1098_vm11  ;;  %vm828_vm11 = vcmp.eq.s32.totalorder %v3501_v12, %v4058_v7  ;;  %1888 = vmatmul.f32.gmra.mxu1 %v4539_v17  ;;  %1917 = vmatmul.f32.gmra.mxu2 %v4539_v17 }
 0x195   : > { %vm1498_vm3 = vmor %vm1226_vm1, %vm1370_vm13  ;;  %vm1100_vm13 = vcmp.eq.s32.totalorder %v3501_v12, %v4062_v9  ;;  %vm413_vm1 = vcmp.eq.s32.totalorder %v3501_v12, %v4076_v28  ;;  %1946 = vmatmul.f32.gmra.mxu3 %v4539_v17  ;;  %2108 = vperm.xlu1 %2922, %v2102_v60  }
 0x196   : > { %v2776_v4 = vsel %vm1498_vm3, 1.0, %v3024_v33  ;;  %vm683_vm5 = vmor %vm411_vm15, %vm555_vm0  ;;  %vm1372_vm15 = vcmp.eq.s32.totalorder %v3501_v12, %v4070_v21 }
 0x197   : > { %1956 = vmatpush.msrb.mxu0 %v2776_v4  ;;  %vm955_vm7 = vmor %vm683_vm5, %vm827_vm2  ;;  %vm557_vm2 = vcmp.eq.s32.totalorder %v3501_v12, %v4078_v29 }
 0x198   : > { %vm1227_vm10 = vmor %vm955_vm7, %vm1099_vm4  ;;  %vm829_vm4 = vcmp.eq.s32.totalorder %v3501_v12, %v4082_v30 }
 0x199   : > { %vm1499_vm12 = vmor %vm1227_vm10, %vm1371_vm6  ;;  %vm1101_vm6 = vcmp.eq.s32.totalorder %v3501_v12, %v4086_v38  ;;  %vm402_vm10 = vcmp.eq.s32.totalorder %v3548_v25, %v3975_v24 }
 0x19a   : > { %v2777_v8 = vsel %vm1499_vm12, 1.0, %v3024_v33  ;;  %vm684_vm14 = vmor %vm412_vm8, %vm556_vm9  ;;  %vm1373_vm8 = vcmp.eq.s32.totalorder %v3501_v12, %v4091_v40 }
 0x19b   : > { %1985 = vmatpush.msrb.mxu1 %v2777_v8  ;;  %vm956_vm0 = vmor %vm684_vm14, %vm828_vm11  ;;  %vm546_vm11 = vcmp.eq.s32.totalorder %v3548_v25, %v3977_v27 }
 0x19c   : > { %vm1228_vm3 = vmor %vm956_vm0, %vm1100_vm13  ;;  %vm818_vm13 = vcmp.eq.s32.totalorder %v3548_v25, %v3982_v32 }
 0x19d   : > { %vm1500_vm5 = vmor %vm1228_vm3, %vm1372_vm15  ;;  %vm1090_vm15 = vcmp.eq.s32.totalorder %v3548_v25, %v3990_v48  ;;  %vm403_vm3 = vcmp.eq.s32.totalorder %v3548_v25, %v3992_v49 }
 0x19e   : > { %v2778_v13 = vsel %vm1500_vm5, 1.0, %v3024_v33  ;;  %vm685_vm7 = vmor %vm413_vm1, %vm557_vm2  ;;  %vm1362_vm1 = vcmp.eq.s32.totalorder %v3548_v25, %v4003_v36 }
 0x19f   : > { %2014 = vmatpush.msrb.mxu2 %v2778_v13  ;;  %vm957_vm9 = vmor %vm685_vm7, %vm829_vm4  ;;  %vm547_vm4 = vcmp.eq.s32.totalorder %v3548_v25, %v4012_v37 }
 0x1a0   : > { %vm1229_vm12 = vmor %vm957_vm9, %vm1101_vm6  ;;  %vm819_vm6 = vcmp.eq.s32.totalorder %v3548_v25, %v4020_v44 }
 0x1a1   : > { %vm1501_vm14 = vmor %vm1229_vm12, %vm1373_vm8  ;;  %vm1091_vm8 = vcmp.eq.s32.totalorder %v3548_v25, %v4030_v45  ;;  %vm404_vm12 = vcmp.eq.s32.totalorder %v3548_v25, %v4048_v63 }
 0x1a2   : > { %v2779_v20 = vsel %vm1501_vm14, 1.0, %v3024_v33  ;;  %vm674_vm0 = vmor %vm402_vm10, %vm546_vm11  ;;  %vm1363_vm10 = vcmp.eq.s32.totalorder %v3548_v25, %v4041_v46 }
 0x1a3   : > { %2043 = vmatpush.msrb.mxu3 %v2779_v20  ;;  %vm946_vm2 = vmor %vm674_vm0, %vm818_vm13  ;;  %vm548_vm13 = vcmp.eq.s32.totalorder %v3548_v25, %v4050_v0 }
 0x1a4   : > { %vm1218_vm5 = vmor %vm946_vm2, %vm1090_vm15  ;;  %vm820_vm15 = vcmp.eq.s32.totalorder %v3548_v25, %v4058_v7 }
 0x1a5   : > { %vm1490_vm7 = vmor %vm1218_vm5, %vm1362_vm1  ;;  %vm1092_vm1 = vcmp.eq.s32.totalorder %v3548_v25, %v4062_v9  ;;  %vm405_vm5 = vcmp.eq.s32.totalorder %v3548_v25, %v4076_v28 }
 0x1a6   : > { %v2768_v12 = vsel %vm1490_vm7, 1.0, %v3024_v33  ;;  %vm675_vm9 = vmor %vm403_vm3, %vm547_vm4  ;;  %vm1364_vm3 = vcmp.eq.s32.totalorder %v3548_v25, %v4070_v21 }
 0x1a7   : > { %1957 = vmatpush.msrb.mxu0 %v2768_v12  ;;  %vm947_vm11 = vmor %vm675_vm9, %vm819_vm6  ;;  %vm549_vm6 = vcmp.eq.s32.totalorder %v3548_v25, %v4078_v29 }
 0x1a8   : > { %vm1219_vm14 = vmor %vm947_vm11, %vm1091_vm8  ;;  %vm821_vm8 = vcmp.eq.s32.totalorder %v3548_v25, %v4082_v30 }
 0x1a9   : > { %vm1491_vm0 = vmor %vm1219_vm14, %vm1363_vm10  ;;  %vm1093_vm10 = vcmp.eq.s32.totalorder %v3548_v25, %v4086_v38  ;;  %vm394_vm14 = vcmp.eq.s32.totalorder %v3595_v34, %v3975_v24 }
 0x1aa   : > { %v2769_v22 = vsel %vm1491_vm0, 1.0, %v3024_v33  ;;  %vm676_vm2 = vmor %vm404_vm12, %vm548_vm13  ;;  %vm1365_vm12 = vcmp.eq.s32.totalorder %v3548_v25, %v4091_v40 }
 0x1ab   : > { %1986 = vmatpush.msrb.mxu1 %v2769_v22  ;;  %vm948_vm4 = vmor %vm676_vm2, %vm820_vm15  ;;  %vm538_vm15 = vcmp.eq.s32.totalorder %v3595_v34, %v3977_v27 }
 0x1ac   : > { %vm1220_vm7 = vmor %vm948_vm4, %vm1092_vm1  ;;  %vm810_vm1 = vcmp.eq.s32.totalorder %v3595_v34, %v3982_v32 }
 0x1ad   : > { %vm1492_vm9 = vmor %vm1220_vm7, %vm1364_vm3  ;;  %vm1082_vm3 = vcmp.eq.s32.totalorder %v3595_v34, %v3990_v48  ;;  %vm395_vm7 = vcmp.eq.s32.totalorder %v3595_v34, %v3992_v49 }
 0x1ae   : > { %v2770_v39 = vsel %vm1492_vm9, 1.0, %v3024_v33  ;;  %vm677_vm11 = vmor %vm405_vm5, %vm549_vm6  ;;  %vm1354_vm5 = vcmp.eq.s32.totalorder %v3595_v34, %v4003_v36 }
 0x1af   : > { %2015 = vmatpush.msrb.mxu2 %v2770_v39  ;;  %vm949_vm13 = vmor %vm677_vm11, %vm821_vm8  ;;  %vm539_vm8 = vcmp.eq.s32.totalorder %v3595_v34, %v4012_v37 }
 0x1b0   : > { %vm1221_vm0 = vmor %vm949_vm13, %vm1093_vm10  ;;  %vm811_vm10 = vcmp.eq.s32.totalorder %v3595_v34, %v4020_v44 }
 0x1b1   : > { %vm1493_vm2 = vmor %vm1221_vm0, %vm1365_vm12  ;;  %vm1083_vm12 = vcmp.eq.s32.totalorder %v3595_v34, %v4030_v45  ;;  %vm396_vm0 = vcmp.eq.s32.totalorder %v3595_v34, %v4048_v63 }
 0x1b2   : > { %v2771_v6 = vsel %vm1493_vm2, 1.0, %v3024_v33  ;;  %vm666_vm4 = vmor %vm394_vm14, %vm538_vm15  ;;  %vm1355_vm14 = vcmp.eq.s32.totalorder %v3595_v34, %v4041_v46 }
 0x1b3   : > { %2044 = vmatpush.msrb.mxu3 %v2771_v6  ;;  %vm938_vm6 = vmor %vm666_vm4, %vm810_vm1  ;;  %vm540_vm1 = vcmp.eq.s32.totalorder %v3595_v34, %v4050_v0 }
 0x1b4   : > { %vm1210_vm9 = vmor %vm938_vm6, %vm1082_vm3  ;;  %vm812_vm3 = vcmp.eq.s32.totalorder %v3595_v34, %v4058_v7 }
 0x1b5   : > { %vm1482_vm11 = vmor %vm1210_vm9, %vm1354_vm5  ;;  %vm1084_vm5 = vcmp.eq.s32.totalorder %v3595_v34, %v4062_v9  ;;  %vm397_vm9 = vcmp.eq.s32.totalorder %v3595_v34, %v4076_v28 }
 0x1b6   : > { %v2760_v25 = vsel %vm1482_vm11, 1.0, %v3024_v33  ;;  %vm667_vm13 = vmor %vm395_vm7, %vm539_vm8  ;;  %vm1356_vm7 = vcmp.eq.s32.totalorder %v3595_v34, %v4070_v21 }
 0x1b7   : > { %1958 = vmatpush.msrb.mxu0 %v2760_v25  ;;  %vm939_vm15 = vmor %vm667_vm13, %vm811_vm10  ;;  %vm541_vm10 = vcmp.eq.s32.totalorder %v3595_v34, %v4078_v29  ;;  %v4824_v25 = vpop.permute.xlu1 %1821 }
 0x1b8   : > { %vm1211_vm2 = vmor %vm939_vm15, %vm1083_vm12  ;;  %vm813_vm12 = vcmp.eq.s32.totalorder %v3595_v34, %v4082_v30 }
 0x1b9   : > { %vm1483_vm4 = vmor %vm1211_vm2, %vm1355_vm14  ;;  %vm1085_vm14 = vcmp.eq.s32.totalorder %v3595_v34, %v4086_v38  ;;  %vm386_vm2 = vcmp.eq.s32.totalorder %v3642_v43, %v3975_v24 }
 0x1ba   : > { %v2761_v14 = vsel %vm1483_vm4, 1.0, %v3024_v33  ;;  %vm668_vm6 = vmor %vm396_vm0, %vm540_vm1  ;;  %vm1357_vm0 = vcmp.eq.s32.totalorder %v3595_v34, %v4091_v40 }
 0x1bb   : > { %1987 = vmatpush.msrb.mxu1 %v2761_v14  ;;  %vm940_vm8 = vmor %vm668_vm6, %vm812_vm3  ;;  %vm530_vm3 = vcmp.eq.s32.totalorder %v3642_v43, %v3977_v27 }
 0x1bc   : > { %vm1212_vm11 = vmor %vm940_vm8, %vm1084_vm5  ;;  %vm802_vm5 = vcmp.eq.s32.totalorder %v3642_v43, %v3982_v32 }
 0x1bd   : > { %vm1484_vm13 = vmor %vm1212_vm11, %vm1356_vm7  ;;  %vm1074_vm7 = vcmp.eq.s32.totalorder %v3642_v43, %v3990_v48  ;;  %vm387_vm11 = vcmp.eq.s32.totalorder %v3642_v43, %v3992_v49 }
 0x1be   : > { %v2762_v3 = vsel %vm1484_vm13, 1.0, %v3024_v33  ;;  %vm669_vm15 = vmor %vm397_vm9, %vm541_vm10  ;;  %vm1346_vm9 = vcmp.eq.s32.totalorder %v3642_v43, %v4003_v36 }
 0x1bf   : > { %2016 = vmatpush.msrb.mxu2 %v2762_v3  ;;  %vm941_vm1 = vmor %vm669_vm15, %vm813_vm12  ;;  %vm531_vm12 = vcmp.eq.s32.totalorder %v3642_v43, %v4012_v37  ;;  %v4826_v14 = vpop.permute.xlu1 %1816 }
 0x1c0   : > { %vm1213_vm4 = vmor %vm941_vm1, %vm1085_vm14  ;;  %vm803_vm14 = vcmp.eq.s32.totalorder %v3642_v43, %v4020_v44 }
 0x1c1   : > { %vm1485_vm6 = vmor %vm1213_vm4, %vm1357_vm0  ;;  %vm1075_vm0 = vcmp.eq.s32.totalorder %v3642_v43, %v4030_v45  ;;  %vm388_vm4 = vcmp.eq.s32.totalorder %v3642_v43, %v4048_v63 }
 0x1c2   : > { %v2763_v11 = vsel %vm1485_vm6, 1.0, %v3024_v33  ;;  %vm658_vm8 = vmor %vm386_vm2, %vm530_vm3  ;;  %vm1347_vm2 = vcmp.eq.s32.totalorder %v3642_v43, %v4041_v46 }
 0x1c3   : > { %2045 = vmatpush.msrb.mxu3 %v2763_v11  ;;  %vm930_vm10 = vmor %vm658_vm8, %vm802_vm5  ;;  %vm532_vm5 = vcmp.eq.s32.totalorder %v3642_v43, %v4050_v0 }
 0x1c4   : > { %vm1202_vm13 = vmor %vm930_vm10, %vm1074_vm7  ;;  %vm804_vm7 = vcmp.eq.s32.totalorder %v3642_v43, %v4058_v7 }
 0x1c5   : > { %vm1474_vm15 = vmor %vm1202_vm13, %vm1346_vm9  ;;  %vm1076_vm9 = vcmp.eq.s32.totalorder %v3642_v43, %v4062_v9  ;;  %vm389_vm13 = vcmp.eq.s32.totalorder %v3642_v43, %v4076_v28 }
 0x1c6   : > { %v2752_v34 = vsel %vm1474_vm15, 1.0, %v3024_v33  ;;  %vm659_vm1 = vmor %vm387_vm11, %vm531_vm12  ;;  %vm1348_vm11 = vcmp.eq.s32.totalorder %v3642_v43, %v4070_v21 }
 0x1c7   : > { %1959 = vmatpush.msrb.mxu0 %v2752_v34  ;;  %vm931_vm3 = vmor %vm659_vm1, %vm803_vm14  ;;  %vm533_vm14 = vcmp.eq.s32.totalorder %v3642_v43, %v4078_v29 }
 0x1c8   : > { %vm1203_vm6 = vmor %vm931_vm3, %vm1075_vm0  ;;  %vm805_vm0 = vcmp.eq.s32.totalorder %v3642_v43, %v4082_v30 }
 0x1c9   : > { %vm1475_vm8 = vmor %vm1203_vm6, %vm1347_vm2  ;;  %vm1077_vm2 = vcmp.eq.s32.totalorder %v3642_v43, %v4086_v38  ;;  %vm378_vm6 = vcmp.eq.s32.totalorder %v3689_v53, %v3975_v24 }
 0x1ca   : > { %v2753_v15 = vsel %vm1475_vm8, 1.0, %v3024_v33  ;;  %vm660_vm10 = vmor %vm388_vm4, %vm532_vm5  ;;  %vm1349_vm4 = vcmp.eq.s32.totalorder %v3642_v43, %v4091_v40 }
 0x1cb   : > { %1988 = vmatpush.msrb.mxu1 %v2753_v15  ;;  %vm932_vm12 = vmor %vm660_vm10, %vm804_vm7  ;;  %vm522_vm7 = vcmp.eq.s32.totalorder %v3689_v53, %v3977_v27 }
 0x1cc   : > { %vm1204_vm15 = vmor %vm932_vm12, %vm1076_vm9  ;;  %vm794_vm9 = vcmp.eq.s32.totalorder %v3689_v53, %v3982_v32 }
 0x1cd   : > { %vm1476_vm1 = vmor %vm1204_vm15, %vm1348_vm11  ;;  %vm1066_vm11 = vcmp.eq.s32.totalorder %v3689_v53, %v3990_v48  ;;  %vm379_vm15 = vcmp.eq.s32.totalorder %v3689_v53, %v3992_v49 }
 0x1ce   : > { %v2754_v16 = vsel %vm1476_vm1, 1.0, %v3024_v33  ;;  %vm661_vm3 = vmor %vm389_vm13, %vm533_vm14  ;;  %vm1338_vm13 = vcmp.eq.s32.totalorder %v3689_v53, %v4003_v36 }
 0x1cf   : > { %2017 = vmatpush.msrb.mxu2 %v2754_v16  ;;  %vm933_vm5 = vmor %vm661_vm3, %vm805_vm0  ;;  %vm523_vm0 = vcmp.eq.s32.totalorder %v3689_v53, %v4012_v37 }
 0x1d0   : > { %vm1205_vm8 = vmor %vm933_vm5, %vm1077_vm2  ;;  %vm795_vm2 = vcmp.eq.s32.totalorder %v3689_v53, %v4020_v44 }
 0x1d1   : > { %vm1477_vm10 = vmor %vm1205_vm8, %vm1349_vm4  ;;  %vm1067_vm4 = vcmp.eq.s32.totalorder %v3689_v53, %v4030_v45  ;;  %vm380_vm8 = vcmp.eq.s32.totalorder %v3689_v53, %v4048_v63 }
 0x1d2   : > { %v2755_v43 = vsel %vm1477_vm10, 1.0, %v3024_v33  ;;  %vm650_vm12 = vmor %vm378_vm6, %vm522_vm7  ;;  %vm1339_vm6 = vcmp.eq.s32.totalorder %v3689_v53, %v4041_v46 }
 0x1d3   : > { %2046 = vmatpush.msrb.mxu3 %v2755_v43  ;;  %vm922_vm14 = vmor %vm650_vm12, %vm794_vm9  ;;  %vm524_vm9 = vcmp.eq.s32.totalorder %v3689_v53, %v4050_v0 }
 0x1d4   : > { %vm1194_vm1 = vmor %vm922_vm14, %vm1066_vm11  ;;  %vm796_vm11 = vcmp.eq.s32.totalorder %v3689_v53, %v4058_v7 }
 0x1d5   : > { %vm1466_vm3 = vmor %vm1194_vm1, %vm1338_vm13  ;;  %vm1068_vm13 = vcmp.eq.s32.totalorder %v3689_v53, %v4062_v9  ;;  %vm381_vm1 = vcmp.eq.s32.totalorder %v3689_v53, %v4076_v28 }
 0x1d6   : > { %v2744_v18 = vsel %vm1466_vm3, 1.0, %v3024_v33  ;;  %vm651_vm5 = vmor %vm379_vm15, %vm523_vm0  ;;  %vm1340_vm15 = vcmp.eq.s32.totalorder %v3689_v53, %v4070_v21 }
 0x1d7   : > { %1960 = vmatpush.msrb.mxu0 %v2744_v18  ;;  %vm923_vm7 = vmor %vm651_vm5, %vm795_vm2  ;;  %vm525_vm2 = vcmp.eq.s32.totalorder %v3689_v53, %v4078_v29 }
 0x1d8   : > { %vm1195_vm10 = vmor %vm923_vm7, %vm1067_vm4  ;;  %vm797_vm4 = vcmp.eq.s32.totalorder %v3689_v53, %v4082_v30 }
 0x1d9   : > { %vm1467_vm12 = vmor %vm1195_vm10, %vm1339_vm6  ;;  %vm1069_vm6 = vcmp.eq.s32.totalorder %v3689_v53, %v4086_v38  ;;  %vm370_vm10 = vcmp.eq.s32.totalorder %v3736_v59, %v3975_v24 }
 0x1da   : > { %v2745_v19 = vsel %vm1467_vm12, 1.0, %v3024_v33  ;;  %vm652_vm14 = vmor %vm380_vm8, %vm524_vm9  ;;  %vm1341_vm8 = vcmp.eq.s32.totalorder %v3689_v53, %v4091_v40 }
 0x1db   : > { %1989 = vmatpush.msrb.mxu1 %v2745_v19  ;;  %vm924_vm0 = vmor %vm652_vm14, %vm796_vm11  ;;  %vm514_vm11 = vcmp.eq.s32.totalorder %v3736_v59, %v3977_v27 }
 0x1dc   : > { %vm1196_vm3 = vmor %vm924_vm0, %vm1068_vm13  ;;  %vm786_vm13 = vcmp.eq.s32.totalorder %v3736_v59, %v3982_v32 }
 0x1dd   : > { %vm1468_vm5 = vmor %vm1196_vm3, %vm1340_vm15  ;;  %vm1058_vm15 = vcmp.eq.s32.totalorder %v3736_v59, %v3990_v48  ;;  %vm371_vm3 = vcmp.eq.s32.totalorder %v3736_v59, %v3992_v49 }
 0x1de   : > { %v2746_v23 = vsel %vm1468_vm5, 1.0, %v3024_v33  ;;  %vm653_vm7 = vmor %vm381_vm1, %vm525_vm2  ;;  %vm1330_vm1 = vcmp.eq.s32.totalorder %v3736_v59, %v4003_v36 }
 0x1df   : > { %2018 = vmatpush.msrb.mxu2 %v2746_v23  ;;  %vm925_vm9 = vmor %vm653_vm7, %vm797_vm4  ;;  %vm515_vm4 = vcmp.eq.s32.totalorder %v3736_v59, %v4012_v37 }
 0x1e0   : > { %vm1197_vm12 = vmor %vm925_vm9, %vm1069_vm6  ;;  %vm787_vm6 = vcmp.eq.s32.totalorder %v3736_v59, %v4020_v44 }
 0x1e1   : > { %vm1469_vm14 = vmor %vm1197_vm12, %vm1341_vm8  ;;  %vm1059_vm8 = vcmp.eq.s32.totalorder %v3736_v59, %v4030_v45  ;;  %vm372_vm12 = vcmp.eq.s32.totalorder %v3736_v59, %v4048_v63 }
 0x1e2   : > { %v2747_v31 = vsel %vm1469_vm14, 1.0, %v3024_v33  ;;  %vm642_vm0 = vmor %vm370_vm10, %vm514_vm11  ;;  %vm1331_vm10 = vcmp.eq.s32.totalorder %v3736_v59, %v4041_v46 }
 0x1e3   : > { %2047 = vmatpush.msrb.mxu3 %v2747_v31  ;;  %vm914_vm2 = vmor %vm642_vm0, %vm786_vm13  ;;  %vm516_vm13 = vcmp.eq.s32.totalorder %v3736_v59, %v4050_v0 }
 0x1e4   : > { %vm1186_vm5 = vmor %vm914_vm2, %vm1058_vm15  ;;  %vm788_vm15 = vcmp.eq.s32.totalorder %v3736_v59, %v4058_v7 }
 0x1e5   : > { %vm1458_vm7 = vmor %vm1186_vm5, %vm1330_vm1  ;;  %vm1060_vm1 = vcmp.eq.s32.totalorder %v3736_v59, %v4062_v9  ;;  %vm373_vm5 = vcmp.eq.s32.totalorder %v3736_v59, %v4076_v28 }
 0x1e6   : > { %v2736_v53 = vsel %vm1458_vm7, 1.0, %v3024_v33  ;;  %vm643_vm9 = vmor %vm371_vm3, %vm515_vm4  ;;  %vm1332_vm3 = vcmp.eq.s32.totalorder %v3736_v59, %v4070_v21 }
 0x1e7   : > { %1961 = vmatpush.msrb.mxu0 %v2736_v53  ;;  %vm915_vm11 = vmor %vm643_vm9, %vm787_vm6  ;;  %vm517_vm6 = vcmp.eq.s32.totalorder %v3736_v59, %v4078_v29 }
 0x1e8   : > { %vm1187_vm14 = vmor %vm915_vm11, %vm1059_vm8  ;;  %vm789_vm8 = vcmp.eq.s32.totalorder %v3736_v59, %v4082_v30 }
 0x1e9   : > { %vm1459_vm0 = vmor %vm1187_vm14, %vm1331_vm10  ;;  %vm1061_vm10 = vcmp.eq.s32.totalorder %v3736_v59, %v4086_v38  ;;  %vm362_vm14 = vcmp.eq.s32.totalorder %v3783_v1, %v3975_v24 }
 0x1ea   : > { %v2737_v35 = vsel %vm1459_vm0, 1.0, %v3024_v33  ;;  %vm644_vm2 = vmor %vm372_vm12, %vm516_vm13  ;;  %vm1333_vm12 = vcmp.eq.s32.totalorder %v3736_v59, %v4091_v40 }
 0x1eb   : > { %1990 = vmatpush.msrb.mxu1 %v2737_v35  ;;  %vm916_vm4 = vmor %vm644_vm2, %vm788_vm15  ;;  %vm506_vm15 = vcmp.eq.s32.totalorder %v3783_v1, %v3977_v27 }
 0x1ec   : > { %vm1188_vm7 = vmor %vm916_vm4, %vm1060_vm1  ;;  %vm778_vm1 = vcmp.eq.s32.totalorder %v3783_v1, %v3982_v32 }
 0x1ed   : > { %vm1460_vm9 = vmor %vm1188_vm7, %vm1332_vm3  ;;  %vm1050_vm3 = vcmp.eq.s32.totalorder %v3783_v1, %v3990_v48  ;;  %vm363_vm7 = vcmp.eq.s32.totalorder %v3783_v1, %v3992_v49 }
 0x1ee   : > { %v2738_v52 = vsel %vm1460_vm9, 1.0, %v3024_v33  ;;  %vm645_vm11 = vmor %vm373_vm5, %vm517_vm6  ;;  %vm1322_vm5 = vcmp.eq.s32.totalorder %v3783_v1, %v4003_v36 }
 0x1ef   : > { %2019 = vmatpush.msrb.mxu2 %v2738_v52  ;;  %vm917_vm13 = vmor %vm645_vm11, %vm789_vm8  ;;  %vm507_vm8 = vcmp.eq.s32.totalorder %v3783_v1, %v4012_v37 }
 0x1f0   : > { %vm1189_vm0 = vmor %vm917_vm13, %vm1061_vm10  ;;  %vm779_vm10 = vcmp.eq.s32.totalorder %v3783_v1, %v4020_v44 }
 0x1f1   : > { %vm1461_vm2 = vmor %vm1189_vm0, %vm1333_vm12  ;;  %vm1051_vm12 = vcmp.eq.s32.totalorder %v3783_v1, %v4030_v45  ;;  %vm364_vm0 = vcmp.eq.s32.totalorder %v3783_v1, %v4048_v63 }
 0x1f2   : > { %v2739_v42 = vsel %vm1461_vm2, 1.0, %v3024_v33  ;;  %vm634_vm4 = vmor %vm362_vm14, %vm506_vm15  ;;  %vm1323_vm14 = vcmp.eq.s32.totalorder %v3783_v1, %v4041_v46 }
 0x1f3   : > { %2048 = vmatpush.msrb.mxu3 %v2739_v42  ;;  %vm906_vm6 = vmor %vm634_vm4, %vm778_vm1  ;;  %vm508_vm1 = vcmp.eq.s32.totalorder %v3783_v1, %v4050_v0 }
 0x1f4   : > { %vm1178_vm9 = vmor %vm906_vm6, %vm1050_vm3  ;;  %vm780_vm3 = vcmp.eq.s32.totalorder %v3783_v1, %v4058_v7 }
 0x1f5   : > { %vm1450_vm11 = vmor %vm1178_vm9, %vm1322_vm5  ;;  %vm1052_vm5 = vcmp.eq.s32.totalorder %v3783_v1, %v4062_v9  ;;  %vm365_vm9 = vcmp.eq.s32.totalorder %v3783_v1, %v4076_v28 }
 0x1f6   : > { %v2728_v59 = vsel %vm1450_vm11, 1.0, %v3024_v33  ;;  %vm635_vm13 = vmor %vm363_vm7, %vm507_vm8  ;;  %vm1324_vm7 = vcmp.eq.s32.totalorder %v3783_v1, %v4070_v21 }
 0x1f7   : > { %1962 = vmatpush.msrb.mxu0 %v2728_v59  ;;  %vm907_vm15 = vmor %vm635_vm13, %vm779_vm10  ;;  %vm509_vm10 = vcmp.eq.s32.totalorder %v3783_v1, %v4078_v29 }
 0x1f8   : > { %vm1179_vm2 = vmor %vm907_vm15, %vm1051_vm12  ;;  %vm781_vm12 = vcmp.eq.s32.totalorder %v3783_v1, %v4082_v30 }
 0x1f9   : > { %vm1451_vm4 = vmor %vm1179_vm2, %vm1323_vm14  ;;  %vm1053_vm14 = vcmp.eq.s32.totalorder %v3783_v1, %v4086_v38  ;;  %vm354_vm2 = vcmp.eq.s32.totalorder %v3830_v10, %v3975_v24 }
 0x1fa   : > { %v2729_v50 = vsel %vm1451_vm4, 1.0, %v3024_v33  ;;  %vm636_vm6 = vmor %vm364_vm0, %vm508_vm1  ;;  %vm1325_vm0 = vcmp.eq.s32.totalorder %v3783_v1, %v4091_v40 }
 0x1fb   : > { %1991 = vmatpush.msrb.mxu1 %v2729_v50  ;;  %vm908_vm8 = vmor %vm636_vm6, %vm780_vm3  ;;  %vm498_vm3 = vcmp.eq.s32.totalorder %v3830_v10, %v3977_v27 }
 0x1fc   : > { %vm1180_vm11 = vmor %vm908_vm8, %vm1052_vm5  ;;  %vm770_vm5 = vcmp.eq.s32.totalorder %v3830_v10, %v3982_v32 }
 0x1fd   : > { %vm1452_vm13 = vmor %vm1180_vm11, %vm1324_vm7  ;;  %vm1042_vm7 = vcmp.eq.s32.totalorder %v3830_v10, %v3990_v48  ;;  %vm355_vm11 = vcmp.eq.s32.totalorder %v3830_v10, %v3992_v49 }
 0x1fe   : > { %v2730_v51 = vsel %vm1452_vm13, 1.0, %v3024_v33  ;;  %vm637_vm15 = vmor %vm365_vm9, %vm509_vm10  ;;  %vm1314_vm9 = vcmp.eq.s32.totalorder %v3830_v10, %v4003_v36 }
 0x1ff   : > { %2020 = vmatpush.msrb.mxu2 %v2730_v51  ;;  %vm909_vm1 = vmor %vm637_vm15, %vm781_vm12  ;;  %vm499_vm12 = vcmp.eq.s32.totalorder %v3830_v10, %v4012_v37 }
 0x200   : > { %vm1181_vm4 = vmor %vm909_vm1, %vm1053_vm14  ;;  %vm771_vm14 = vcmp.eq.s32.totalorder %v3830_v10, %v4020_v44 }
 0x201   : > { %vm1453_vm6 = vmor %vm1181_vm4, %vm1325_vm0  ;;  %vm1043_vm0 = vcmp.eq.s32.totalorder %v3830_v10, %v4030_v45  ;;  %vm356_vm4 = vcmp.eq.s32.totalorder %v3830_v10, %v4048_v63 }
 0x202   : > { %v2731_v57 = vsel %vm1453_vm6, 1.0, %v3024_v33  ;;  %vm626_vm8 = vmor %vm354_vm2, %vm498_vm3  ;;  %vm1315_vm2 = vcmp.eq.s32.totalorder %v3830_v10, %v4041_v46 }
 0x203   : > { %2049 = vmatpush.msrb.mxu3 %v2731_v57  ;;  %vm898_vm10 = vmor %vm626_vm8, %vm770_vm5  ;;  %vm500_vm5 = vcmp.eq.s32.totalorder %v3830_v10, %v4050_v0 }
 0x204   : > { %vm1170_vm13 = vmor %vm898_vm10, %vm1042_vm7  ;;  %vm772_vm7 = vcmp.eq.s32.totalorder %v3830_v10, %v4058_v7 }
 0x205   : > { %vm1442_vm15 = vmor %vm1170_vm13, %vm1314_vm9  ;;  %vm1044_vm9 = vcmp.eq.s32.totalorder %v3830_v10, %v4062_v9  ;;  %vm357_vm13 = vcmp.eq.s32.totalorder %v3830_v10, %v4076_v28 }
 0x206   : > { %v2720_v1 = vsel %vm1442_vm15, 1.0, %v3024_v33  ;;  %vm627_vm1 = vmor %vm355_vm11, %vm499_vm12  ;;  %vm1316_vm11 = vcmp.eq.s32.totalorder %v3830_v10, %v4070_v21 }
 0x207   : > { %1963 = vmatpush.msrb.mxu0 %v2720_v1  ;;  %vm899_vm3 = vmor %vm627_vm1, %vm771_vm14  ;;  %vm501_vm14 = vcmp.eq.s32.totalorder %v3830_v10, %v4078_v29 }
 0x208   : > { %vm1171_vm6 = vmor %vm899_vm3, %vm1043_vm0  ;;  %vm773_vm0 = vcmp.eq.s32.totalorder %v3830_v10, %v4082_v30 }
 0x209   : > { %vm1443_vm8 = vmor %vm1171_vm6, %vm1315_vm2  ;;  %vm1045_vm2 = vcmp.eq.s32.totalorder %v3830_v10, %v4086_v38  ;;  %vm346_vm6 = vcmp.eq.s32.totalorder %v3877_v26, %v3975_v24 }
 0x20a   : > { %v2721_v54 = vsel %vm1443_vm8, 1.0, %v3024_v33  ;;  %vm628_vm10 = vmor %vm356_vm4, %vm500_vm5  ;;  %vm1317_vm4 = vcmp.eq.s32.totalorder %v3830_v10, %v4091_v40 }
 0x20b   : > { %1992 = vmatpush.msrb.mxu1 %v2721_v54  ;;  %vm900_vm12 = vmor %vm628_vm10, %vm772_vm7  ;;  %vm490_vm7 = vcmp.eq.s32.totalorder %v3877_v26, %v3977_v27 }
 0x20c   : > { %vm1172_vm15 = vmor %vm900_vm12, %vm1044_vm9  ;;  %vm762_vm9 = vcmp.eq.s32.totalorder %v3877_v26, %v3982_v32 }
 0x20d   : > { %vm1444_vm1 = vmor %vm1172_vm15, %vm1316_vm11  ;;  %vm1034_vm11 = vcmp.eq.s32.totalorder %v3877_v26, %v3990_v48  ;;  %vm347_vm15 = vcmp.eq.s32.totalorder %v3877_v26, %v3992_v49 }
 0x20e   : > { %v2722_v41 = vsel %vm1444_vm1, 1.0, %v3024_v33  ;;  %vm629_vm3 = vmor %vm357_vm13, %vm501_vm14  ;;  %vm1306_vm13 = vcmp.eq.s32.totalorder %v3877_v26, %v4003_v36 }
 0x20f   : > { %2021 = vmatpush.msrb.mxu2 %v2722_v41  ;;  %vm901_vm5 = vmor %vm629_vm3, %vm773_vm0  ;;  %vm491_vm0 = vcmp.eq.s32.totalorder %v3877_v26, %v4012_v37 }
 0x210   : > { %vm1173_vm8 = vmor %vm901_vm5, %vm1045_vm2  ;;  %vm763_vm2 = vcmp.eq.s32.totalorder %v3877_v26, %v4020_v44 }
 0x211   : > { %vm1445_vm10 = vmor %vm1173_vm8, %vm1317_vm4  ;;  %vm1035_vm4 = vcmp.eq.s32.totalorder %v3877_v26, %v4030_v45  ;;  %vm348_vm8 = vcmp.eq.s32.totalorder %v3877_v26, %v4048_v63 }
 0x212   : > { %v2723_v10 = vsel %vm1445_vm10, 1.0, %v3024_v33  ;;  %vm618_vm12 = vmor %vm346_vm6, %vm490_vm7  ;;  %vm1307_vm6 = vcmp.eq.s32.totalorder %v3877_v26, %v4041_v46 }
 0x213   : > { %2050 = vmatpush.msrb.mxu3 %v2723_v10  ;;  %vm890_vm14 = vmor %vm618_vm12, %vm762_vm9  ;;  %vm492_vm9 = vcmp.eq.s32.totalorder %v3877_v26, %v4050_v0 }
 0x214   : > { %vm1162_vm1 = vmor %vm890_vm14, %vm1034_vm11  ;;  %vm764_vm11 = vcmp.eq.s32.totalorder %v3877_v26, %v4058_v7 }
 0x215   : > { %vm1434_vm3 = vmor %vm1162_vm1, %vm1306_vm13  ;;  %vm1036_vm13 = vcmp.eq.s32.totalorder %v3877_v26, %v4062_v9  ;;  %vm349_vm1 = vcmp.eq.s32.totalorder %v3877_v26, %v4076_v28 }
 0x216   : > { %v2712_v62 = vsel %vm1434_vm3, 1.0, %v3024_v33  ;;  %vm619_vm5 = vmor %vm347_vm15, %vm491_vm0  ;;  %vm1308_vm15 = vcmp.eq.s32.totalorder %v3877_v26, %v4070_v21 }
 0x217   : > { %1964 = vmatpush.msrb.mxu0 %v2712_v62  ;;  %vm891_vm7 = vmor %vm619_vm5, %vm763_vm2  ;;  %vm493_vm2 = vcmp.eq.s32.totalorder %v3877_v26, %v4078_v29  ;;  %v4845_v62 = vld [vmem:[%s5046_s3] sm:$0xff] }
 0x218   : > { %vm1163_vm10 = vmor %vm891_vm7, %vm1035_vm4  ;;  %vm765_vm4 = vcmp.eq.s32.totalorder %v3877_v26, %v4082_v30 }
 0x219   : > { %vm1435_vm12 = vmor %vm1163_vm10, %vm1307_vm6  ;;  %vm1037_vm6 = vcmp.eq.s32.totalorder %v3877_v26, %v4086_v38  ;;  %vm338_vm10 = vcmp.eq.s32.totalorder %v3165_v2, %v3975_v24  ;;  %v2924_v24 = vld [vmem:[%s5044_s1] sm:$0xff] }
 0x21a   : > { %v2713_v58 = vsel %vm1435_vm12, 1.0, %v3024_v33  ;;  %vm620_vm14 = vmor %vm348_vm8, %vm492_vm9  ;;  %vm1309_vm8 = vcmp.eq.s32.totalorder %v3877_v26, %v4091_v40 }
 0x21b   : > { %1993 = vmatpush.msrb.mxu1 %v2713_v58  ;;  %vm892_vm0 = vmor %vm620_vm14, %vm764_vm11  ;;  %vm482_vm11 = vcmp.eq.s32.totalorder %v3165_v2, %v3977_v27  ;;  %v4871_v58 = vld [vmem:[%s5046_s3 + $0x10] sm:$0xff] }
 0x21c   : > { %vm1164_vm3 = vmor %vm892_vm0, %vm1036_vm13  ;;  %vm754_vm13 = vcmp.eq.s32.totalorder %v3165_v2, %v3982_v32 }
 0x21d   : > { %vm1436_vm5 = vmor %vm1164_vm3, %vm1308_vm15  ;;  %vm1026_vm15 = vcmp.eq.s32.totalorder %v3165_v2, %v3990_v48  ;;  %vm339_vm3 = vcmp.eq.s32.totalorder %v3165_v2, %v3992_v49  ;;  %v2925_v48 = vld [vmem:[%s5044_s1 + $0x8] sm:$0xff] }
 0x21e   : > { %v2714_v61 = vsel %vm1436_vm5, 1.0, %v3024_v33  ;;  %vm621_vm7 = vmor %vm349_vm1, %vm493_vm2  ;;  %vm1298_vm1 = vcmp.eq.s32.totalorder %v3165_v2, %v4003_v36  ;;  %v1880_v36 = vpop.f32.mrf.mxu1 }
 0x21f   : > { %2022 = vmatpush.msrb.mxu2 %v2714_v61  ;;  %vm893_vm9 = vmor %vm621_vm7, %vm765_vm4  ;;  %vm483_vm4 = vcmp.eq.s32.totalorder %v3165_v2, %v4012_v37  ;;  %v1938_v37 = vpop.f32.mrf.mxu3  ;;  %v1881_v59 = vadd.f32 %v1880_v36, %v4826_v14 }
 0x220   : > { %vm1165_vm12 = vmor %vm893_vm9, %vm1037_vm6  ;;  %vm755_vm6 = vcmp.eq.s32.totalorder %v3165_v2, %v4020_v44  ;;  %v1939_v23 = vadd.f32 %v1938_v37, %v4826_v14 }
 0x221   : > { %vm1437_vm14 = vmor %vm1165_vm12, %vm1309_vm8  ;;  %vm1027_vm8 = vcmp.eq.s32.totalorder %v3165_v2, %v4030_v45  ;;  %vm340_vm12 = vcmp.eq.s32.totalorder %v3165_v2, %v4048_v63  ;;  %v2067_v41 = vmax.f32 %v1881_v59, 0.0 }
 0x222   : > { %v2715_v4 = vsel %vm1437_vm14, 1.0, %v3024_v33  ;;  %vm610_vm0 = vmor %vm338_vm10, %vm482_vm11  ;;  %vm1299_vm10 = vcmp.eq.s32.totalorder %v3165_v2, %v4041_v46  ;;  %v2069_v10 = vmax.f32 %v1939_v23, 0.0 }
 0x223   : > { %2051 = vmatpush.msrb.mxu3 %v2715_v4  ;;  %vm882_vm2 = vmor %vm610_vm0, %vm754_vm13  ;;  %vm484_vm13 = vcmp.eq.s32.totalorder %v3165_v2, %v4050_v0  ;;  %v4884_v4 = vld [vmem:[%s5046_s3 + $0x18] sm:$0xff] }
 0x224   : > { %vm1154_vm5 = vmor %vm882_vm2, %vm1026_vm15  ;;  %vm756_vm15 = vcmp.eq.s32.totalorder %v3165_v2, %v4058_v7 }
 0x225   : > { %vm1426_vm7 = vmor %vm1154_vm5, %vm1298_vm1  ;;  %vm1028_vm1 = vcmp.eq.s32.totalorder %v3165_v2, %v4062_v9  ;;  %vm341_vm5 = vcmp.eq.s32.totalorder %v3165_v2, %v4076_v28 }
 0x226   : > { %v2704_v26 = vsel %vm1426_vm7, 1.0, %v3024_v33  ;;  %vm611_vm9 = vmor %vm339_vm3, %vm483_vm4  ;;  %vm1300_vm3 = vcmp.eq.s32.totalorder %v3165_v2, %v4070_v21  ;;  %v1883_v45 = vpop.f32.mrf.mxu1  ;;  %v4818_v21 = vpop.permute.xlu0 %1831 }
 0x227   : > { %1965 = vmatpush.msrb.mxu0 %v2704_v26  ;;  %vm883_vm11 = vmor %vm611_vm9, %vm755_vm6  ;;  %vm485_vm6 = vcmp.eq.s32.totalorder %v3165_v2, %v4078_v29  ;;  %v1941_v63 = vpop.f32.mrf.mxu3  ;;  %v1884_v11 = vadd.f32 %v1883_v45, %v4824_v25 }
 0x228   : > { %vm1155_vm14 = vmor %vm883_vm11, %vm1027_vm8  ;;  %1966 = vmatmul.f32.vlgmr.msrb.gmra.mxu0 %v2924_v24  ;;  %vm757_vm8 = vcmp.eq.s32.totalorder %v3165_v2, %v4082_v30  ;;  %v1942_v18 = vadd.f32 %v1941_v63, %v4824_v25 }
 0x229   : > { %vm1427_vm0 = vmor %vm1155_vm14, %vm1299_vm10  ;;  %vm1029_vm10 = vcmp.eq.s32.totalorder %v3165_v2, %v4086_v38  ;;  %v2075_v51 = vmax.f32 %v1884_v11, 0.0 }
 0x22a   : > { %v2705_v27 = vsel %vm1427_vm0, 1.0, %v3024_v33  ;;  %vm612_vm2 = vmor %vm340_vm12, %vm484_vm13  ;;  %vm1301_vm12 = vcmp.eq.s32.totalorder %v3165_v2, %v4091_v40  ;;  %v1851_v2 = vpop.f32.mrf.mxu0  ;;  %v2077_v1 = vmax.f32 %v1942_v18, 0.0  ;;  %vm2126_vm0 = vcmask 261120  }
 0x22b   : > { %1994 = vmatpush.msrb.mxu1 %v2705_v27  ;;  %vm884_vm4 = vmor %vm612_vm2, %vm756_vm15  ;;  %v1852_v42 = vadd.f32 %v1851_v2, %v4826_v14  ;;  %vm2589_vm2 = vcmask 1040384  }
 0x22c   : > { %vm1156_vm7 = vmor %vm884_vm4, %vm1028_vm1  ;;  %1995 = vmatmul.f32.vlgmr.msrb.gmra.mxu1 %v2924_v24  ;;  %vm2591_vm1 = vcmask 1042434   ;;  %vm2595_vm4 = vcmask 1044484  }
 0x22d   : > { %vm1428_vm9 = vmor %vm1156_vm7, %vm1300_vm3  ;;  %v2066_v54 = vmax.f32 %v1852_v42, 0.0  ;;  %vm2593_vm3 = vcmask 1041408   ;;  %vm2601_vm7 = vcmask 1043456  }
 0x22e   : > { %v2706_v32 = vsel %vm1428_vm9, 1.0, %v3024_v33  ;;  %vm613_vm11 = vmor %vm341_vm5, %vm485_vm6  ;;  %v1886_v7 = vpop.f32.mrf.mxu1  ;;  %v4830_v34 = vpop.permute.xlu0 %1826  ;;  %vm2597_vm5 = vcmask 1046534   ;;  %vm2599_vm6 = vcmask 1045508  }
 0x22f   : > { %2023 = vmatpush.msrb.mxu2 %v2706_v32  ;;  %vm885_vm13 = vmor %vm613_vm11, %vm757_vm8  ;;  %v1944_v28 = vpop.f32.mrf.mxu3  ;;  %v1887_v43 = vadd.f32 %v1886_v7, %v4830_v34 }
 0x230   : > { %vm1157_vm14 = vmor %vm885_vm13, %vm1029_vm10  ;;  %2024 = vmatmul.f32.vlgmr.msrb.gmra.mxu2 %v2924_v24  ;;  %1969 = vmatmul.f32.gmra.mxu0 %v2925_v48  ;;  %v1945_v16 = vadd.f32 %v1944_v28, %v4830_v34 }
 0x231   : > { %vm1429_vm15 = vmor %vm1157_vm14, %vm1301_vm12  ;;  %v2083_v53 = vmax.f32 %v1887_v43, 0.0 }
 0x232   : > { %v2707_v49 = vsel %vm1429_vm15, 1.0, %v3024_v33  ;;  %v1909_v33 = vpop.f32.mrf.mxu2  ;;  %v1854_v44 = vpop.f32.mrf.mxu0  ;;  %v2085_v52 = vmax.f32 %v1945_v16, 0.0 }
 0x233   : > { %2052 = vmatpush.msrb.mxu3 %v2707_v49  ;;  %v1855_v3 = vadd.f32 %v1854_v44, %v4824_v25  ;;  %v1910_v19 = vadd.f32 %v1909_v33, %v4826_v14 }
 0x234   : > { %2053 = vmatmul.f32.vlgmr.msrb.gmra.mxu3 %v2924_v24  ;;  %1998 = vmatmul.f32.gmra.mxu1 %v2925_v48 }
 0x235   : > { %v2074_v50 = vmax.f32 %v1855_v3, 0.0  ;;  %v2068_v55 = vmax.f32 %v1910_v19, 0.0  ;;  %v2104_v3 = vld [vmem:[%s5047_s4 + $0x10] sm:$0xff] }
 0x236   : > { %v1889_v38 = vpop.f32.mrf.mxu1 }
 0x237   : > { %v1890_v40 = vadd.f32 %v1889_v38, %v4818_v21  ;;  %v1947_v22 = vpop.f32.mrf.mxu3 }
 0x238   : > { %2027 = vmatmul.f32.gmra.mxu2 %v2925_v48  ;;  %1972 = vmatmul.f32.gmra.mxu0 %v4348_v5  ;;  %v1948_v39 = vadd.f32 %v1947_v22, %v4818_v21 }
 0x239   : > { %v2091_v8 = vmax.f32 %v1890_v40, 0.0 }
 0x23a   : > { %v1912_v46 = vpop.f32.mrf.mxu2  ;;  %v1857_v0 = vpop.f32.mrf.mxu0  ;;  %v2093_v6 = vmax.f32 %v1948_v39, 0.0 }
 0x23b   : > { %2180 = vmatpush.msra.mxu1 %v2091_v8  ;;  %v1858_v47 = vadd.f32 %v1857_v0, %v4830_v34 }
 0x23c   : > { %2056 = vmatmul.f32.gmra.mxu3 %v2925_v48  ;;  %2001 = vmatmul.f32.gmra.mxu1 %v4348_v5 }
 0x23d   : > { %2238 = vmatpush.msra.mxu3 %v2093_v6  ;;  %v2082_v31 = vmax.f32 %v1858_v47, 0.0  ;;  %2181 = vmatpush.msra.mxu1 %v2083_v53 }
 0x23f   : > { %2239 = vmatpush.msra.mxu3 %v2085_v52  ;;  %2182 = vmatpush.msra.mxu1 %v2075_v51  ;;  %v2404_v52 = vld [vmem:[#allocation2] sm:$0x1] }
 0x240   : > { %2030 = vmatmul.f32.gmra.mxu2 %v4348_v5  ;;  %1975 = vmatmul.f32.gmra.mxu0 %v4539_v17 }
 0x241   : > { %2240 = vmatpush.msra.mxu3 %v2077_v1  ;;  %2183 = vmatpush.msra.mxu1 %v2067_v41 }
 0x242   : > { %v1915_v9 = vpop.f32.mrf.mxu2  ;;  %v1860_v29 = vpop.f32.mrf.mxu0 }
 0x243   : > { %v1861_v30 = vadd.f32 %v1860_v29, %v4818_v21  ;;  %v1916_v15 = vadd.f32 %v1915_v9, %v4830_v34  ;;  %2241 = vmatpush.msra.mxu3 %v2069_v10 }
 0x244   : > { %2059 = vmatmul.f32.gmra.mxu3 %v4348_v5  ;;  %2004 = vmatmul.f32.gmra.mxu1 %v4539_v17 }
 0x245   : > { %v2090_v5 = vmax.f32 %v1861_v30, 0.0  ;;  %v2084_v35 = vmax.f32 %v1916_v15, 0.0  ;;  %v2105_v30 = vld [vmem:[%s5047_s4 + $0x18] sm:$0xff] }
 0x246   : > { %2123 = vperm.xlu2 %2923, %v2105_v30  }
 0x247   : > { %2151 = vmatpush.msra.mxu0 %v2090_v5 }
 0x248   : > { %2033 = vmatmul.f32.gmra.mxu2 %v4539_v17 }
 0x249   : > { %2152 = vmatpush.msra.mxu0 %v2082_v31 }
 0x24a   : > { %v1918_v13 = vpop.f32.mrf.mxu2 }
 0x24b   : > { %v1919_v20 = vadd.f32 %v1918_v13, %v4818_v21  ;;  %2153 = vmatpush.msra.mxu0 %v2074_v50 }
 0x24c   : > { %2062 = vmatmul.f32.gmra.mxu3 %v4539_v17  ;;  %v1913_v17 = vadd.f32 %v1912_v46, %v4824_v25  ;;  %2832 = vmatmul.msk.f32.vlgmr.msra.gmra.mxu1 %vm2126_vm0, %v4845_v62 }
 0x24d   : > { %v2092_v12 = vmax.f32 %v1919_v20, 0.0  ;;  %2154 = vmatpush.msra.mxu0 %v2066_v54 }
 0x24e   : > { %v2076_v57 = vmax.f32 %v1913_v17, 0.0  ;;  %2828 = vmatmul.msk.f32.vlgmr.msra.gmra.mxu0 %vm2126_vm0, %v4845_v62  ;;  %2118 = vperm.xlu2 %2923, %v2104_v3  }
 0x24f   : > { %2209 = vmatpush.msra.mxu2 %v2092_v12 }
 0x251   : > { %2210 = vmatpush.msra.mxu2 %v2084_v35 }
 0x253   : > { %2211 = vmatpush.msra.mxu2 %v2076_v57 }
 0x254   : > { %2840 = vmatmul.msk.f32.vlgmr.msra.gmra.mxu3 %vm2126_vm0, %v4845_v62  ;;  %2833 = vmatmul.msk.f32.gmra.mxu1 %vm2126_vm0, %v4858_v56 }
 0x255   : > { %2212 = vmatpush.msra.mxu2 %v2068_v55 }
 0x256   : > { %2836 = vmatmul.msk.f32.vlgmr.msra.gmra.mxu2 %vm2126_vm0, %v4845_v62  ;;  %2829 = vmatmul.msk.f32.gmra.mxu0 %vm2126_vm0, %v4858_v56 }
 0x257   : > { %2407 = vperm.xlu2 %2923, %v2404_v52  }
 0x25c   : > { %2841 = vmatmul.msk.f32.gmra.mxu3 %vm2126_vm0, %v4858_v56  ;;  %2834 = vmatmul.msk.f32.gmra.mxu1 %vm2126_vm0, %v4871_v58 }
 0x25e   : > { %2837 = vmatmul.msk.f32.gmra.mxu2 %vm2126_vm0, %v4858_v56  ;;  %2830 = vmatmul.msk.f32.gmra.mxu0 %vm2126_vm0, %v4871_v58 }
 0x264   : > { %2842 = vmatmul.msk.f32.gmra.mxu3 %vm2126_vm0, %v4871_v58  ;;  %2835 = vmatmul.msk.f32.gmra.mxu1 %vm2126_vm0, %v4884_v4 }
 0x266   : > { %2838 = vmatmul.msk.f32.gmra.mxu2 %vm2126_vm0, %v4871_v58  ;;  %2831 = vmatmul.msk.f32.gmra.mxu0 %vm2126_vm0, %v4884_v4 }
 0x26c   : > { %2843 = vmatmul.msk.f32.gmra.mxu3 %vm2126_vm0, %v4884_v4 }
 0x26e   : > { %2839 = vmatmul.msk.f32.gmra.mxu2 %vm2126_vm0, %v4884_v4 }
 0x2a0   : > { %v4948_v41 = vpop.permute.xlu2 %2123 }
 0x2a5   : > { %v1967_v60 = vpop.f32.mrf.mxu0 }
 0x2a6   : > { %v1968_v0 = vadd.f32 %v1967_v60, %v4826_v14 }
 0x2a8   : > { %v2070_v8 = vmax.f32 %v1968_v0, 0.0  ;;  %v4950_v60 = vpop.permute.xlu2 %2118 }
 0x2a9   : > { %v1996_v61 = vpop.f32.mrf.mxu1 }
 0x2aa   : > { %v1997_v13 = vadd.f32 %v1996_v61, %v4826_v14 }
 0x2ac   : > { %v2071_v39 = vmax.f32 %v1997_v13, 0.0 }
 0x2ad   : > { %v1970_v26 = vpop.f32.mrf.mxu0 }
 0x2ae   : > { %v1971_v45 = vadd.f32 %v1970_v26, %v4824_v25 }
 0x2b0   : > { %v2078_v38 = vmax.f32 %v1971_v45, 0.0 }
 0x2b1   : > { %v1999_v24 = vpop.f32.mrf.mxu1 }
 0x2b2   : > { %v2000_v40 = vadd.f32 %v1999_v24, %v4824_v25 }
 0x2b3   : > { %v2025_v27 = vpop.f32.mrf.mxu2 }
 0x2b4   : > { %v2079_v22 = vmax.f32 %v2000_v40, 0.0  ;;  %v2026_v17 = vadd.f32 %v2025_v27, %v4826_v14 }
 0x2b5   : > { %v1973_v32 = vpop.f32.mrf.mxu0 }
 0x2b6   : > { %v1974_v33 = vadd.f32 %v1973_v32, %v4830_v34  ;;  %v2072_v42 = vmax.f32 %v2026_v17, 0.0  ;;  %v4954_v32 = vpop.permute.xlu0 %2113 }
 0x2b7   : > { %v2054_v48 = vpop.f32.mrf.mxu3 }
 0x2b8   : > { %v2086_v7 = vmax.f32 %v1974_v33, 0.0  ;;  %v2055_v59 = vadd.f32 %v2054_v48, %v4826_v14 }
 0x2b9   : > { %v2002_v49 = vpop.f32.mrf.mxu1 }
 0x2ba   : > { %v2003_v9 = vadd.f32 %v2002_v49, %v4830_v34 }
 0x2bb   : > { %v2028_v2 = vpop.f32.mrf.mxu2 }
 0x2bc   : > { %v2087_v20 = vmax.f32 %v2003_v9, 0.0  ;;  %v2029_v16 = vadd.f32 %v2028_v2, %v4824_v25 }
 0x2bd   : > { %v1976_v36 = vpop.f32.mrf.mxu0 }
 0x2be   : > { %v1977_v37 = vadd.f32 %v1976_v36, %v4818_v21  ;;  %v2080_v31 = vmax.f32 %v2029_v16, 0.0 }
 0x2bf   : > { %v2057_v44 = vpop.f32.mrf.mxu3 }
 0x2c0   : > { %v2094_v46 = vmax.f32 %v1977_v37, 0.0  ;;  %v2058_v53 = vadd.f32 %v2057_v44, %v4824_v25  ;;  %v2073_v25 = vmax.f32 %v2055_v59, 0.0 }
 0x2c1   : > { %v2005_v63 = vpop.f32.mrf.mxu1 }
 0x2c2   : > { %v2006_v28 = vadd.f32 %v2005_v63, %v4818_v21  ;;  %2267 = vmatpush.msrb.mxu0 %v2094_v46  ;;  %v4960_v46 = vpop.permute.xlu1 %2108 }
 0x2c3   : > { %v2031_v29 = vpop.f32.mrf.mxu2 }
 0x2c4   : > { %v2095_v5 = vmax.f32 %v2006_v28, 0.0  ;;  %2268 = vmatpush.msrb.mxu0 %v2086_v7  ;;  %v2032_v11 = vadd.f32 %v2031_v29, %v4830_v34 }
 0x2c6   : > { %2296 = vmatpush.msrb.mxu1 %v2095_v5  ;;  %2269 = vmatpush.msrb.mxu0 %v2078_v38  ;;  %v2088_v18 = vmax.f32 %v2032_v11, 0.0 }
 0x2c7   : > { %v2060_v12 = vpop.f32.mrf.mxu3 }
 0x2c8   : > { %2297 = vmatpush.msrb.mxu1 %v2087_v20  ;;  %2270 = vmatpush.msrb.mxu0 %v2070_v8  ;;  %v2061_v19 = vadd.f32 %v2060_v12, %v4830_v34  ;;  %v4971_v20 = vld [vmem:[%s5048_s5] sm:$0x1] }
 0x2c9   : > { %2844 = vmatmul.msk.f32.vlgmr.msrb.gmra.mxu0 %vm2126_vm0, %v4845_v62  ;;  %v2185_v34 = vpop.f32.mrf.mxu1 }
 0x2ca   : > { %2298 = vmatpush.msrb.mxu1 %v2079_v22  ;;  %v2089_v50 = vmax.f32 %v2061_v19, 0.0  ;;  %v2186_v0 = vadd.f32 %v2185_v34, %v4960_v46 }
 0x2cb   : > { %v2034_v6 = vpop.f32.mrf.mxu2  ;;  %v2156_v14 = vpop.f32.mrf.mxu0 }
 0x2cc   : > { %v2035_v15 = vadd.f32 %v2034_v6, %v4818_v21  ;;  %2299 = vmatpush.msrb.mxu1 %v2071_v39  ;;  %v2157_v63 = vadd.f32 %v2156_v14, %v4960_v46  ;;  %v2372_v5 = vmax.f32 %v2186_v0, 0.0 }
 0x2cd   : > { %2848 = vmatmul.msk.f32.vlgmr.msrb.gmra.mxu1 %vm2126_vm0, %v4845_v62 }
 0x2ce   : > { %v2096_v47 = vmax.f32 %v2035_v15, 0.0  ;;  %v2371_v40 = vmax.f32 %v2157_v63, 0.0 }
 0x2cf   : > { %v2063_v43 = vpop.f32.mrf.mxu3 }
 0x2d0   : > { %v2064_v23 = vadd.f32 %v2063_v43, %v4818_v21  ;;  %2325 = vmatpush.msrb.mxu2 %v2096_v47  ;;  %v2081_v21 = vmax.f32 %v2058_v53, 0.0 }
 0x2d1   : > { %2845 = vmatmul.msk.f32.gmra.mxu0 %vm2126_vm0, %v4858_v56  ;;  %v2188_v54 = vpop.f32.mrf.mxu1 }
 0x2d2   : > { %v2097_v35 = vmax.f32 %v2064_v23, 0.0  ;;  %2326 = vmatpush.msrb.mxu2 %v2088_v18  ;;  %v2189_v36 = vadd.f32 %v2188_v54, %v4954_v32 }
 0x2d3   : > { %v2159_v1 = vpop.f32.mrf.mxu0 }
 0x2d4   : > { %2354 = vmatpush.msrb.mxu3 %v2097_v35  ;;  %2327 = vmatpush.msrb.mxu2 %v2080_v31  ;;  %v2160_v2 = vadd.f32 %v2159_v1, %v4954_v32  ;;  %v2380_v9 = vmax.f32 %v2189_v36, 0.0 }
 0x2d5   : > { %2849 = vmatmul.msk.f32.gmra.mxu1 %vm2126_vm0, %v4858_v56 }
 0x2d6   : > { %2355 = vmatpush.msrb.mxu3 %v2089_v50  ;;  %2328 = vmatpush.msrb.mxu2 %v2072_v42  ;;  %v2379_v7 = vmax.f32 %v2160_v2, 0.0 }
 0x2d7   : > { %2852 = vmatmul.msk.f32.vlgmr.msrb.gmra.mxu2 %vm2126_vm0, %v4845_v62  ;;  %v2243_v57 = vpop.f32.mrf.mxu3 }
 0x2d8   : > { %2356 = vmatpush.msrb.mxu3 %v2081_v21  ;;  %v2244_v11 = vadd.f32 %v2243_v57, %v4960_v46 }
 0x2d9   : > { %2846 = vmatmul.msk.f32.gmra.mxu0 %vm2126_vm0, %v4871_v58  ;;  %v2214_v51 = vpop.f32.mrf.mxu2 }
 0x2da   : > { %2357 = vmatpush.msrb.mxu3 %v2073_v25  ;;  %v2215_v3 = vadd.f32 %v2214_v51, %v4960_v46  ;;  %v2374_v18 = vmax.f32 %v2244_v11, 0.0 }
 0x2db   : > { %2856 = vmatmul.msk.f32.vlgmr.msrb.gmra.mxu3 %vm2126_vm0, %v4845_v62  ;;  %v2162_v62 = vpop.f32.mrf.mxu0 }
 0x2dc   : > { %v2163_v26 = vadd.f32 %v2162_v62, %v4950_v60  ;;  %v2373_v17 = vmax.f32 %v2215_v3, 0.0 }
 0x2dd   : > { %2850 = vmatmul.msk.f32.gmra.mxu1 %vm2126_vm0, %v4871_v58 }
 0x2de   : > { %v2387_v44 = vmax.f32 %v2163_v26, 0.0 }
 0x2df   : > { %2853 = vmatmul.msk.f32.gmra.mxu2 %vm2126_vm0, %v4858_v56  ;;  %v2246_v10 = vpop.f32.mrf.mxu3 }
 0x2e0   : > { %v2247_v6 = vadd.f32 %v2246_v10, %v4954_v32 }
 0x2e1   : > { %2847 = vmatmul.msk.f32.gmra.mxu0 %vm2126_vm0, %v4884_v4  ;;  %v2217_v55 = vpop.f32.mrf.mxu2 }
 0x2e2   : > { %v2218_v39 = vadd.f32 %v2217_v55, %v4954_v32  ;;  %v2382_v43 = vmax.f32 %v2247_v6, 0.0 }
 0x2e3   : > { %2857 = vmatmul.msk.f32.gmra.mxu3 %vm2126_vm0, %v4858_v56  ;;  %v2191_v56 = vpop.f32.mrf.mxu1  ;;  %v2165_v24 = vpop.f32.mrf.mxu0 }
 0x2e4   : > { %v2166_v48 = vadd.f32 %v2165_v24, %v4948_v41  ;;  %v2381_v47 = vmax.f32 %v2218_v39, 0.0 }
 0x2e5   : > { %2851 = vmatmul.msk.f32.gmra.mxu1 %vm2126_vm0, %v4884_v4 }
 0x2e6   : > { %v2395_v33 = vmax.f32 %v2166_v48, 0.0 }
 0x2e7   : > { %2854 = vmatmul.msk.f32.gmra.mxu2 %vm2126_vm0, %v4871_v58  ;;  %v2249_v61 = vpop.f32.mrf.mxu3 }
 0x2e8   : > { %2426 = vmatpush.msra.mxu0 %v2395_v33  ;;  %v2250_v13 = vadd.f32 %v2249_v61, %v4950_v60 }
 0x2ea   : > { %2427 = vmatpush.msra.mxu0 %v2387_v44  ;;  %v2390_v16 = vmax.f32 %v2250_v13, 0.0 }
 0x2eb   : > { %2858 = vmatmul.msk.f32.gmra.mxu3 %vm2126_vm0, %v4871_v58  ;;  %v2220_v58 = vpop.f32.mrf.mxu2  ;;  %v2194_v27 = vpop.f32.mrf.mxu1 }
 0x2ec   : > { %v2195_v49 = vadd.f32 %v2194_v27, %v4948_v41  ;;  %v2221_v8 = vadd.f32 %v2220_v58, %v4950_v60  ;;  %2428 = vmatpush.msra.mxu0 %v2379_v7 }
 0x2ee   : > { %v2396_v37 = vmax.f32 %v2195_v49, 0.0  ;;  %2429 = vmatpush.msra.mxu0 %v2371_v40  ;;  %v2389_v15 = vmax.f32 %v2221_v8, 0.0 }
 0x2ef   : > { %2855 = vmatmul.msk.f32.gmra.mxu2 %vm2126_vm0, %v4884_v4  ;;  %v2252_v29 = vpop.f32.mrf.mxu3  ;;  %2860 = vmatmul.msk.f32.vlgmr.msra.gmra.mxu0 %vm2126_vm0, %v4971_v20 }
 0x2f0   : > { %2446 = vmatpush.msra.mxu1 %v2396_v37  ;;  %v2253_v38 = vadd.f32 %v2252_v29, %v4948_v41 }
 0x2f2   : > { %v2398_v22 = vmax.f32 %v2253_v38, 0.0 }
 0x2f3   : > { %2859 = vmatmul.msk.f32.gmra.mxu3 %vm2126_vm0, %v4884_v4  ;;  %v2192_v4 = vadd.f32 %v2191_v56, %v4950_v60  ;;  %v2223_v28 = vpop.f32.mrf.mxu2 }
 0x2f4   : > { %v2224_v30 = vadd.f32 %v2223_v28, %v4948_v41  ;;  %2486 = vmatpush.msra.mxu3 %v2398_v22 }
 0x2f5   : > { %v2388_v45 = vmax.f32 %v2192_v4, 0.0 }
 0x2f6   : > { %v2397_v12 = vmax.f32 %v2224_v30, 0.0  ;;  %2487 = vmatpush.msra.mxu3 %v2390_v16 }
 0x2f7   : > { %2447 = vmatpush.msra.mxu1 %v2388_v45 }
 0x2f8   : > { %2466 = vmatpush.msra.mxu2 %v2397_v12  ;;  %2488 = vmatpush.msra.mxu3 %v2382_v43  ;;  %v2408_v12 = vpop.permute.xlu2 %2407 }
 0x2f9   : > { %2448 = vmatpush.msra.mxu1 %v2380_v9  ;;  %v2410_v39 = vperm.slane %v2408_v12, 0 }
 0x2fa   : > { %2467 = vmatpush.msra.mxu2 %v2389_v15  ;;  %2489 = vmatpush.msra.mxu3 %v2374_v18 }
 0x2fb   : > { %2449 = vmatpush.msra.mxu1 %v2372_v5  ;;  %2863 = vmatmul.msk.f32.vlgmr.msra.gmra.mxu3 %vm2126_vm0, %v4971_v20 }
 0x2fc   : > { %2861 = vmatmul.msk.f32.vlgmr.msra.gmra.mxu1 %vm2126_vm0, %v4971_v20  ;;  %2468 = vmatpush.msra.mxu2 %v2381_v47 }
 0x2fe   : > { %2469 = vmatpush.msra.mxu2 %v2373_v17 }
 0x2ff   : > { %2862 = vmatmul.msk.f32.vlgmr.msra.gmra.mxu2 %vm2126_vm0, %v4971_v20 }
 0x346   : > { %v2272_v19 = vpop.f32.mrf.mxu0 }
 0x347   : > { %v2273_v1 = vadd.f32 %v2272_v19, %v4960_v46 }
 0x349   : > { %v2375_v26 = vmax.f32 %v2273_v1, 0.0 }
 0x34a   : > { %v2301_v23 = vpop.f32.mrf.mxu1 }
 0x34b   : > { %v2302_v4 = vadd.f32 %v2301_v23, %v4960_v46 }
 0x34d   : > { %v2376_v49 = vmax.f32 %v2302_v4, 0.0 }
 0x34e   : > { %v2275_v31 = vpop.f32.mrf.mxu0 }
 0x34f   : > { %v2276_v14 = vadd.f32 %v2275_v31, %v4954_v32 }
 0x351   : > { %v2383_v62 = vmax.f32 %v2276_v14, 0.0 }
 0x352   : > { %v2304_v53 = vpop.f32.mrf.mxu1 }
 0x353   : > { %v2305_v56 = vadd.f32 %v2304_v53, %v4954_v32 }
 0x355   : > { %v2384_v27 = vmax.f32 %v2305_v56, 0.0 }
 0x356   : > { %v2278_v35 = vpop.f32.mrf.mxu0 }
 0x357   : > { %v2279_v21 = vadd.f32 %v2278_v35, %v4950_v60 }
 0x359   : > { %v2391_v54 = vmax.f32 %v2279_v21, 0.0 }
 0x35a   : > { %v2330_v52 = vpop.f32.mrf.mxu2  ;;  %v2307_v42 = vpop.f32.mrf.mxu1 }
 0x35b   : > { %v2308_v55 = vadd.f32 %v2307_v42, %v4950_v60  ;;  %v2331_v0 = vadd.f32 %v2330_v52, %v4960_v46 }
 0x35d   : > { %v2392_v24 = vmax.f32 %v2308_v55, 0.0  ;;  %v2377_v40 = vmax.f32 %v2331_v0, 0.0 }
 0x35e   : > { %v2359_v59 = vpop.f32.mrf.mxu3  ;;  %v2281_v50 = vpop.f32.mrf.mxu0 }
 0x35f   : > { %v2282_v25 = vadd.f32 %v2281_v50, %v4948_v41  ;;  %v2360_v5 = vadd.f32 %v2359_v59, %v4960_v46 }
 0x361   : > { %v2399_v34 = vmax.f32 %v2282_v25, 0.0 }
 0x362   : > { %v2333_v51 = vpop.f32.mrf.mxu2  ;;  %v2310_v57 = vpop.f32.mrf.mxu1 }
 0x363   : > { %v2311_v10 = vadd.f32 %v2310_v57, %v4948_v41  ;;  %2506 = vmatpush.msrb.mxu0 %v2399_v34  ;;  %v2334_v44 = vadd.f32 %v2333_v51, %v4954_v32 }
 0x365   : > { %v2400_v58 = vmax.f32 %v2311_v10, 0.0  ;;  %2507 = vmatpush.msrb.mxu0 %v2391_v54  ;;  %v2385_v29 = vmax.f32 %v2334_v44, 0.0 }
 0x366   : > { %v2362_v61 = vpop.f32.mrf.mxu3 }
 0x367   : > { %2526 = vmatpush.msrb.mxu1 %v2400_v58  ;;  %2508 = vmatpush.msrb.mxu0 %v2383_v62  ;;  %v2363_v30 = vadd.f32 %v2362_v61, %v4954_v32 }
 0x369   : > { %2527 = vmatpush.msrb.mxu1 %v2392_v24  ;;  %2509 = vmatpush.msrb.mxu0 %v2375_v26  ;;  %v2386_v13 = vmax.f32 %v2363_v30, 0.0 }
 0x36a   : > { %v2336_v48 = vpop.f32.mrf.mxu2  ;;  %2864 = vmatmul.msk.f32.vlgmr.msrb.gmra.mxu0 %vm2126_vm0, %v4971_v20 }
 0x36b   : > { %2528 = vmatpush.msrb.mxu1 %v2384_v27  ;;  %v2337_v33 = vadd.f32 %v2336_v48, %v4950_v60 }
 0x36d   : > { %2529 = vmatpush.msrb.mxu1 %v2376_v49  ;;  %v2393_v7 = vmax.f32 %v2337_v33, 0.0 }
 0x36e   : > { %v2365_v2 = vpop.f32.mrf.mxu3  ;;  %2865 = vmatmul.msk.f32.vlgmr.msrb.gmra.mxu1 %vm2126_vm0, %v4971_v20 }
 0x36f   : > { %v2366_v9 = vadd.f32 %v2365_v2, %v4950_v60  ;;  %v2378_v60 = vmax.f32 %v2360_v5, 0.0 }
 0x371   : > { %v2394_v8 = vmax.f32 %v2366_v9, 0.0 }
 0x372   : > { %v2339_v36 = vpop.f32.mrf.mxu2 }
 0x373   : > { %v2340_v37 = vadd.f32 %v2339_v36, %v4948_v41 }
 0x375   : > { %v2401_v45 = vmax.f32 %v2340_v37, 0.0 }
 0x376   : > { %v2368_v63 = vpop.f32.mrf.mxu3 }
 0x377   : > { %v2369_v28 = vadd.f32 %v2368_v63, %v4948_v41  ;;  %2546 = vmatpush.msrb.mxu2 %v2401_v45  ;;  %v2431_v41 = vpop.f32.mrf.mxu0 }
 0x378   : > { %v2432_v59 = vadd.f32 %v2431_v41, %v2410_v39 }
 0x379   : > { %v2402_v38 = vmax.f32 %v2369_v28, 0.0  ;;  %2547 = vmatpush.msrb.mxu2 %v2393_v7  ;;  %v2451_v32 = vpop.f32.mrf.mxu1 }
 0x37a   : > { %v2452_v16 = vadd.f32 %v2451_v32, %v2410_v39 }
 0x37b   : > { %2566 = vmatpush.msrb.mxu3 %v2402_v38  ;;  %2548 = vmatpush.msrb.mxu2 %v2385_v29 }
 0x37c   : > { %v2582_v23 = vrot.slane %v2452_v16, 7 }
 0x37d   : > { %2567 = vmatpush.msrb.mxu3 %v2394_v8  ;;  %2549 = vmatpush.msrb.mxu2 %v2377_v40 }
 0x37e   : > { %2866 = vmatmul.msk.f32.vlgmr.msrb.gmra.mxu2 %vm2126_vm0, %v4971_v20  ;;  %v2491_v22 = vpop.f32.mrf.mxu3  ;;  %v2590_v25 = vsel %vm2589_vm2, %v2432_v59, %v2582_v23 }
 0x37f   : > { %2568 = vmatpush.msrb.mxu3 %v2386_v13  ;;  %v2492_v15 = vadd.f32 %v2491_v22, %v2410_v39 }
 0x381   : > { %2569 = vmatpush.msrb.mxu3 %v2378_v60  ;;  %v2584_v19 = vrot.slane %v2492_v15, 5 }
 0x382   : > { %2867 = vmatmul.msk.f32.vlgmr.msrb.gmra.mxu3 %vm2126_vm0, %v4971_v20  ;;  %v2471_v46 = vpop.f32.mrf.mxu2 }
 0x383   : > { %v2472_v11 = vadd.f32 %v2471_v46, %v2410_v39 }
 0x385   : > { %v2583_v20 = vrot.slane %v2472_v11, 6 }
 0x387   : > { %v2592_v50 = vsel %vm2591_vm1, %v2583_v20, %v2584_v19 }
 0x388   : > { %v2594_v51 = vsel %vm2593_vm3, %v2590_v25, %v2592_v50 }
 0x3e7   : > { %v2511_v6 = vpop.f32.mrf.mxu0 }
 0x3e8   : > { %v2512_v43 = vadd.f32 %v2511_v6, %v2410_v39 }
 0x3ea   : > { %v2585_v53 = vrot.slane %v2512_v43, 4 }
 0x3eb   : > { %v2531_v3 = vpop.f32.mrf.mxu1 }
 0x3ec   : > { %v2532_v17 = vadd.f32 %v2531_v3, %v2410_v39 }
 0x3ee   : > { %v2586_v35 = vrot.slane %v2532_v17, 3 }
 0x3f0   : > { %v2596_v14 = vsel %vm2595_vm4, %v2585_v53, %v2586_v35 }
 0x401   : > { %v2551_v47 = vpop.f32.mrf.mxu2 }
 0x402   : > { %v2552_v18 = vadd.f32 %v2551_v47, %v2410_v39 }
 0x404   : > { %v2587_v52 = vrot.slane %v2552_v18, 2 }
 0x405   : > { %v2571_v31 = vpop.f32.mrf.mxu3 }
 0x406   : > { %v2572_v42 = vadd.f32 %v2571_v31, %v2410_v39 }
 0x408   : > { %v2588_v21 = vrot.slane %v2572_v42, 1 }
 0x40a   : > { %v2598_v34 = vsel %vm2597_vm5, %v2587_v52, %v2588_v21 }
 0x40b   : > { %v2600_v57 = vsel %vm2599_vm6, %v2596_v14, %v2598_v34 }
 0x40c   : > { %v2602_v1 = vsel %vm2601_vm7, %v2594_v51, %v2600_v57 }
 0x40d   : > { %2604 = vst [vmem:[%s298_s6] sm:$0xff] %v2602_v1 }
 0x40e   : > { %2983 = shalt.err (!%p2980_p4)
}
 0x40f   : > { %2875 = dma.vmem_to_hbm [thread:$0]  (%p3119_p11), %s2619_s22, 128, %s2621_s24, %s2606_s25  }
 0x410 PF: > { %s2632_s16 = sand.u32 1, %s3010_s26   ;;  %p5056_p7 = scmp.ge.s32.totalorder %s3022_s29, 2 }
 0x411   : > { %s2633_s21 = scalar_lea.sflag [#allocation5], %s2632_s16 }
 0x412   : > { %p2882_p5 = pnand %p5056_p7, %p3123_p12 }
 0x414   : > { %p2883_p8 = pneg %p2882_p5 }
 0x416   : > { %3005 = dma.done.wait (%p2883_p8), %s2633_s21, 128  }
 0x417   : > { %3007 = vsyncadd (%p2883_p8), %s2633_s21, 4294967168  ;;  %p22_p10 = scmp.ge.s32.totalorder %s3094_s8, 4   ;;  %s5057_s26 = smov %s3014_s27 }
 0x418   : > { %s5058_s27 = smov %s3018_s28  ;;  %s5059_s28 = smov %s3106_s11 }
 0x419   : > { %s5060_s29 = smov %s3094_s8  ;;  %24 = sbr.rel (!%p22_p10) target bundleno = 8 (0x8), region = 93 }
 0x41e   :  { %2639 = vsyncpa [#allocation4], 1 }
 0x41f   :  { %2641 = vsyncpa [#allocation4 + $0x1], 1 }
 0x420   :  { %2642 = vsyncpa [#allocation5], 1 }
 0x421   :  { %2644 = vsyncpa [#allocation5 + $0x1], 1 }

</bundles_post_ra>
